<compile_context>
chip_gen: v7x
topology: tpu7x:2x2x1
jax: 0.10.0
libtpu: 0.0.40
codegen_flags: <defaults>
</compile_context>

<pallas_src>
import numpy as np
import jax
import jax.numpy as jnp
from jax.experimental import pallas as pl
from jax.experimental.pallas import tpu as pltpu


_TAPS = [(kd, kh, kw) for kd in range(3) for kh in range(3) for kw in range(3)]


def _interp_pad_matrix(s_in, s_out, lo, s_full):
    """Linear-interp matrix (align_corners=True) with the F.pad column offset
    folded in: rows = input index (s_in), cols = padded output index (s_full)."""
    m = np.zeros((s_in, s_full), dtype=np.float64)
    for o in range(s_out):
        coord = o * (s_in - 1) / (s_out - 1) if s_out > 1 else 0.0
        l = int(np.floor(coord))
        l = max(0, min(l, s_in - 1))
        h = min(l + 1, s_in - 1)
        t = coord - l
        m[l, lo + o] += 1.0 - t
        m[h, lo + o] += t
    return m


@jax.jit
def up3d_forward(x1, x2,
                 conv1_w, conv1_b, bn1_g, bn1_b, bn1_m, bn1_v,
                 conv2_w, conv2_b, bn2_g, bn2_b, bn2_m, bn2_v,
                 eps=1e-5):
    """Up3D.forward(x1, x2) with bilinear=True and eval-mode BatchNorm."""
    N, C1, D1, H1, W1 = x1.shape
    N2, C2, D2, H2, W2 = x2.shape
    assert N == N2
    C_CAT = C1 + C2
    C_OUT = conv1_w.shape[0]
    assert conv1_w.shape == (C_OUT, C_CAT, 3, 3, 3)
    assert conv2_w.shape == (C_OUT, C_OUT, 3, 3, 3)

    V1 = D1 * H1 * W1
    V2 = D2 * H2 * W2  # lane axis inside the kernel (512 here: lane-dense)

    D_UP, H_UP, W_UP = 2 * D1, 2 * H1, 2 * W1
    dz, dy, dx = D2 - D_UP, H2 - H_UP, W2 - W_UP
    assert dz >= 0 and dy >= 0 and dx >= 0, "x2 must be >= upsampled x1"
    ZLO, YLO, XLO = dz // 2, dy // 2, dx // 2

    # ---- trilinear upsample (+ F.pad placement) as a single (V1, V2) matrix ----
    m_up = np.kron(
        _interp_pad_matrix(D1, D_UP, ZLO, D2),
        np.kron(_interp_pad_matrix(H1, H_UP, YLO, H2),
                _interp_pad_matrix(W1, W_UP, XLO, W2))).astype(np.float32)
    m_up = jnp.asarray(m_up)                                       # (V1, V2)

    # ---- per-tap flat-index shift + 0/1 validity mask (conv zero padding) ----
    offs = [(kd - 1) * H2 * W2 + (kh - 1) * W2 + (kw - 1) for kd, kh, kw in _TAPS]
    dd = np.arange(D2)[:, None, None]
    hh = np.arange(H2)[None, :, None]
    ww = np.arange(W2)[None, None, :]
    masks_np = np.zeros((27, V2), np.float32)
    for t, (kd, kh, kw) in enumerate(_TAPS):
        valid = ((dd + kd - 1 >= 0) & (dd + kd - 1 < D2) &
                 (hh + kh - 1 >= 0) & (hh + kh - 1 < H2) &
                 (ww + kw - 1 >= 0) & (ww + kw - 1 < W2))
        masks_np[t] = valid.reshape(-1).astype(np.float32)
    masks = jnp.asarray(masks_np)                                  # (27, V2)

    # ---- fold inference-mode BatchNorm3d + conv bias into weights / shifts ----
    sc1 = bn1_g / jnp.sqrt(bn1_v + eps)
    w1t = jnp.transpose(conv1_w * sc1[:, None, None, None, None],
                        (2, 3, 4, 0, 1)).reshape(27, C_OUT, C_CAT).astype(jnp.float32)
    s1 = ((conv1_b - bn1_m) * sc1 + bn1_b).reshape(C_OUT, 1).astype(jnp.float32)
    sc2 = bn2_g / jnp.sqrt(bn2_v + eps)
    w2t = jnp.transpose(conv2_w * sc2[:, None, None, None, None],
                        (2, 3, 4, 0, 1)).reshape(27, C_OUT, C_OUT).astype(jnp.float32)
    s2 = ((conv2_b - bn2_m) * sc2 + bn2_b).reshape(C_OUT, 1).astype(jnp.float32)

    # Halo width: >= max |flat tap shift|, rounded to a lane multiple so the
    # centre region of the scratch starts lane-aligned.
    max_off = H2 * W2 + W2 + 1
    LPAD = ((max_off + 127) // 128) * 128
    PADW = V2 + 2 * LPAD
    C_PA = max(C_CAT, C_OUT)

    def kernel(x1_ref, x2_ref, mup_ref, mask_ref, w1_ref, w2_ref,
               s1_ref, s2_ref, o_ref, pad_ref):
        f32 = jnp.float32

        # Re-zero only the tiny halo bands each step (zero borders supply the
        # convs' "padding=1"; m_up's zero columns already supply the F.pad).
        zband = jnp.zeros((C_PA, LPAD), f32)
        pad_ref[:, 0:LPAD] = zband
        pad_ref[:, LPAD + V2:PADW] = zband

        # Trilinear upsample + F.pad placement: one MXU matmul.
        up = jnp.dot(x1_ref[...].astype(f32), mup_ref[...],
                     preferred_element_type=f32)                   # (C1, V2)

        # Channel concat [x2, up(x1)] = two row-range stores into one scratch.
        pad_ref[0:C2, LPAD:LPAD + V2] = x2_ref[...].astype(f32)
        pad_ref[C2:C2 + C1, LPAD:LPAD + V2] = up

        def conv3x3x3_bn_relu(c_in, w_ref, s_ref):
            acc = jnp.zeros((C_OUT, V2), f32)
            for t, off in enumerate(offs):
                window = pad_ref[0:c_in, LPAD + off:LPAD + off + V2]   # (c_in, V2)
                window = window * mask_ref[t:t + 1, :]
                acc = acc + jnp.dot(w_ref[t], window, preferred_element_type=f32)
            return jnp.maximum(acc + s_ref[...], 0.0)              # (C_OUT, V2)

        mid = conv3x3x3_bn_relu(C_CAT, w1_ref, s1_ref)
        pad_ref[0:C_OUT, LPAD:LPAD + V2] = mid
        o_ref[...] = conv3x3x3_bn_relu(C_OUT, w2_ref, s2_ref).astype(o_ref.dtype)

    flops = 2 * N * (C1 * V1 * V2 + 27 * V2 * (C_CAT * C_OUT + C_OUT * C_OUT))
    bytes_accessed = 4 * (x1.size + x2.size + N * C_OUT * V2
                          + m_up.size + masks.size + w1t.size + w2t.size + 2 * C_OUT)

    out = pl.pallas_call(
        kernel,
        out_shape=jax.ShapeDtypeStruct((N, C_OUT, V2), jnp.float32),
        grid=(N,),
        in_specs=[
            pl.BlockSpec((None, C1, V1), lambda n: (n, 0, 0)),        # x1 (flat spatial)
            pl.BlockSpec((None, C2, V2), lambda n: (n, 0, 0)),        # x2 (flat spatial)
            pl.BlockSpec((V1, V2), lambda n: (0, 0)),                 # upsample matrix
            pl.BlockSpec((27, V2), lambda n: (0, 0)),                 # tap masks
            pl.BlockSpec((27, C_OUT, C_CAT), lambda n: (0, 0, 0)),    # conv1 weights (BN folded)
            pl.BlockSpec((27, C_OUT, C_OUT), lambda n: (0, 0, 0)),    # conv2 weights (BN folded)
            pl.BlockSpec((C_OUT, 1), lambda n: (0, 0)),               # conv1 shift
            pl.BlockSpec((C_OUT, 1), lambda n: (0, 0)),               # conv2 shift
        ],
        out_specs=pl.BlockSpec((None, C_OUT, V2), lambda n: (n, 0, 0)),
        scratch_shapes=[pltpu.VMEM((C_PA, PADW), jnp.float32)],       # zero-halo work slab
        compiler_params=pltpu.CompilerParams(
            dimension_semantics=("parallel",),
            vmem_limit_bytes=32 * 1024 * 1024,
        ),
        cost_estimate=pl.CostEstimate(
            flops=int(flops), transcendentals=0, bytes_accessed=int(bytes_accessed)),
    )(x1.reshape(N, C1, V1), x2.reshape(N, C2, V2),
      m_up, masks, w1t, w2t, s1, s2)

    # Free contiguous reshape back to NCDHW.
    return out.reshape(N, C_OUT, D2, H2, W2)


# ---------------------------- pure-JAX reference ----------------------------

def _upsample_trilinear_ref(x):
    """nn.Upsample(scale_factor=2, mode='trilinear', align_corners=True)."""
    def interp_axis(v, axis):
        s_in = v.shape[axis]
        s_out = 2 * s_in
        if s_out > 1:
            coord = jnp.arange(s_out, dtype=jnp.float32) * (s_in - 1) / (s_out - 1)
        else:
            coord = jnp.zeros((s_out,), jnp.float32)
        lo = jnp.clip(jnp.floor(coord).astype(jnp.int32), 0, s_in - 1)
        hi = jnp.clip(lo + 1, 0, s_in - 1)
        t = coord - lo.astype(jnp.float32)
        vlo = jnp.take(v, lo, axis=axis)
        vhi = jnp.take(v, hi, axis=axis)
        shp = [1] * v.ndim
        shp[axis] = s_out
        t = t.reshape(shp)
        return vlo * (1.0 - t) + vhi * t

    x = interp_axis(x, 2)
    x = interp_axis(x, 3)
    x = interp_axis(x, 4)
    return x


def up3d_reference(x1, x2,
                   conv1_w, conv1_b, bn1_g, bn1_b, bn1_m, bn1_v,
                   conv2_w, conv2_b, bn2_g, bn2_b, bn2_m, bn2_v,
                   eps=1e-5):
    x1u = _upsample_trilinear_ref(x1)
    dz = x2.shape[2] - x1u.shape[2]
    dy = x2.shape[3] - x1u.shape[3]
    dx = x2.shape[4] - x1u.shape[4]
    x1p = jnp.pad(x1u, ((0, 0), (0, 0),
                        (dz // 2, dz - dz // 2),
                        (dy // 2, dy - dy // 2),
                        (dx // 2, dx - dx // 2)))
    x = jnp.concatenate([x2, x1p], axis=1)

    def conv_bn_relu(v, w, b, g, bb, m, var):
        y = jax.lax.conv_general_dilated(
            v, w, window_strides=(1, 1, 1), padding=((1, 1), (1, 1), (1, 1)),
            dimension_numbers=("NCDHW", "OIDHW", "NCDHW"),
            precision=jax.lax.Precision.HIGHEST)
        y = y + b[None, :, None, None, None]
        y = (y - m[None, :, None, None, None]) / jnp.sqrt(var + eps)[None, :, None, None, None]
        y = y * g[None, :, None, None, None] + bb[None, :, None, None, None]
        return jnp.maximum(y, 0.0)

    y = conv_bn_relu(x, conv1_w, conv1_b, bn1_g, bn1_b, bn1_m, bn1_v)
    y = conv_bn_relu(y, conv2_w, conv2_b, bn2_g, bn2_b, bn2_m, bn2_v)
    return y


if __name__ == "__main__":
    key = jax.random.PRNGKey(0)
    keys = jax.random.split(key, 16)

    N = 2
    C1, C2 = 4, 4            # x1 (decoder) channels, x2 (skip) channels
    C_IN = C1 + C2           # Up3D in_channels (after concat)
    C_OUT = 4                # Up3D out_channels
    D1, H1, W1 = 3, 4, 4     # x1 spatial (pre-upsample)
    D2, H2, W2 = 8, 8, 8     # x2 spatial (forces a diffZ=2 F.pad)

    x1 = jax.random.normal(keys[0], (N, C1, D1, H1, W1), dtype=jnp.float32)
    x2 = jax.random.normal(keys[1], (N, C2, D2, H2, W2), dtype=jnp.float32)

    conv1_w = 0.1 * jax.random.normal(keys[2], (C_OUT, C_IN, 3, 3, 3), jnp.float32)
    conv1_b = 0.1 * jax.random.normal(keys[3], (C_OUT,), jnp.float32)
    bn1_g = 1.0 + 0.1 * jax.random.normal(keys[4], (C_OUT,), jnp.float32)
    bn1_b = 0.1 * jax.random.normal(keys[5], (C_OUT,), jnp.float32)
    bn1_m = 0.1 * jax.random.normal(keys[6], (C_OUT,), jnp.float32)
    bn1_v = 1.0 + 0.5 * jax.random.uniform(keys[7], (C_OUT,), dtype=jnp.float32)

    conv2_w = 0.1 * jax.random.normal(keys[8], (C_OUT, C_OUT, 3, 3, 3), jnp.float32)
    conv2_b = 0.1 * jax.random.normal(keys[9], (C_OUT,), jnp.float32)
    bn2_g = 1.0 + 0.1 * jax.random.normal(keys[10], (C_OUT,), jnp.float32)
    bn2_b = 0.1 * jax.random.normal(keys[11], (C_OUT,), jnp.float32)
    bn2_m = 0.1 * jax.random.normal(keys[12], (C_OUT,), jnp.float32)
    bn2_v = 1.0 + 0.5 * jax.random.uniform(keys[13], (C_OUT,), dtype=jnp.float32)

    args = (x1, x2,
            conv1_w, conv1_b, bn1_g, bn1_b, bn1_m, bn1_v,
            conv2_w, conv2_b, bn2_g, bn2_b, bn2_m, bn2_v)

    out = up3d_forward(*args)
    out = jax.block_until_ready(out)

    ref = up3d_reference(*args)
    ref = jax.block_until_ready(ref)

    assert out.shape == (N, C_OUT, D2, H2, W2), out.shape
    max_err = float(jnp.max(jnp.abs(out - ref)))
    assert max_err < 2e-3, f"max abs err = {max_err}"
    print("KERNEL_OK")
</pallas_src>

<mosaic_0001>
module attributes {stable_mosaic.version = 11 : i64} {
  func.func @kernel(%arg0: i32, %arg1: memref<1x4x48xf32, #tpu.memory_space<vmem>>, %arg2: memref<1x4x512xf32, #tpu.memory_space<vmem>>, %arg3: memref<48x512xf32, #tpu.memory_space<vmem>>, %arg4: memref<27x512xf32, #tpu.memory_space<vmem>>, %arg5: memref<27x4x8xf32, #tpu.memory_space<vmem>>, %arg6: memref<27x4x4xf32, #tpu.memory_space<vmem>>, %arg7: memref<4x1xf32, #tpu.memory_space<vmem>>, %arg8: memref<4x1xf32, #tpu.memory_space<vmem>>, %arg9: memref<1x4x512xf32, #tpu.memory_space<vmem>>, %arg10: memref<8x768xf32, #tpu.memory_space<vmem>>) attributes {dimension_semantics = [#tpu.dimension_semantics<parallel>], iteration_bounds = array<i64: 2>, scalar_prefetch = 0 : i64, scratch_operands = 1 : i64, tpu.core_type = #tpu.core_type<tc>, window_params = [{transform_indices = @transform_0, window_bounds = array<i64: 1, 4, 48>}, {transform_indices = @transform_1, window_bounds = array<i64: 1, 4, 512>}, {pipeline_mode = #tpu.pipeline_mode<synchronous>, transform_indices = @transform_2, window_bounds = array<i64: 48, 512>}, {pipeline_mode = #tpu.pipeline_mode<synchronous>, transform_indices = @transform_3, window_bounds = array<i64: 27, 512>}, {pipeline_mode = #tpu.pipeline_mode<synchronous>, transform_indices = @transform_4, window_bounds = array<i64: 27, 4, 8>}, {pipeline_mode = #tpu.pipeline_mode<synchronous>, transform_indices = @transform_5, window_bounds = array<i64: 27, 4, 4>}, {pipeline_mode = #tpu.pipeline_mode<synchronous>, transform_indices = @transform_6, window_bounds = array<i64: 4, 1>}, {pipeline_mode = #tpu.pipeline_mode<synchronous>, transform_indices = @transform_7, window_bounds = array<i64: 4, 1>}, {transform_indices = @transform_8, window_bounds = array<i64: 1, 4, 512>}]} {
    %cst = arith.constant 0.000000e+00 : f32
    %0 = vector.broadcast %cst : f32 to vector<8x128xf32>
    %c0 = arith.constant 0 : index
    %c0_0 = arith.constant 0 : index
    %1 = vector.load %arg10[%c0, %c0_0] : memref<8x768xf32, #tpu.memory_space<vmem>>, vector<8x128xf32>
    tpu.vector_store %arg10[%c0, %c0_0], %0 {strides = array<i32>} : memref<8x768xf32, #tpu.memory_space<vmem>>, vector<8x128xf32>,
    %c0_1 = arith.constant 0 : index
    %c640 = arith.constant 640 : index
    %2 = vector.load %arg10[%c0_1, %c640] : memref<8x768xf32, #tpu.memory_space<vmem>>, vector<8x128xf32>
    tpu.vector_store %arg10[%c0_1, %c640], %0 {strides = array<i32>} : memref<8x768xf32, #tpu.memory_space<vmem>>, vector<8x128xf32>,
    %c0_2 = arith.constant 0 : index
    %c0_3 = arith.constant 0 : index
    %c0_4 = arith.constant 0 : index
    %3 = vector.load %arg1[%c0_2, %c0_3, %c0_4] : memref<1x4x48xf32, #tpu.memory_space<vmem>>, vector<1x4x48xf32>
    %4 = vector.shape_cast %3 : vector<1x4x48xf32> to vector<4x48xf32>
    %c0_5 = arith.constant 0 : index
    %c0_6 = arith.constant 0 : index
    %5 = vector.load %arg3[%c0_5, %c0_6] : memref<48x512xf32, #tpu.memory_space<vmem>>, vector<48x512xf32>
    %cst_7 = arith.constant dense<0.000000e+00> : vector<4x512xf32>
    %6 = tpu.matmul %4, %5, %cst_7 {dimension_numbers = #tpu.dot_dimension_numbers<[1], [0], [0], [1], [0, 0, 1, 1], [], []>} : vector<4x48xf32>, vector<48x512xf32>, vector<4x512xf32> -> vector<4x512xf32>
    %c0_8 = arith.constant 0 : index
    %c0_9 = arith.constant 0 : index
    %c0_10 = arith.constant 0 : index
    %7 = vector.load %arg2[%c0_8, %c0_9, %c0_10] : memref<1x4x512xf32, #tpu.memory_space<vmem>>, vector<1x4x512xf32>
    %8 = vector.shape_cast %7 : vector<1x4x512xf32> to vector<4x512xf32>
    %c0_11 = arith.constant 0 : index
    %c128 = arith.constant 128 : index
    %9 = vector.load %arg10[%c0_11, %c128] : memref<8x768xf32, #tpu.memory_space<vmem>>, vector<4x512xf32>
    tpu.vector_store %arg10[%c0_11, %c128], %8 {strides = array<i32>} : memref<8x768xf32, #tpu.memory_space<vmem>>, vector<4x512xf32>,
    %c4 = arith.constant 4 : index
    %c128_12 = arith.constant 128 : index
    %10 = vector.load %arg10[%c4, %c128_12] : memref<8x768xf32, #tpu.memory_space<vmem>>, vector<4x512xf32>
    tpu.vector_store %arg10[%c4, %c128_12], %6 {strides = array<i32>} : memref<8x768xf32, #tpu.memory_space<vmem>>, vector<4x512xf32>,
    %cst_13 = arith.constant 0.000000e+00 : f32
    %11 = vector.broadcast %cst_13 : f32 to vector<4x512xf32>
    %c0_14 = arith.constant 0 : index
    %c55 = arith.constant 55 : index
    %12 = vector.load %arg10[%c0_14, %c55] : memref<8x768xf32, #tpu.memory_space<vmem>>, vector<8x512xf32>
    %c0_15 = arith.constant 0 : index
    %c0_16 = arith.constant 0 : index
    %13 = vector.load %arg4[%c0_15, %c0_16] : memref<27x512xf32, #tpu.memory_space<vmem>>, vector<1x512xf32>
    %14 = vector.broadcast %13 : vector<1x512xf32> to vector<8x512xf32>
    %15 = arith.mulf %12, %14 : vector<8x512xf32>
    %c0_17 = arith.constant 0 : index
    %c0_18 = arith.constant 0 : index
    %c0_19 = arith.constant 0 : index
    %16 = vector.load %arg5[%c0_17, %c0_18, %c0_19] : memref<27x4x8xf32, #tpu.memory_space<vmem>>, vector<1x4x8xf32>
    %17 = vector.shape_cast %16 : vector<1x4x8xf32> to vector<4x8xf32>
    %cst_20 = arith.constant dense<0.000000e+00> : vector<4x512xf32>
    %18 = tpu.matmul %17, %15, %cst_20 {dimension_numbers = #tpu.dot_dimension_numbers<[1], [0], [0], [1], [0, 0, 1, 1], [], []>} : vector<4x8xf32>, vector<8x512xf32>, vector<4x512xf32> -> vector<4x512xf32>
    %19 = arith.addf %11, %18 : vector<4x512xf32>
    %c0_21 = arith.constant 0 : index
    %c56 = arith.constant 56 : index
    %20 = vector.load %arg10[%c0_21, %c56] : memref<8x768xf32, #tpu.memory_space<vmem>>, vector<8x512xf32>
    %c1 = arith.constant 1 : index
    %c0_22 = arith.constant 0 : index
    %21 = vector.load %arg4[%c1, %c0_22] : memref<27x512xf32, #tpu.memory_space<vmem>>, vector<1x512xf32>
    %22 = vector.broadcast %21 : vector<1x512xf32> to vector<8x512xf32>
    %23 = arith.mulf %20, %22 : vector<8x512xf32>
    %c1_23 = arith.constant 1 : index
    %c0_24 = arith.constant 0 : index
    %c0_25 = arith.constant 0 : index
    %24 = vector.load %arg5[%c1_23, %c0_24, %c0_25] : memref<27x4x8xf32, #tpu.memory_space<vmem>>, vector<1x4x8xf32>
    %25 = vector.shape_cast %24 : vector<1x4x8xf32> to vector<4x8xf32>
    %cst_26 = arith.constant dense<0.000000e+00> : vector<4x512xf32>
    %26 = tpu.matmul %25, %23, %cst_26 {dimension_numbers = #tpu.dot_dimension_numbers<[1], [0], [0], [1], [0, 0, 1, 1], [], []>} : vector<4x8xf32>, vector<8x512xf32>, vector<4x512xf32> -> vector<4x512xf32>
    %27 = arith.addf %19, %26 : vector<4x512xf32>
    %c0_27 = arith.constant 0 : index
    %c57 = arith.constant 57 : index
    %28 = vector.load %arg10[%c0_27, %c57] : memref<8x768xf32, #tpu.memory_space<vmem>>, vector<8x512xf32>
    %c2 = arith.constant 2 : index
    %c0_28 = arith.constant 0 : index
    %29 = vector.load %arg4[%c2, %c0_28] : memref<27x512xf32, #tpu.memory_space<vmem>>, vector<1x512xf32>
    %30 = vector.broadcast %29 : vector<1x512xf32> to vector<8x512xf32>
    %31 = arith.mulf %28, %30 : vector<8x512xf32>
    %c2_29 = arith.constant 2 : index
    %c0_30 = arith.constant 0 : index
    %c0_31 = arith.constant 0 : index
    %32 = vector.load %arg5[%c2_29, %c0_30, %c0_31] : memref<27x4x8xf32, #tpu.memory_space<vmem>>, vector<1x4x8xf32>
    %33 = vector.shape_cast %32 : vector<1x4x8xf32> to vector<4x8xf32>
    %cst_32 = arith.constant dense<0.000000e+00> : vector<4x512xf32>
    %34 = tpu.matmul %33, %31, %cst_32 {dimension_numbers = #tpu.dot_dimension_numbers<[1], [0], [0], [1], [0, 0, 1, 1], [], []>} : vector<4x8xf32>, vector<8x512xf32>, vector<4x512xf32> -> vector<4x512xf32>
    %35 = arith.addf %27, %34 : vector<4x512xf32>
    %c0_33 = arith.constant 0 : index
    %c63 = arith.constant 63 : index
    %36 = vector.load %arg10[%c0_33, %c63] : memref<8x768xf32, #tpu.memory_space<vmem>>, vector<8x512xf32>
    %c3 = arith.constant 3 : index
    %c0_34 = arith.constant 0 : index
    %37 = vector.load %arg4[%c3, %c0_34] : memref<27x512xf32, #tpu.memory_space<vmem>>, vector<1x512xf32>
    %38 = vector.broadcast %37 : vector<1x512xf32> to vector<8x512xf32>
    %39 = arith.mulf %36, %38 : vector<8x512xf32>
    %c3_35 = arith.constant 3 : index
    %c0_36 = arith.constant 0 : index
    %c0_37 = arith.constant 0 : index
    %40 = vector.load %arg5[%c3_35, %c0_36, %c0_37] : memref<27x4x8xf32, #tpu.memory_space<vmem>>, vector<1x4x8xf32>
    %41 = vector.shape_cast %40 : vector<1x4x8xf32> to vector<4x8xf32>
    %cst_38 = arith.constant dense<0.000000e+00> : vector<4x512xf32>
    %42 = tpu.matmul %41, %39, %cst_38 {dimension_numbers = #tpu.dot_dimension_numbers<[1], [0], [0], [1], [0, 0, 1, 1], [], []>} : vector<4x8xf32>, vector<8x512xf32>, vector<4x512xf32> -> vector<4x512xf32>
    %43 = arith.addf %35, %42 : vector<4x512xf32>
    %c0_39 = arith.constant 0 : index
    %c64 = arith.constant 64 : index
    %44 = vector.load %arg10[%c0_39, %c64] : memref<8x768xf32, #tpu.memory_space<vmem>>, vector<8x512xf32>
    %c4_40 = arith.constant 4 : index
    %c0_41 = arith.constant 0 : index
    %45 = vector.load %arg4[%c4_40, %c0_41] : memref<27x512xf32, #tpu.memory_space<vmem>>, vector<1x512xf32>
    %46 = vector.broadcast %45 : vector<1x512xf32> to vector<8x512xf32>
    %47 = arith.mulf %44, %46 : vector<8x512xf32>
    %c4_42 = arith.constant 4 : index
    %c0_43 = arith.constant 0 : index
    %c0_44 = arith.constant 0 : index
    %48 = vector.load %arg5[%c4_42, %c0_43, %c0_44] : memref<27x4x8xf32, #tpu.memory_space<vmem>>, vector<1x4x8xf32>
    %49 = vector.shape_cast %48 : vector<1x4x8xf32> to vector<4x8xf32>
    %cst_45 = arith.constant dense<0.000000e+00> : vector<4x512xf32>
    %50 = tpu.matmul %49, %47, %cst_45 {dimension_numbers = #tpu.dot_dimension_numbers<[1], [0], [0], [1], [0, 0, 1, 1], [], []>} : vector<4x8xf32>, vector<8x512xf32>, vector<4x512xf32> -> vector<4x512xf32>
    %51 = arith.addf %43, %50 : vector<4x512xf32>
    %c0_46 = arith.constant 0 : index
    %c65 = arith.constant 65 : index
    %52 = vector.load %arg10[%c0_46, %c65] : memref<8x768xf32, #tpu.memory_space<vmem>>, vector<8x512xf32>
    %c5 = arith.constant 5 : index
    %c0_47 = arith.constant 0 : index
    %53 = vector.load %arg4[%c5, %c0_47] : memref<27x512xf32, #tpu.memory_space<vmem>>, vector<1x512xf32>
    %54 = vector.broadcast %53 : vector<1x512xf32> to vector<8x512xf32>
    %55 = arith.mulf %52, %54 : vector<8x512xf32>
    %c5_48 = arith.constant 5 : index
    %c0_49 = arith.constant 0 : index
    %c0_50 = arith.constant 0 : index
    %56 = vector.load %arg5[%c5_48, %c0_49, %c0_50] : memref<27x4x8xf32, #tpu.memory_space<vmem>>, vector<1x4x8xf32>
    %57 = vector.shape_cast %56 : vector<1x4x8xf32> to vector<4x8xf32>
    %cst_51 = arith.constant dense<0.000000e+00> : vector<4x512xf32>
    %58 = tpu.matmul %57, %55, %cst_51 {dimension_numbers = #tpu.dot_dimension_numbers<[1], [0], [0], [1], [0, 0, 1, 1], [], []>} : vector<4x8xf32>, vector<8x512xf32>, vector<4x512xf32> -> vector<4x512xf32>
    %59 = arith.addf %51, %58 : vector<4x512xf32>
    %c0_52 = arith.constant 0 : index
    %c71 = arith.constant 71 : index
    %60 = vector.load %arg10[%c0_52, %c71] : memref<8x768xf32, #tpu.memory_space<vmem>>, vector<8x512xf32>
    %c6 = arith.constant 6 : index
    %c0_53 = arith.constant 0 : index
    %61 = vector.load %arg4[%c6, %c0_53] : memref<27x512xf32, #tpu.memory_space<vmem>>, vector<1x512xf32>
    %62 = vector.broadcast %61 : vector<1x512xf32> to vector<8x512xf32>
    %63 = arith.mulf %60, %62 : vector<8x512xf32>
    %c6_54 = arith.constant 6 : index
    %c0_55 = arith.constant 0 : index
    %c0_56 = arith.constant 0 : index
    %64 = vector.load %arg5[%c6_54, %c0_55, %c0_56] : memref<27x4x8xf32, #tpu.memory_space<vmem>>, vector<1x4x8xf32>
    %65 = vector.shape_cast %64 : vector<1x4x8xf32> to vector<4x8xf32>
    %cst_57 = arith.constant dense<0.000000e+00> : vector<4x512xf32>
    %66 = tpu.matmul %65, %63, %cst_57 {dimension_numbers = #tpu.dot_dimension_numbers<[1], [0], [0], [1], [0, 0, 1, 1], [], []>} : vector<4x8xf32>, vector<8x512xf32>, vector<4x512xf32> -> vector<4x512xf32>
    %67 = arith.addf %59, %66 : vector<4x512xf32>
    %c0_58 = arith.constant 0 : index
    %c72 = arith.constant 72 : index
    %68 = vector.load %arg10[%c0_58, %c72] : memref<8x768xf32, #tpu.memory_space<vmem>>, vector<8x512xf32>
    %c7 = arith.constant 7 : index
    %c0_59 = arith.constant 0 : index
    %69 = vector.load %arg4[%c7, %c0_59] : memref<27x512xf32, #tpu.memory_space<vmem>>, vector<1x512xf32>
    %70 = vector.broadcast %69 : vector<1x512xf32> to vector<8x512xf32>
    %71 = arith.mulf %68, %70 : vector<8x512xf32>
    %c7_60 = arith.constant 7 : index
    %c0_61 = arith.constant 0 : index
    %c0_62 = arith.constant 0 : index
    %72 = vector.load %arg5[%c7_60, %c0_61, %c0_62] : memref<27x4x8xf32, #tpu.memory_space<vmem>>, vector<1x4x8xf32>
    %73 = vector.shape_cast %72 : vector<1x4x8xf32> to vector<4x8xf32>
    %cst_63 = arith.constant dense<0.000000e+00> : vector<4x512xf32>
    %74 = tpu.matmul %73, %71, %cst_63 {dimension_numbers = #tpu.dot_dimension_numbers<[1], [0], [0], [1], [0, 0, 1, 1], [], []>} : vector<4x8xf32>, vector<8x512xf32>, vector<4x512xf32> -> vector<4x512xf32>
    %75 = arith.addf %67, %74 : vector<4x512xf32>
    %c0_64 = arith.constant 0 : index
    %c73 = arith.constant 73 : index
    %76 = vector.load %arg10[%c0_64, %c73] : memref<8x768xf32, #tpu.memory_space<vmem>>, vector<8x512xf32>
    %c8 = arith.constant 8 : index
    %c0_65 = arith.constant 0 : index
    %77 = vector.load %arg4[%c8, %c0_65] : memref<27x512xf32, #tpu.memory_space<vmem>>, vector<1x512xf32>
    %78 = vector.broadcast %77 : vector<1x512xf32> to vector<8x512xf32>
    %79 = arith.mulf %76, %78 : vector<8x512xf32>
    %c8_66 = arith.constant 8 : index
    %c0_67 = arith.constant 0 : index
    %c0_68 = arith.constant 0 : index
    %80 = vector.load %arg5[%c8_66, %c0_67, %c0_68] : memref<27x4x8xf32, #tpu.memory_space<vmem>>, vector<1x4x8xf32>
    %81 = vector.shape_cast %80 : vector<1x4x8xf32> to vector<4x8xf32>
    %cst_69 = arith.constant dense<0.000000e+00> : vector<4x512xf32>
    %82 = tpu.matmul %81, %79, %cst_69 {dimension_numbers = #tpu.dot_dimension_numbers<[1], [0], [0], [1], [0, 0, 1, 1], [], []>} : vector<4x8xf32>, vector<8x512xf32>, vector<4x512xf32> -> vector<4x512xf32>
    %83 = arith.addf %75, %82 : vector<4x512xf32>
    %c0_70 = arith.constant 0 : index
    %c119 = arith.constant 119 : index
    %84 = vector.load %arg10[%c0_70, %c119] : memref<8x768xf32, #tpu.memory_space<vmem>>, vector<8x512xf32>
    %c9 = arith.constant 9 : index
    %c0_71 = arith.constant 0 : index
    %85 = vector.load %arg4[%c9, %c0_71] : memref<27x512xf32, #tpu.memory_space<vmem>>, vector<1x512xf32>
    %86 = vector.broadcast %85 : vector<1x512xf32> to vector<8x512xf32>
    %87 = arith.mulf %84, %86 : vector<8x512xf32>
    %c9_72 = arith.constant 9 : index
    %c0_73 = arith.constant 0 : index
    %c0_74 = arith.constant 0 : index
    %88 = vector.load %arg5[%c9_72, %c0_73, %c0_74] : memref<27x4x8xf32, #tpu.memory_space<vmem>>, vector<1x4x8xf32>
    %89 = vector.shape_cast %88 : vector<1x4x8xf32> to vector<4x8xf32>
    %cst_75 = arith.constant dense<0.000000e+00> : vector<4x512xf32>
    %90 = tpu.matmul %89, %87, %cst_75 {dimension_numbers = #tpu.dot_dimension_numbers<[1], [0], [0], [1], [0, 0, 1, 1], [], []>} : vector<4x8xf32>, vector<8x512xf32>, vector<4x512xf32> -> vector<4x512xf32>
    %91 = arith.addf %83, %90 : vector<4x512xf32>
    %c0_76 = arith.constant 0 : index
    %c120 = arith.constant 120 : index
    %92 = vector.load %arg10[%c0_76, %c120] : memref<8x768xf32, #tpu.memory_space<vmem>>, vector<8x512xf32>
    %c10 = arith.constant 10 : index
    %c0_77 = arith.constant 0 : index
    %93 = vector.load %arg4[%c10, %c0_77] : memref<27x512xf32, #tpu.memory_space<vmem>>, vector<1x512xf32>
    %94 = vector.broadcast %93 : vector<1x512xf32> to vector<8x512xf32>
    %95 = arith.mulf %92, %94 : vector<8x512xf32>
    %c10_78 = arith.constant 10 : index
    %c0_79 = arith.constant 0 : index
    %c0_80 = arith.constant 0 : index
    %96 = vector.load %arg5[%c10_78, %c0_79, %c0_80] : memref<27x4x8xf32, #tpu.memory_space<vmem>>, vector<1x4x8xf32>
    %97 = vector.shape_cast %96 : vector<1x4x8xf32> to vector<4x8xf32>
    %cst_81 = arith.constant dense<0.000000e+00> : vector<4x512xf32>
    %98 = tpu.matmul %97, %95, %cst_81 {dimension_numbers = #tpu.dot_dimension_numbers<[1], [0], [0], [1], [0, 0, 1, 1], [], []>} : vector<4x8xf32>, vector<8x512xf32>, vector<4x512xf32> -> vector<4x512xf32>
    %99 = arith.addf %91, %98 : vector<4x512xf32>
    %c0_82 = arith.constant 0 : index
    %c121 = arith.constant 121 : index
    %100 = vector.load %arg10[%c0_82, %c121] : memref<8x768xf32, #tpu.memory_space<vmem>>, vector<8x512xf32>
    %c11 = arith.constant 11 : index
    %c0_83 = arith.constant 0 : index
    %101 = vector.load %arg4[%c11, %c0_83] : memref<27x512xf32, #tpu.memory_space<vmem>>, vector<1x512xf32>
    %102 = vector.broadcast %101 : vector<1x512xf32> to vector<8x512xf32>
    %103 = arith.mulf %100, %102 : vector<8x512xf32>
    %c11_84 = arith.constant 11 : index
    %c0_85 = arith.constant 0 : index
    %c0_86 = arith.constant 0 : index
    %104 = vector.load %arg5[%c11_84, %c0_85, %c0_86] : memref<27x4x8xf32, #tpu.memory_space<vmem>>, vector<1x4x8xf32>
    %105 = vector.shape_cast %104 : vector<1x4x8xf32> to vector<4x8xf32>
    %cst_87 = arith.constant dense<0.000000e+00> : vector<4x512xf32>
    %106 = tpu.matmul %105, %103, %cst_87 {dimension_numbers = #tpu.dot_dimension_numbers<[1], [0], [0], [1], [0, 0, 1, 1], [], []>} : vector<4x8xf32>, vector<8x512xf32>, vector<4x512xf32> -> vector<4x512xf32>
    %107 = arith.addf %99, %106 : vector<4x512xf32>
    %c0_88 = arith.constant 0 : index
    %c127 = arith.constant 127 : index
    %108 = vector.load %arg10[%c0_88, %c127] : memref<8x768xf32, #tpu.memory_space<vmem>>, vector<8x512xf32>
    %c12 = arith.constant 12 : index
    %c0_89 = arith.constant 0 : index
    %109 = vector.load %arg4[%c12, %c0_89] : memref<27x512xf32, #tpu.memory_space<vmem>>, vector<1x512xf32>
    %110 = vector.broadcast %109 : vector<1x512xf32> to vector<8x512xf32>
    %111 = arith.mulf %108, %110 : vector<8x512xf32>
    %c12_90 = arith.constant 12 : index
    %c0_91 = arith.constant 0 : index
    %c0_92 = arith.constant 0 : index
    %112 = vector.load %arg5[%c12_90, %c0_91, %c0_92] : memref<27x4x8xf32, #tpu.memory_space<vmem>>, vector<1x4x8xf32>
    %113 = vector.shape_cast %112 : vector<1x4x8xf32> to vector<4x8xf32>
    %cst_93 = arith.constant dense<0.000000e+00> : vector<4x512xf32>
    %114 = tpu.matmul %113, %111, %cst_93 {dimension_numbers = #tpu.dot_dimension_numbers<[1], [0], [0], [1], [0, 0, 1, 1], [], []>} : vector<4x8xf32>, vector<8x512xf32>, vector<4x512xf32> -> vector<4x512xf32>
    %115 = arith.addf %107, %114 : vector<4x512xf32>
    %c0_94 = arith.constant 0 : index
    %c128_95 = arith.constant 128 : index
    %116 = vector.load %arg10[%c0_94, %c128_95] : memref<8x768xf32, #tpu.memory_space<vmem>>, vector<8x512xf32>
    %c13 = arith.constant 13 : index
    %c0_96 = arith.constant 0 : index
    %117 = vector.load %arg4[%c13, %c0_96] : memref<27x512xf32, #tpu.memory_space<vmem>>, vector<1x512xf32>
    %118 = vector.broadcast %117 : vector<1x512xf32> to vector<8x512xf32>
    %119 = arith.mulf %116, %118 : vector<8x512xf32>
    %c13_97 = arith.constant 13 : index
    %c0_98 = arith.constant 0 : index
    %c0_99 = arith.constant 0 : index
    %120 = vector.load %arg5[%c13_97, %c0_98, %c0_99] : memref<27x4x8xf32, #tpu.memory_space<vmem>>, vector<1x4x8xf32>
    %121 = vector.shape_cast %120 : vector<1x4x8xf32> to vector<4x8xf32>
    %cst_100 = arith.constant dense<0.000000e+00> : vector<4x512xf32>
    %122 = tpu.matmul %121, %119, %cst_100 {dimension_numbers = #tpu.dot_dimension_numbers<[1], [0], [0], [1], [0, 0, 1, 1], [], []>} : vector<4x8xf32>, vector<8x512xf32>, vector<4x512xf32> -> vector<4x512xf32>
    %123 = arith.addf %115, %122 : vector<4x512xf32>
    %c0_101 = arith.constant 0 : index
    %c129 = arith.constant 129 : index
    %124 = vector.load %arg10[%c0_101, %c129] : memref<8x768xf32, #tpu.memory_space<vmem>>, vector<8x512xf32>
    %c14 = arith.constant 14 : index
    %c0_102 = arith.constant 0 : index
    %125 = vector.load %arg4[%c14, %c0_102] : memref<27x512xf32, #tpu.memory_space<vmem>>, vector<1x512xf32>
    %126 = vector.broadcast %125 : vector<1x512xf32> to vector<8x512xf32>
    %127 = arith.mulf %124, %126 : vector<8x512xf32>
    %c14_103 = arith.constant 14 : index
    %c0_104 = arith.constant 0 : index
    %c0_105 = arith.constant 0 : index
    %128 = vector.load %arg5[%c14_103, %c0_104, %c0_105] : memref<27x4x8xf32, #tpu.memory_space<vmem>>, vector<1x4x8xf32>
    %129 = vector.shape_cast %128 : vector<1x4x8xf32> to vector<4x8xf32>
    %cst_106 = arith.constant dense<0.000000e+00> : vector<4x512xf32>
    %130 = tpu.matmul %129, %127, %cst_106 {dimension_numbers = #tpu.dot_dimension_numbers<[1], [0], [0], [1], [0, 0, 1, 1], [], []>} : vector<4x8xf32>, vector<8x512xf32>, vector<4x512xf32> -> vector<4x512xf32>
    %131 = arith.addf %123, %130 : vector<4x512xf32>
    %c0_107 = arith.constant 0 : index
    %c135 = arith.constant 135 : index
    %132 = vector.load %arg10[%c0_107, %c135] : memref<8x768xf32, #tpu.memory_space<vmem>>, vector<8x512xf32>
    %c15 = arith.constant 15 : index
    %c0_108 = arith.constant 0 : index
    %133 = vector.load %arg4[%c15, %c0_108] : memref<27x512xf32, #tpu.memory_space<vmem>>, vector<1x512xf32>
    %134 = vector.broadcast %133 : vector<1x512xf32> to vector<8x512xf32>
    %135 = arith.mulf %132, %134 : vector<8x512xf32>
    %c15_109 = arith.constant 15 : index
    %c0_110 = arith.constant 0 : index
    %c0_111 = arith.constant 0 : index
    %136 = vector.load %arg5[%c15_109, %c0_110, %c0_111] : memref<27x4x8xf32, #tpu.memory_space<vmem>>, vector<1x4x8xf32>
    %137 = vector.shape_cast %136 : vector<1x4x8xf32> to vector<4x8xf32>
    %cst_112 = arith.constant dense<0.000000e+00> : vector<4x512xf32>
    %138 = tpu.matmul %137, %135, %cst_112 {dimension_numbers = #tpu.dot_dimension_numbers<[1], [0], [0], [1], [0, 0, 1, 1], [], []>} : vector<4x8xf32>, vector<8x512xf32>, vector<4x512xf32> -> vector<4x512xf32>
    %139 = arith.addf %131, %138 : vector<4x512xf32>
    %c0_113 = arith.constant 0 : index
    %c136 = arith.constant 136 : index
    %140 = vector.load %arg10[%c0_113, %c136] : memref<8x768xf32, #tpu.memory_space<vmem>>, vector<8x512xf32>
    %c16 = arith.constant 16 : index
    %c0_114 = arith.constant 0 : index
    %141 = vector.load %arg4[%c16, %c0_114] : memref<27x512xf32, #tpu.memory_space<vmem>>, vector<1x512xf32>
    %142 = vector.broadcast %141 : vector<1x512xf32> to vector<8x512xf32>
    %143 = arith.mulf %140, %142 : vector<8x512xf32>
    %c16_115 = arith.constant 16 : index
    %c0_116 = arith.constant 0 : index
    %c0_117 = arith.constant 0 : index
    %144 = vector.load %arg5[%c16_115, %c0_116, %c0_117] : memref<27x4x8xf32, #tpu.memory_space<vmem>>, vector<1x4x8xf32>
    %145 = vector.shape_cast %144 : vector<1x4x8xf32> to vector<4x8xf32>
    %cst_118 = arith.constant dense<0.000000e+00> : vector<4x512xf32>
    %146 = tpu.matmul %145, %143, %cst_118 {dimension_numbers = #tpu.dot_dimension_numbers<[1], [0], [0], [1], [0, 0, 1, 1], [], []>} : vector<4x8xf32>, vector<8x512xf32>, vector<4x512xf32> -> vector<4x512xf32>
    %147 = arith.addf %139, %146 : vector<4x512xf32>
    %c0_119 = arith.constant 0 : index
    %c137 = arith.constant 137 : index
    %148 = vector.load %arg10[%c0_119, %c137] : memref<8x768xf32, #tpu.memory_space<vmem>>, vector<8x512xf32>
    %c17 = arith.constant 17 : index
    %c0_120 = arith.constant 0 : index
    %149 = vector.load %arg4[%c17, %c0_120] : memref<27x512xf32, #tpu.memory_space<vmem>>, vector<1x512xf32>
    %150 = vector.broadcast %149 : vector<1x512xf32> to vector<8x512xf32>
    %151 = arith.mulf %148, %150 : vector<8x512xf32>
    %c17_121 = arith.constant 17 : index
    %c0_122 = arith.constant 0 : index
    %c0_123 = arith.constant 0 : index
    %152 = vector.load %arg5[%c17_121, %c0_122, %c0_123] : memref<27x4x8xf32, #tpu.memory_space<vmem>>, vector<1x4x8xf32>
    %153 = vector.shape_cast %152 : vector<1x4x8xf32> to vector<4x8xf32>
    %cst_124 = arith.constant dense<0.000000e+00> : vector<4x512xf32>
    %154 = tpu.matmul %153, %151, %cst_124 {dimension_numbers = #tpu.dot_dimension_numbers<[1], [0], [0], [1], [0, 0, 1, 1], [], []>} : vector<4x8xf32>, vector<8x512xf32>, vector<4x512xf32> -> vector<4x512xf32>
    %155 = arith.addf %147, %154 : vector<4x512xf32>
    %c0_125 = arith.constant 0 : index
    %c183 = arith.constant 183 : index
    %156 = vector.load %arg10[%c0_125, %c183] : memref<8x768xf32, #tpu.memory_space<vmem>>, vector<8x512xf32>
    %c18 = arith.constant 18 : index
    %c0_126 = arith.constant 0 : index
    %157 = vector.load %arg4[%c18, %c0_126] : memref<27x512xf32, #tpu.memory_space<vmem>>, vector<1x512xf32>
    %158 = vector.broadcast %157 : vector<1x512xf32> to vector<8x512xf32>
    %159 = arith.mulf %156, %158 : vector<8x512xf32>
    %c18_127 = arith.constant 18 : index
    %c0_128 = arith.constant 0 : index
    %c0_129 = arith.constant 0 : index
    %160 = vector.load %arg5[%c18_127, %c0_128, %c0_129] : memref<27x4x8xf32, #tpu.memory_space<vmem>>, vector<1x4x8xf32>
    %161 = vector.shape_cast %160 : vector<1x4x8xf32> to vector<4x8xf32>
    %cst_130 = arith.constant dense<0.000000e+00> : vector<4x512xf32>
    %162 = tpu.matmul %161, %159, %cst_130 {dimension_numbers = #tpu.dot_dimension_numbers<[1], [0], [0], [1], [0, 0, 1, 1], [], []>} : vector<4x8xf32>, vector<8x512xf32>, vector<4x512xf32> -> vector<4x512xf32>
    %163 = arith.addf %155, %162 : vector<4x512xf32>
    %c0_131 = arith.constant 0 : index
    %c184 = arith.constant 184 : index
    %164 = vector.load %arg10[%c0_131, %c184] : memref<8x768xf32, #tpu.memory_space<vmem>>, vector<8x512xf32>
    %c19 = arith.constant 19 : index
    %c0_132 = arith.constant 0 : index
    %165 = vector.load %arg4[%c19, %c0_132] : memref<27x512xf32, #tpu.memory_space<vmem>>, vector<1x512xf32>
    %166 = vector.broadcast %165 : vector<1x512xf32> to vector<8x512xf32>
    %167 = arith.mulf %164, %166 : vector<8x512xf32>
    %c19_133 = arith.constant 19 : index
    %c0_134 = arith.constant 0 : index
    %c0_135 = arith.constant 0 : index
    %168 = vector.load %arg5[%c19_133, %c0_134, %c0_135] : memref<27x4x8xf32, #tpu.memory_space<vmem>>, vector<1x4x8xf32>
    %169 = vector.shape_cast %168 : vector<1x4x8xf32> to vector<4x8xf32>
    %cst_136 = arith.constant dense<0.000000e+00> : vector<4x512xf32>
    %170 = tpu.matmul %169, %167, %cst_136 {dimension_numbers = #tpu.dot_dimension_numbers<[1], [0], [0], [1], [0, 0, 1, 1], [], []>} : vector<4x8xf32>, vector<8x512xf32>, vector<4x512xf32> -> vector<4x512xf32>
    %171 = arith.addf %163, %170 : vector<4x512xf32>
    %c0_137 = arith.constant 0 : index
    %c185 = arith.constant 185 : index
    %172 = vector.load %arg10[%c0_137, %c185] : memref<8x768xf32, #tpu.memory_space<vmem>>, vector<8x512xf32>
    %c20 = arith.constant 20 : index
    %c0_138 = arith.constant 0 : index
    %173 = vector.load %arg4[%c20, %c0_138] : memref<27x512xf32, #tpu.memory_space<vmem>>, vector<1x512xf32>
    %174 = vector.broadcast %173 : vector<1x512xf32> to vector<8x512xf32>
    %175 = arith.mulf %172, %174 : vector<8x512xf32>
    %c20_139 = arith.constant 20 : index
    %c0_140 = arith.constant 0 : index
    %c0_141 = arith.constant 0 : index
    %176 = vector.load %arg5[%c20_139, %c0_140, %c0_141] : memref<27x4x8xf32, #tpu.memory_space<vmem>>, vector<1x4x8xf32>
    %177 = vector.shape_cast %176 : vector<1x4x8xf32> to vector<4x8xf32>
    %cst_142 = arith.constant dense<0.000000e+00> : vector<4x512xf32>
    %178 = tpu.matmul %177, %175, %cst_142 {dimension_numbers = #tpu.dot_dimension_numbers<[1], [0], [0], [1], [0, 0, 1, 1], [], []>} : vector<4x8xf32>, vector<8x512xf32>, vector<4x512xf32> -> vector<4x512xf32>
    %179 = arith.addf %171, %178 : vector<4x512xf32>
    %c0_143 = arith.constant 0 : index
    %c191 = arith.constant 191 : index
    %180 = vector.load %arg10[%c0_143, %c191] : memref<8x768xf32, #tpu.memory_space<vmem>>, vector<8x512xf32>
    %c21 = arith.constant 21 : index
    %c0_144 = arith.constant 0 : index
    %181 = vector.load %arg4[%c21, %c0_144] : memref<27x512xf32, #tpu.memory_space<vmem>>, vector<1x512xf32>
    %182 = vector.broadcast %181 : vector<1x512xf32> to vector<8x512xf32>
    %183 = arith.mulf %180, %182 : vector<8x512xf32>
    %c21_145 = arith.constant 21 : index
    %c0_146 = arith.constant 0 : index
    %c0_147 = arith.constant 0 : index
    %184 = vector.load %arg5[%c21_145, %c0_146, %c0_147] : memref<27x4x8xf32, #tpu.memory_space<vmem>>, vector<1x4x8xf32>
    %185 = vector.shape_cast %184 : vector<1x4x8xf32> to vector<4x8xf32>
    %cst_148 = arith.constant dense<0.000000e+00> : vector<4x512xf32>
    %186 = tpu.matmul %185, %183, %cst_148 {dimension_numbers = #tpu.dot_dimension_numbers<[1], [0], [0], [1], [0, 0, 1, 1], [], []>} : vector<4x8xf32>, vector<8x512xf32>, vector<4x512xf32> -> vector<4x512xf32>
    %187 = arith.addf %179, %186 : vector<4x512xf32>
    %c0_149 = arith.constant 0 : index
    %c192 = arith.constant 192 : index
    %188 = vector.load %arg10[%c0_149, %c192] : memref<8x768xf32, #tpu.memory_space<vmem>>, vector<8x512xf32>
    %c22 = arith.constant 22 : index
    %c0_150 = arith.constant 0 : index
    %189 = vector.load %arg4[%c22, %c0_150] : memref<27x512xf32, #tpu.memory_space<vmem>>, vector<1x512xf32>
    %190 = vector.broadcast %189 : vector<1x512xf32> to vector<8x512xf32>
    %191 = arith.mulf %188, %190 : vector<8x512xf32>
    %c22_151 = arith.constant 22 : index
    %c0_152 = arith.constant 0 : index
    %c0_153 = arith.constant 0 : index
    %192 = vector.load %arg5[%c22_151, %c0_152, %c0_153] : memref<27x4x8xf32, #tpu.memory_space<vmem>>, vector<1x4x8xf32>
    %193 = vector.shape_cast %192 : vector<1x4x8xf32> to vector<4x8xf32>
    %cst_154 = arith.constant dense<0.000000e+00> : vector<4x512xf32>
    %194 = tpu.matmul %193, %191, %cst_154 {dimension_numbers = #tpu.dot_dimension_numbers<[1], [0], [0], [1], [0, 0, 1, 1], [], []>} : vector<4x8xf32>, vector<8x512xf32>, vector<4x512xf32> -> vector<4x512xf32>
    %195 = arith.addf %187, %194 : vector<4x512xf32>
    %c0_155 = arith.constant 0 : index
    %c193 = arith.constant 193 : index
    %196 = vector.load %arg10[%c0_155, %c193] : memref<8x768xf32, #tpu.memory_space<vmem>>, vector<8x512xf32>
    %c23 = arith.constant 23 : index
    %c0_156 = arith.constant 0 : index
    %197 = vector.load %arg4[%c23, %c0_156] : memref<27x512xf32, #tpu.memory_space<vmem>>, vector<1x512xf32>
    %198 = vector.broadcast %197 : vector<1x512xf32> to vector<8x512xf32>
    %199 = arith.mulf %196, %198 : vector<8x512xf32>
    %c23_157 = arith.constant 23 : index
    %c0_158 = arith.constant 0 : index
    %c0_159 = arith.constant 0 : index
    %200 = vector.load %arg5[%c23_157, %c0_158, %c0_159] : memref<27x4x8xf32, #tpu.memory_space<vmem>>, vector<1x4x8xf32>
    %201 = vector.shape_cast %200 : vector<1x4x8xf32> to vector<4x8xf32>
    %cst_160 = arith.constant dense<0.000000e+00> : vector<4x512xf32>
    %202 = tpu.matmul %201, %199, %cst_160 {dimension_numbers = #tpu.dot_dimension_numbers<[1], [0], [0], [1], [0, 0, 1, 1], [], []>} : vector<4x8xf32>, vector<8x512xf32>, vector<4x512xf32> -> vector<4x512xf32>
    %203 = arith.addf %195, %202 : vector<4x512xf32>
    %c0_161 = arith.constant 0 : index
    %c199 = arith.constant 199 : index
    %204 = vector.load %arg10[%c0_161, %c199] : memref<8x768xf32, #tpu.memory_space<vmem>>, vector<8x512xf32>
    %c24 = arith.constant 24 : index
    %c0_162 = arith.constant 0 : index
    %205 = vector.load %arg4[%c24, %c0_162] : memref<27x512xf32, #tpu.memory_space<vmem>>, vector<1x512xf32>
    %206 = vector.broadcast %205 : vector<1x512xf32> to vector<8x512xf32>
    %207 = arith.mulf %204, %206 : vector<8x512xf32>
    %c24_163 = arith.constant 24 : index
    %c0_164 = arith.constant 0 : index
    %c0_165 = arith.constant 0 : index
    %208 = vector.load %arg5[%c24_163, %c0_164, %c0_165] : memref<27x4x8xf32, #tpu.memory_space<vmem>>, vector<1x4x8xf32>
    %209 = vector.shape_cast %208 : vector<1x4x8xf32> to vector<4x8xf32>
    %cst_166 = arith.constant dense<0.000000e+00> : vector<4x512xf32>
    %210 = tpu.matmul %209, %207, %cst_166 {dimension_numbers = #tpu.dot_dimension_numbers<[1], [0], [0], [1], [0, 0, 1, 1], [], []>} : vector<4x8xf32>, vector<8x512xf32>, vector<4x512xf32> -> vector<4x512xf32>
    %211 = arith.addf %203, %210 : vector<4x512xf32>
    %c0_167 = arith.constant 0 : index
    %c200 = arith.constant 200 : index
    %212 = vector.load %arg10[%c0_167, %c200] : memref<8x768xf32, #tpu.memory_space<vmem>>, vector<8x512xf32>
    %c25 = arith.constant 25 : index
    %c0_168 = arith.constant 0 : index
    %213 = vector.load %arg4[%c25, %c0_168] : memref<27x512xf32, #tpu.memory_space<vmem>>, vector<1x512xf32>
    %214 = vector.broadcast %213 : vector<1x512xf32> to vector<8x512xf32>
    %215 = arith.mulf %212, %214 : vector<8x512xf32>
    %c25_169 = arith.constant 25 : index
    %c0_170 = arith.constant 0 : index
    %c0_171 = arith.constant 0 : index
    %216 = vector.load %arg5[%c25_169, %c0_170, %c0_171] : memref<27x4x8xf32, #tpu.memory_space<vmem>>, vector<1x4x8xf32>
    %217 = vector.shape_cast %216 : vector<1x4x8xf32> to vector<4x8xf32>
    %cst_172 = arith.constant dense<0.000000e+00> : vector<4x512xf32>
    %218 = tpu.matmul %217, %215, %cst_172 {dimension_numbers = #tpu.dot_dimension_numbers<[1], [0], [0], [1], [0, 0, 1, 1], [], []>} : vector<4x8xf32>, vector<8x512xf32>, vector<4x512xf32> -> vector<4x512xf32>
    %219 = arith.addf %211, %218 : vector<4x512xf32>
    %c0_173 = arith.constant 0 : index
    %c201 = arith.constant 201 : index
    %220 = vector.load %arg10[%c0_173, %c201] : memref<8x768xf32, #tpu.memory_space<vmem>>, vector<8x512xf32>
    %c26 = arith.constant 26 : index
    %c0_174 = arith.constant 0 : index
    %221 = vector.load %arg4[%c26, %c0_174] : memref<27x512xf32, #tpu.memory_space<vmem>>, vector<1x512xf32>
    %222 = vector.broadcast %221 : vector<1x512xf32> to vector<8x512xf32>
    %223 = arith.mulf %220, %222 : vector<8x512xf32>
    %c26_175 = arith.constant 26 : index
    %c0_176 = arith.constant 0 : index
    %c0_177 = arith.constant 0 : index
    %224 = vector.load %arg5[%c26_175, %c0_176, %c0_177] : memref<27x4x8xf32, #tpu.memory_space<vmem>>, vector<1x4x8xf32>
    %225 = vector.shape_cast %224 : vector<1x4x8xf32> to vector<4x8xf32>
    %cst_178 = arith.constant dense<0.000000e+00> : vector<4x512xf32>
    %226 = tpu.matmul %225, %223, %cst_178 {dimension_numbers = #tpu.dot_dimension_numbers<[1], [0], [0], [1], [0, 0, 1, 1], [], []>} : vector<4x8xf32>, vector<8x512xf32>, vector<4x512xf32> -> vector<4x512xf32>
    %227 = arith.addf %219, %226 : vector<4x512xf32>
    %c0_179 = arith.constant 0 : index
    %c0_180 = arith.constant 0 : index
    %228 = vector.load %arg7[%c0_179, %c0_180] : memref<4x1xf32, #tpu.memory_space<vmem>>, vector<4x1xf32>
    %229 = vector.broadcast %228 : vector<4x1xf32> to vector<4x512xf32>
    %230 = arith.addf %227, %229 : vector<4x512xf32>
    %cst_181 = arith.constant 0.000000e+00 : f32
    %231 = vector.broadcast %cst_181 : f32 to vector<4x512xf32>
    %232 = arith.maximumf %230, %231 : vector<4x512xf32>
    %c0_182 = arith.constant 0 : index
    %c128_183 = arith.constant 128 : index
    %233 = vector.load %arg10[%c0_182, %c128_183] : memref<8x768xf32, #tpu.memory_space<vmem>>, vector<4x512xf32>
    tpu.vector_store %arg10[%c0_182, %c128_183], %232 {strides = array<i32>} : memref<8x768xf32, #tpu.memory_space<vmem>>, vector<4x512xf32>,
    %cst_184 = arith.constant 0.000000e+00 : f32
    %234 = vector.broadcast %cst_184 : f32 to vector<4x512xf32>
    %c0_185 = arith.constant 0 : index
    %c55_186 = arith.constant 55 : index
    %235 = vector.load %arg10[%c0_185, %c55_186] : memref<8x768xf32, #tpu.memory_space<vmem>>, vector<4x512xf32>
    %c0_187 = arith.constant 0 : index
    %c0_188 = arith.constant 0 : index
    %236 = vector.load %arg4[%c0_187, %c0_188] : memref<27x512xf32, #tpu.memory_space<vmem>>, vector<1x512xf32>
    %237 = vector.broadcast %236 : vector<1x512xf32> to vector<4x512xf32>
    %238 = arith.mulf %235, %237 : vector<4x512xf32>
    %c0_189 = arith.constant 0 : index
    %c0_190 = arith.constant 0 : index
    %c0_191 = arith.constant 0 : index
    %239 = vector.load %arg6[%c0_189, %c0_190, %c0_191] : memref<27x4x4xf32, #tpu.memory_space<vmem>>, vector<1x4x4xf32>
    %240 = vector.shape_cast %239 : vector<1x4x4xf32> to vector<4x4xf32>
    %cst_192 = arith.constant dense<0.000000e+00> : vector<4x512xf32>
    %241 = tpu.matmul %240, %238, %cst_192 {dimension_numbers = #tpu.dot_dimension_numbers<[1], [0], [0], [1], [0, 0, 1, 1], [], []>} : vector<4x4xf32>, vector<4x512xf32>, vector<4x512xf32> -> vector<4x512xf32>
    %242 = arith.addf %234, %241 : vector<4x512xf32>
    %c0_193 = arith.constant 0 : index
    %c56_194 = arith.constant 56 : index
    %243 = vector.load %arg10[%c0_193, %c56_194] : memref<8x768xf32, #tpu.memory_space<vmem>>, vector<4x512xf32>
    %c1_195 = arith.constant 1 : index
    %c0_196 = arith.constant 0 : index
    %244 = vector.load %arg4[%c1_195, %c0_196] : memref<27x512xf32, #tpu.memory_space<vmem>>, vector<1x512xf32>
    %245 = vector.broadcast %244 : vector<1x512xf32> to vector<4x512xf32>
    %246 = arith.mulf %243, %245 : vector<4x512xf32>
    %c1_197 = arith.constant 1 : index
    %c0_198 = arith.constant 0 : index
    %c0_199 = arith.constant 0 : index
    %247 = vector.load %arg6[%c1_197, %c0_198, %c0_199] : memref<27x4x4xf32, #tpu.memory_space<vmem>>, vector<1x4x4xf32>
    %248 = vector.shape_cast %247 : vector<1x4x4xf32> to vector<4x4xf32>
    %cst_200 = arith.constant dense<0.000000e+00> : vector<4x512xf32>
    %249 = tpu.matmul %248, %246, %cst_200 {dimension_numbers = #tpu.dot_dimension_numbers<[1], [0], [0], [1], [0, 0, 1, 1], [], []>} : vector<4x4xf32>, vector<4x512xf32>, vector<4x512xf32> -> vector<4x512xf32>
    %250 = arith.addf %242, %249 : vector<4x512xf32>
    %c0_201 = arith.constant 0 : index
    %c57_202 = arith.constant 57 : index
    %251 = vector.load %arg10[%c0_201, %c57_202] : memref<8x768xf32, #tpu.memory_space<vmem>>, vector<4x512xf32>
    %c2_203 = arith.constant 2 : index
    %c0_204 = arith.constant 0 : index
    %252 = vector.load %arg4[%c2_203, %c0_204] : memref<27x512xf32, #tpu.memory_space<vmem>>, vector<1x512xf32>
    %253 = vector.broadcast %252 : vector<1x512xf32> to vector<4x512xf32>
    %254 = arith.mulf %251, %253 : vector<4x512xf32>
    %c2_205 = arith.constant 2 : index
    %c0_206 = arith.constant 0 : index
    %c0_207 = arith.constant 0 : index
    %255 = vector.load %arg6[%c2_205, %c0_206, %c0_207] : memref<27x4x4xf32, #tpu.memory_space<vmem>>, vector<1x4x4xf32>
    %256 = vector.shape_cast %255 : vector<1x4x4xf32> to vector<4x4xf32>
    %cst_208 = arith.constant dense<0.000000e+00> : vector<4x512xf32>
    %257 = tpu.matmul %256, %254, %cst_208 {dimension_numbers = #tpu.dot_dimension_numbers<[1], [0], [0], [1], [0, 0, 1, 1], [], []>} : vector<4x4xf32>, vector<4x512xf32>, vector<4x512xf32> -> vector<4x512xf32>
    %258 = arith.addf %250, %257 : vector<4x512xf32>
    %c0_209 = arith.constant 0 : index
    %c63_210 = arith.constant 63 : index
    %259 = vector.load %arg10[%c0_209, %c63_210] : memref<8x768xf32, #tpu.memory_space<vmem>>, vector<4x512xf32>
    %c3_211 = arith.constant 3 : index
    %c0_212 = arith.constant 0 : index
    %260 = vector.load %arg4[%c3_211, %c0_212] : memref<27x512xf32, #tpu.memory_space<vmem>>, vector<1x512xf32>
    %261 = vector.broadcast %260 : vector<1x512xf32> to vector<4x512xf32>
    %262 = arith.mulf %259, %261 : vector<4x512xf32>
    %c3_213 = arith.constant 3 : index
    %c0_214 = arith.constant 0 : index
    %c0_215 = arith.constant 0 : index
    %263 = vector.load %arg6[%c3_213, %c0_214, %c0_215] : memref<27x4x4xf32, #tpu.memory_space<vmem>>, vector<1x4x4xf32>
    %264 = vector.shape_cast %263 : vector<1x4x4xf32> to vector<4x4xf32>
    %cst_216 = arith.constant dense<0.000000e+00> : vector<4x512xf32>
    %265 = tpu.matmul %264, %262, %cst_216 {dimension_numbers = #tpu.dot_dimension_numbers<[1], [0], [0], [1], [0, 0, 1, 1], [], []>} : vector<4x4xf32>, vector<4x512xf32>, vector<4x512xf32> -> vector<4x512xf32>
    %266 = arith.addf %258, %265 : vector<4x512xf32>
    %c0_217 = arith.constant 0 : index
    %c64_218 = arith.constant 64 : index
    %267 = vector.load %arg10[%c0_217, %c64_218] : memref<8x768xf32, #tpu.memory_space<vmem>>, vector<4x512xf32>
    %c4_219 = arith.constant 4 : index
    %c0_220 = arith.constant 0 : index
    %268 = vector.load %arg4[%c4_219, %c0_220] : memref<27x512xf32, #tpu.memory_space<vmem>>, vector<1x512xf32>
    %269 = vector.broadcast %268 : vector<1x512xf32> to vector<4x512xf32>
    %270 = arith.mulf %267, %269 : vector<4x512xf32>
    %c4_221 = arith.constant 4 : index
    %c0_222 = arith.constant 0 : index
    %c0_223 = arith.constant 0 : index
    %271 = vector.load %arg6[%c4_221, %c0_222, %c0_223] : memref<27x4x4xf32, #tpu.memory_space<vmem>>, vector<1x4x4xf32>
    %272 = vector.shape_cast %271 : vector<1x4x4xf32> to vector<4x4xf32>
    %cst_224 = arith.constant dense<0.000000e+00> : vector<4x512xf32>
    %273 = tpu.matmul %272, %270, %cst_224 {dimension_numbers = #tpu.dot_dimension_numbers<[1], [0], [0], [1], [0, 0, 1, 1], [], []>} : vector<4x4xf32>, vector<4x512xf32>, vector<4x512xf32> -> vector<4x512xf32>
    %274 = arith.addf %266, %273 : vector<4x512xf32>
    %c0_225 = arith.constant 0 : index
    %c65_226 = arith.constant 65 : index
    %275 = vector.load %arg10[%c0_225, %c65_226] : memref<8x768xf32, #tpu.memory_space<vmem>>, vector<4x512xf32>
    %c5_227 = arith.constant 5 : index
    %c0_228 = arith.constant 0 : index
    %276 = vector.load %arg4[%c5_227, %c0_228] : memref<27x512xf32, #tpu.memory_space<vmem>>, vector<1x512xf32>
    %277 = vector.broadcast %276 : vector<1x512xf32> to vector<4x512xf32>
    %278 = arith.mulf %275, %277 : vector<4x512xf32>
    %c5_229 = arith.constant 5 : index
    %c0_230 = arith.constant 0 : index
    %c0_231 = arith.constant 0 : index
    %279 = vector.load %arg6[%c5_229, %c0_230, %c0_231] : memref<27x4x4xf32, #tpu.memory_space<vmem>>, vector<1x4x4xf32>
    %280 = vector.shape_cast %279 : vector<1x4x4xf32> to vector<4x4xf32>
    %cst_232 = arith.constant dense<0.000000e+00> : vector<4x512xf32>
    %281 = tpu.matmul %280, %278, %cst_232 {dimension_numbers = #tpu.dot_dimension_numbers<[1], [0], [0], [1], [0, 0, 1, 1], [], []>} : vector<4x4xf32>, vector<4x512xf32>, vector<4x512xf32> -> vector<4x512xf32>
    %282 = arith.addf %274, %281 : vector<4x512xf32>
    %c0_233 = arith.constant 0 : index
    %c71_234 = arith.constant 71 : index
    %283 = vector.load %arg10[%c0_233, %c71_234] : memref<8x768xf32, #tpu.memory_space<vmem>>, vector<4x512xf32>
    %c6_235 = arith.constant 6 : index
    %c0_236 = arith.constant 0 : index
    %284 = vector.load %arg4[%c6_235, %c0_236] : memref<27x512xf32, #tpu.memory_space<vmem>>, vector<1x512xf32>
    %285 = vector.broadcast %284 : vector<1x512xf32> to vector<4x512xf32>
    %286 = arith.mulf %283, %285 : vector<4x512xf32>
    %c6_237 = arith.constant 6 : index
    %c0_238 = arith.constant 0 : index
    %c0_239 = arith.constant 0 : index
    %287 = vector.load %arg6[%c6_237, %c0_238, %c0_239] : memref<27x4x4xf32, #tpu.memory_space<vmem>>, vector<1x4x4xf32>
    %288 = vector.shape_cast %287 : vector<1x4x4xf32> to vector<4x4xf32>
    %cst_240 = arith.constant dense<0.000000e+00> : vector<4x512xf32>
    %289 = tpu.matmul %288, %286, %cst_240 {dimension_numbers = #tpu.dot_dimension_numbers<[1], [0], [0], [1], [0, 0, 1, 1], [], []>} : vector<4x4xf32>, vector<4x512xf32>, vector<4x512xf32> -> vector<4x512xf32>
    %290 = arith.addf %282, %289 : vector<4x512xf32>
    %c0_241 = arith.constant 0 : index
    %c72_242 = arith.constant 72 : index
    %291 = vector.load %arg10[%c0_241, %c72_242] : memref<8x768xf32, #tpu.memory_space<vmem>>, vector<4x512xf32>
    %c7_243 = arith.constant 7 : index
    %c0_244 = arith.constant 0 : index
    %292 = vector.load %arg4[%c7_243, %c0_244] : memref<27x512xf32, #tpu.memory_space<vmem>>, vector<1x512xf32>
    %293 = vector.broadcast %292 : vector<1x512xf32> to vector<4x512xf32>
    %294 = arith.mulf %291, %293 : vector<4x512xf32>
    %c7_245 = arith.constant 7 : index
    %c0_246 = arith.constant 0 : index
    %c0_247 = arith.constant 0 : index
    %295 = vector.load %arg6[%c7_245, %c0_246, %c0_247] : memref<27x4x4xf32, #tpu.memory_space<vmem>>, vector<1x4x4xf32>
    %296 = vector.shape_cast %295 : vector<1x4x4xf32> to vector<4x4xf32>
    %cst_248 = arith.constant dense<0.000000e+00> : vector<4x512xf32>
    %297 = tpu.matmul %296, %294, %cst_248 {dimension_numbers = #tpu.dot_dimension_numbers<[1], [0], [0], [1], [0, 0, 1, 1], [], []>} : vector<4x4xf32>, vector<4x512xf32>, vector<4x512xf32> -> vector<4x512xf32>
    %298 = arith.addf %290, %297 : vector<4x512xf32>
    %c0_249 = arith.constant 0 : index
    %c73_250 = arith.constant 73 : index
    %299 = vector.load %arg10[%c0_249, %c73_250] : memref<8x768xf32, #tpu.memory_space<vmem>>, vector<4x512xf32>
    %c8_251 = arith.constant 8 : index
    %c0_252 = arith.constant 0 : index
    %300 = vector.load %arg4[%c8_251, %c0_252] : memref<27x512xf32, #tpu.memory_space<vmem>>, vector<1x512xf32>
    %301 = vector.broadcast %300 : vector<1x512xf32> to vector<4x512xf32>
    %302 = arith.mulf %299, %301 : vector<4x512xf32>
    %c8_253 = arith.constant 8 : index
    %c0_254 = arith.constant 0 : index
    %c0_255 = arith.constant 0 : index
    %303 = vector.load %arg6[%c8_253, %c0_254, %c0_255] : memref<27x4x4xf32, #tpu.memory_space<vmem>>, vector<1x4x4xf32>
    %304 = vector.shape_cast %303 : vector<1x4x4xf32> to vector<4x4xf32>
    %cst_256 = arith.constant dense<0.000000e+00> : vector<4x512xf32>
    %305 = tpu.matmul %304, %302, %cst_256 {dimension_numbers = #tpu.dot_dimension_numbers<[1], [0], [0], [1], [0, 0, 1, 1], [], []>} : vector<4x4xf32>, vector<4x512xf32>, vector<4x512xf32> -> vector<4x512xf32>
    %306 = arith.addf %298, %305 : vector<4x512xf32>
    %c0_257 = arith.constant 0 : index
    %c119_258 = arith.constant 119 : index
    %307 = vector.load %arg10[%c0_257, %c119_258] : memref<8x768xf32, #tpu.memory_space<vmem>>, vector<4x512xf32>
    %c9_259 = arith.constant 9 : index
    %c0_260 = arith.constant 0 : index
    %308 = vector.load %arg4[%c9_259, %c0_260] : memref<27x512xf32, #tpu.memory_space<vmem>>, vector<1x512xf32>
    %309 = vector.broadcast %308 : vector<1x512xf32> to vector<4x512xf32>
    %310 = arith.mulf %307, %309 : vector<4x512xf32>
    %c9_261 = arith.constant 9 : index
    %c0_262 = arith.constant 0 : index
    %c0_263 = arith.constant 0 : index
    %311 = vector.load %arg6[%c9_261, %c0_262, %c0_263] : memref<27x4x4xf32, #tpu.memory_space<vmem>>, vector<1x4x4xf32>
    %312 = vector.shape_cast %311 : vector<1x4x4xf32> to vector<4x4xf32>
    %cst_264 = arith.constant dense<0.000000e+00> : vector<4x512xf32>
    %313 = tpu.matmul %312, %310, %cst_264 {dimension_numbers = #tpu.dot_dimension_numbers<[1], [0], [0], [1], [0, 0, 1, 1], [], []>} : vector<4x4xf32>, vector<4x512xf32>, vector<4x512xf32> -> vector<4x512xf32>
    %314 = arith.addf %306, %313 : vector<4x512xf32>
    %c0_265 = arith.constant 0 : index
    %c120_266 = arith.constant 120 : index
    %315 = vector.load %arg10[%c0_265, %c120_266] : memref<8x768xf32, #tpu.memory_space<vmem>>, vector<4x512xf32>
    %c10_267 = arith.constant 10 : index
    %c0_268 = arith.constant 0 : index
    %316 = vector.load %arg4[%c10_267, %c0_268] : memref<27x512xf32, #tpu.memory_space<vmem>>, vector<1x512xf32>
    %317 = vector.broadcast %316 : vector<1x512xf32> to vector<4x512xf32>
    %318 = arith.mulf %315, %317 : vector<4x512xf32>
    %c10_269 = arith.constant 10 : index
    %c0_270 = arith.constant 0 : index
    %c0_271 = arith.constant 0 : index
    %319 = vector.load %arg6[%c10_269, %c0_270, %c0_271] : memref<27x4x4xf32, #tpu.memory_space<vmem>>, vector<1x4x4xf32>
    %320 = vector.shape_cast %319 : vector<1x4x4xf32> to vector<4x4xf32>
    %cst_272 = arith.constant dense<0.000000e+00> : vector<4x512xf32>
    %321 = tpu.matmul %320, %318, %cst_272 {dimension_numbers = #tpu.dot_dimension_numbers<[1], [0], [0], [1], [0, 0, 1, 1], [], []>} : vector<4x4xf32>, vector<4x512xf32>, vector<4x512xf32> -> vector<4x512xf32>
    %322 = arith.addf %314, %321 : vector<4x512xf32>
    %c0_273 = arith.constant 0 : index
    %c121_274 = arith.constant 121 : index
    %323 = vector.load %arg10[%c0_273, %c121_274] : memref<8x768xf32, #tpu.memory_space<vmem>>, vector<4x512xf32>
    %c11_275 = arith.constant 11 : index
    %c0_276 = arith.constant 0 : index
    %324 = vector.load %arg4[%c11_275, %c0_276] : memref<27x512xf32, #tpu.memory_space<vmem>>, vector<1x512xf32>
    %325 = vector.broadcast %324 : vector<1x512xf32> to vector<4x512xf32>
    %326 = arith.mulf %323, %325 : vector<4x512xf32>
    %c11_277 = arith.constant 11 : index
    %c0_278 = arith.constant 0 : index
    %c0_279 = arith.constant 0 : index
    %327 = vector.load %arg6[%c11_277, %c0_278, %c0_279] : memref<27x4x4xf32, #tpu.memory_space<vmem>>, vector<1x4x4xf32>
    %328 = vector.shape_cast %327 : vector<1x4x4xf32> to vector<4x4xf32>
    %cst_280 = arith.constant dense<0.000000e+00> : vector<4x512xf32>
    %329 = tpu.matmul %328, %326, %cst_280 {dimension_numbers = #tpu.dot_dimension_numbers<[1], [0], [0], [1], [0, 0, 1, 1], [], []>} : vector<4x4xf32>, vector<4x512xf32>, vector<4x512xf32> -> vector<4x512xf32>
    %330 = arith.addf %322, %329 : vector<4x512xf32>
    %c0_281 = arith.constant 0 : index
    %c127_282 = arith.constant 127 : index
    %331 = vector.load %arg10[%c0_281, %c127_282] : memref<8x768xf32, #tpu.memory_space<vmem>>, vector<4x512xf32>
    %c12_283 = arith.constant 12 : index
    %c0_284 = arith.constant 0 : index
    %332 = vector.load %arg4[%c12_283, %c0_284] : memref<27x512xf32, #tpu.memory_space<vmem>>, vector<1x512xf32>
    %333 = vector.broadcast %332 : vector<1x512xf32> to vector<4x512xf32>
    %334 = arith.mulf %331, %333 : vector<4x512xf32>
    %c12_285 = arith.constant 12 : index
    %c0_286 = arith.constant 0 : index
    %c0_287 = arith.constant 0 : index
    %335 = vector.load %arg6[%c12_285, %c0_286, %c0_287] : memref<27x4x4xf32, #tpu.memory_space<vmem>>, vector<1x4x4xf32>
    %336 = vector.shape_cast %335 : vector<1x4x4xf32> to vector<4x4xf32>
    %cst_288 = arith.constant dense<0.000000e+00> : vector<4x512xf32>
    %337 = tpu.matmul %336, %334, %cst_288 {dimension_numbers = #tpu.dot_dimension_numbers<[1], [0], [0], [1], [0, 0, 1, 1], [], []>} : vector<4x4xf32>, vector<4x512xf32>, vector<4x512xf32> -> vector<4x512xf32>
    %338 = arith.addf %330, %337 : vector<4x512xf32>
    %c0_289 = arith.constant 0 : index
    %c128_290 = arith.constant 128 : index
    %339 = vector.load %arg10[%c0_289, %c128_290] : memref<8x768xf32, #tpu.memory_space<vmem>>, vector<4x512xf32>
    %c13_291 = arith.constant 13 : index
    %c0_292 = arith.constant 0 : index
    %340 = vector.load %arg4[%c13_291, %c0_292] : memref<27x512xf32, #tpu.memory_space<vmem>>, vector<1x512xf32>
    %341 = vector.broadcast %340 : vector<1x512xf32> to vector<4x512xf32>
    %342 = arith.mulf %339, %341 : vector<4x512xf32>
    %c13_293 = arith.constant 13 : index
    %c0_294 = arith.constant 0 : index
    %c0_295 = arith.constant 0 : index
    %343 = vector.load %arg6[%c13_293, %c0_294, %c0_295] : memref<27x4x4xf32, #tpu.memory_space<vmem>>, vector<1x4x4xf32>
    %344 = vector.shape_cast %343 : vector<1x4x4xf32> to vector<4x4xf32>
    %cst_296 = arith.constant dense<0.000000e+00> : vector<4x512xf32>
    %345 = tpu.matmul %344, %342, %cst_296 {dimension_numbers = #tpu.dot_dimension_numbers<[1], [0], [0], [1], [0, 0, 1, 1], [], []>} : vector<4x4xf32>, vector<4x512xf32>, vector<4x512xf32> -> vector<4x512xf32>
    %346 = arith.addf %338, %345 : vector<4x512xf32>
    %c0_297 = arith.constant 0 : index
    %c129_298 = arith.constant 129 : index
    %347 = vector.load %arg10[%c0_297, %c129_298] : memref<8x768xf32, #tpu.memory_space<vmem>>, vector<4x512xf32>
    %c14_299 = arith.constant 14 : index
    %c0_300 = arith.constant 0 : index
    %348 = vector.load %arg4[%c14_299, %c0_300] : memref<27x512xf32, #tpu.memory_space<vmem>>, vector<1x512xf32>
    %349 = vector.broadcast %348 : vector<1x512xf32> to vector<4x512xf32>
    %350 = arith.mulf %347, %349 : vector<4x512xf32>
    %c14_301 = arith.constant 14 : index
    %c0_302 = arith.constant 0 : index
    %c0_303 = arith.constant 0 : index
    %351 = vector.load %arg6[%c14_301, %c0_302, %c0_303] : memref<27x4x4xf32, #tpu.memory_space<vmem>>, vector<1x4x4xf32>
    %352 = vector.shape_cast %351 : vector<1x4x4xf32> to vector<4x4xf32>
    %cst_304 = arith.constant dense<0.000000e+00> : vector<4x512xf32>
    %353 = tpu.matmul %352, %350, %cst_304 {dimension_numbers = #tpu.dot_dimension_numbers<[1], [0], [0], [1], [0, 0, 1, 1], [], []>} : vector<4x4xf32>, vector<4x512xf32>, vector<4x512xf32> -> vector<4x512xf32>
    %354 = arith.addf %346, %353 : vector<4x512xf32>
    %c0_305 = arith.constant 0 : index
    %c135_306 = arith.constant 135 : index
    %355 = vector.load %arg10[%c0_305, %c135_306] : memref<8x768xf32, #tpu.memory_space<vmem>>, vector<4x512xf32>
    %c15_307 = arith.constant 15 : index
    %c0_308 = arith.constant 0 : index
    %356 = vector.load %arg4[%c15_307, %c0_308] : memref<27x512xf32, #tpu.memory_space<vmem>>, vector<1x512xf32>
    %357 = vector.broadcast %356 : vector<1x512xf32> to vector<4x512xf32>
    %358 = arith.mulf %355, %357 : vector<4x512xf32>
    %c15_309 = arith.constant 15 : index
    %c0_310 = arith.constant 0 : index
    %c0_311 = arith.constant 0 : index
    %359 = vector.load %arg6[%c15_309, %c0_310, %c0_311] : memref<27x4x4xf32, #tpu.memory_space<vmem>>, vector<1x4x4xf32>
    %360 = vector.shape_cast %359 : vector<1x4x4xf32> to vector<4x4xf32>
    %cst_312 = arith.constant dense<0.000000e+00> : vector<4x512xf32>
    %361 = tpu.matmul %360, %358, %cst_312 {dimension_numbers = #tpu.dot_dimension_numbers<[1], [0], [0], [1], [0, 0, 1, 1], [], []>} : vector<4x4xf32>, vector<4x512xf32>, vector<4x512xf32> -> vector<4x512xf32>
    %362 = arith.addf %354, %361 : vector<4x512xf32>
    %c0_313 = arith.constant 0 : index
    %c136_314 = arith.constant 136 : index
    %363 = vector.load %arg10[%c0_313, %c136_314] : memref<8x768xf32, #tpu.memory_space<vmem>>, vector<4x512xf32>
    %c16_315 = arith.constant 16 : index
    %c0_316 = arith.constant 0 : index
    %364 = vector.load %arg4[%c16_315, %c0_316] : memref<27x512xf32, #tpu.memory_space<vmem>>, vector<1x512xf32>
    %365 = vector.broadcast %364 : vector<1x512xf32> to vector<4x512xf32>
    %366 = arith.mulf %363, %365 : vector<4x512xf32>
    %c16_317 = arith.constant 16 : index
    %c0_318 = arith.constant 0 : index
    %c0_319 = arith.constant 0 : index
    %367 = vector.load %arg6[%c16_317, %c0_318, %c0_319] : memref<27x4x4xf32, #tpu.memory_space<vmem>>, vector<1x4x4xf32>
    %368 = vector.shape_cast %367 : vector<1x4x4xf32> to vector<4x4xf32>
    %cst_320 = arith.constant dense<0.000000e+00> : vector<4x512xf32>
    %369 = tpu.matmul %368, %366, %cst_320 {dimension_numbers = #tpu.dot_dimension_numbers<[1], [0], [0], [1], [0, 0, 1, 1], [], []>} : vector<4x4xf32>, vector<4x512xf32>, vector<4x512xf32> -> vector<4x512xf32>
    %370 = arith.addf %362, %369 : vector<4x512xf32>
    %c0_321 = arith.constant 0 : index
    %c137_322 = arith.constant 137 : index
    %371 = vector.load %arg10[%c0_321, %c137_322] : memref<8x768xf32, #tpu.memory_space<vmem>>, vector<4x512xf32>
    %c17_323 = arith.constant 17 : index
    %c0_324 = arith.constant 0 : index
    %372 = vector.load %arg4[%c17_323, %c0_324] : memref<27x512xf32, #tpu.memory_space<vmem>>, vector<1x512xf32>
    %373 = vector.broadcast %372 : vector<1x512xf32> to vector<4x512xf32>
    %374 = arith.mulf %371, %373 : vector<4x512xf32>
    %c17_325 = arith.constant 17 : index
    %c0_326 = arith.constant 0 : index
    %c0_327 = arith.constant 0 : index
    %375 = vector.load %arg6[%c17_325, %c0_326, %c0_327] : memref<27x4x4xf32, #tpu.memory_space<vmem>>, vector<1x4x4xf32>
    %376 = vector.shape_cast %375 : vector<1x4x4xf32> to vector<4x4xf32>
    %cst_328 = arith.constant dense<0.000000e+00> : vector<4x512xf32>
    %377 = tpu.matmul %376, %374, %cst_328 {dimension_numbers = #tpu.dot_dimension_numbers<[1], [0], [0], [1], [0, 0, 1, 1], [], []>} : vector<4x4xf32>, vector<4x512xf32>, vector<4x512xf32> -> vector<4x512xf32>
    %378 = arith.addf %370, %377 : vector<4x512xf32>
    %c0_329 = arith.constant 0 : index
    %c183_330 = arith.constant 183 : index
    %379 = vector.load %arg10[%c0_329, %c183_330] : memref<8x768xf32, #tpu.memory_space<vmem>>, vector<4x512xf32>
    %c18_331 = arith.constant 18 : index
    %c0_332 = arith.constant 0 : index
    %380 = vector.load %arg4[%c18_331, %c0_332] : memref<27x512xf32, #tpu.memory_space<vmem>>, vector<1x512xf32>
    %381 = vector.broadcast %380 : vector<1x512xf32> to vector<4x512xf32>
    %382 = arith.mulf %379, %381 : vector<4x512xf32>
    %c18_333 = arith.constant 18 : index
    %c0_334 = arith.constant 0 : index
    %c0_335 = arith.constant 0 : index
    %383 = vector.load %arg6[%c18_333, %c0_334, %c0_335] : memref<27x4x4xf32, #tpu.memory_space<vmem>>, vector<1x4x4xf32>
    %384 = vector.shape_cast %383 : vector<1x4x4xf32> to vector<4x4xf32>
    %cst_336 = arith.constant dense<0.000000e+00> : vector<4x512xf32>
    %385 = tpu.matmul %384, %382, %cst_336 {dimension_numbers = #tpu.dot_dimension_numbers<[1], [0], [0], [1], [0, 0, 1, 1], [], []>} : vector<4x4xf32>, vector<4x512xf32>, vector<4x512xf32> -> vector<4x512xf32>
    %386 = arith.addf %378, %385 : vector<4x512xf32>
    %c0_337 = arith.constant 0 : index
    %c184_338 = arith.constant 184 : index
    %387 = vector.load %arg10[%c0_337, %c184_338] : memref<8x768xf32, #tpu.memory_space<vmem>>, vector<4x512xf32>
    %c19_339 = arith.constant 19 : index
    %c0_340 = arith.constant 0 : index
    %388 = vector.load %arg4[%c19_339, %c0_340] : memref<27x512xf32, #tpu.memory_space<vmem>>, vector<1x512xf32>
    %389 = vector.broadcast %388 : vector<1x512xf32> to vector<4x512xf32>
    %390 = arith.mulf %387, %389 : vector<4x512xf32>
    %c19_341 = arith.constant 19 : index
    %c0_342 = arith.constant 0 : index
    %c0_343 = arith.constant 0 : index
    %391 = vector.load %arg6[%c19_341, %c0_342, %c0_343] : memref<27x4x4xf32, #tpu.memory_space<vmem>>, vector<1x4x4xf32>
    %392 = vector.shape_cast %391 : vector<1x4x4xf32> to vector<4x4xf32>
    %cst_344 = arith.constant dense<0.000000e+00> : vector<4x512xf32>
    %393 = tpu.matmul %392, %390, %cst_344 {dimension_numbers = #tpu.dot_dimension_numbers<[1], [0], [0], [1], [0, 0, 1, 1], [], []>} : vector<4x4xf32>, vector<4x512xf32>, vector<4x512xf32> -> vector<4x512xf32>
    %394 = arith.addf %386, %393 : vector<4x512xf32>
    %c0_345 = arith.constant 0 : index
    %c185_346 = arith.constant 185 : index
    %395 = vector.load %arg10[%c0_345, %c185_346] : memref<8x768xf32, #tpu.memory_space<vmem>>, vector<4x512xf32>
    %c20_347 = arith.constant 20 : index
    %c0_348 = arith.constant 0 : index
    %396 = vector.load %arg4[%c20_347, %c0_348] : memref<27x512xf32, #tpu.memory_space<vmem>>, vector<1x512xf32>
    %397 = vector.broadcast %396 : vector<1x512xf32> to vector<4x512xf32>
    %398 = arith.mulf %395, %397 : vector<4x512xf32>
    %c20_349 = arith.constant 20 : index
    %c0_350 = arith.constant 0 : index
    %c0_351 = arith.constant 0 : index
    %399 = vector.load %arg6[%c20_349, %c0_350, %c0_351] : memref<27x4x4xf32, #tpu.memory_space<vmem>>, vector<1x4x4xf32>
    %400 = vector.shape_cast %399 : vector<1x4x4xf32> to vector<4x4xf32>
    %cst_352 = arith.constant dense<0.000000e+00> : vector<4x512xf32>
    %401 = tpu.matmul %400, %398, %cst_352 {dimension_numbers = #tpu.dot_dimension_numbers<[1], [0], [0], [1], [0, 0, 1, 1], [], []>} : vector<4x4xf32>, vector<4x512xf32>, vector<4x512xf32> -> vector<4x512xf32>
    %402 = arith.addf %394, %401 : vector<4x512xf32>
    %c0_353 = arith.constant 0 : index
    %c191_354 = arith.constant 191 : index
    %403 = vector.load %arg10[%c0_353, %c191_354] : memref<8x768xf32, #tpu.memory_space<vmem>>, vector<4x512xf32>
    %c21_355 = arith.constant 21 : index
    %c0_356 = arith.constant 0 : index
    %404 = vector.load %arg4[%c21_355, %c0_356] : memref<27x512xf32, #tpu.memory_space<vmem>>, vector<1x512xf32>
    %405 = vector.broadcast %404 : vector<1x512xf32> to vector<4x512xf32>
    %406 = arith.mulf %403, %405 : vector<4x512xf32>
    %c21_357 = arith.constant 21 : index
    %c0_358 = arith.constant 0 : index
    %c0_359 = arith.constant 0 : index
    %407 = vector.load %arg6[%c21_357, %c0_358, %c0_359] : memref<27x4x4xf32, #tpu.memory_space<vmem>>, vector<1x4x4xf32>
    %408 = vector.shape_cast %407 : vector<1x4x4xf32> to vector<4x4xf32>
    %cst_360 = arith.constant dense<0.000000e+00> : vector<4x512xf32>
    %409 = tpu.matmul %408, %406, %cst_360 {dimension_numbers = #tpu.dot_dimension_numbers<[1], [0], [0], [1], [0, 0, 1, 1], [], []>} : vector<4x4xf32>, vector<4x512xf32>, vector<4x512xf32> -> vector<4x512xf32>
    %410 = arith.addf %402, %409 : vector<4x512xf32>
    %c0_361 = arith.constant 0 : index
    %c192_362 = arith.constant 192 : index
    %411 = vector.load %arg10[%c0_361, %c192_362] : memref<8x768xf32, #tpu.memory_space<vmem>>, vector<4x512xf32>
    %c22_363 = arith.constant 22 : index
    %c0_364 = arith.constant 0 : index
    %412 = vector.load %arg4[%c22_363, %c0_364] : memref<27x512xf32, #tpu.memory_space<vmem>>, vector<1x512xf32>
    %413 = vector.broadcast %412 : vector<1x512xf32> to vector<4x512xf32>
    %414 = arith.mulf %411, %413 : vector<4x512xf32>
    %c22_365 = arith.constant 22 : index
    %c0_366 = arith.constant 0 : index
    %c0_367 = arith.constant 0 : index
    %415 = vector.load %arg6[%c22_365, %c0_366, %c0_367] : memref<27x4x4xf32, #tpu.memory_space<vmem>>, vector<1x4x4xf32>
    %416 = vector.shape_cast %415 : vector<1x4x4xf32> to vector<4x4xf32>
    %cst_368 = arith.constant dense<0.000000e+00> : vector<4x512xf32>
    %417 = tpu.matmul %416, %414, %cst_368 {dimension_numbers = #tpu.dot_dimension_numbers<[1], [0], [0], [1], [0, 0, 1, 1], [], []>} : vector<4x4xf32>, vector<4x512xf32>, vector<4x512xf32> -> vector<4x512xf32>
    %418 = arith.addf %410, %417 : vector<4x512xf32>
    %c0_369 = arith.constant 0 : index
    %c193_370 = arith.constant 193 : index
    %419 = vector.load %arg10[%c0_369, %c193_370] : memref<8x768xf32, #tpu.memory_space<vmem>>, vector<4x512xf32>
    %c23_371 = arith.constant 23 : index
    %c0_372 = arith.constant 0 : index
    %420 = vector.load %arg4[%c23_371, %c0_372] : memref<27x512xf32, #tpu.memory_space<vmem>>, vector<1x512xf32>
    %421 = vector.broadcast %420 : vector<1x512xf32> to vector<4x512xf32>
    %422 = arith.mulf %419, %421 : vector<4x512xf32>
    %c23_373 = arith.constant 23 : index
    %c0_374 = arith.constant 0 : index
    %c0_375 = arith.constant 0 : index
    %423 = vector.load %arg6[%c23_373, %c0_374, %c0_375] : memref<27x4x4xf32, #tpu.memory_space<vmem>>, vector<1x4x4xf32>
    %424 = vector.shape_cast %423 : vector<1x4x4xf32> to vector<4x4xf32>
    %cst_376 = arith.constant dense<0.000000e+00> : vector<4x512xf32>
    %425 = tpu.matmul %424, %422, %cst_376 {dimension_numbers = #tpu.dot_dimension_numbers<[1], [0], [0], [1], [0, 0, 1, 1], [], []>} : vector<4x4xf32>, vector<4x512xf32>, vector<4x512xf32> -> vector<4x512xf32>
    %426 = arith.addf %418, %425 : vector<4x512xf32>
    %c0_377 = arith.constant 0 : index
    %c199_378 = arith.constant 199 : index
    %427 = vector.load %arg10[%c0_377, %c199_378] : memref<8x768xf32, #tpu.memory_space<vmem>>, vector<4x512xf32>
    %c24_379 = arith.constant 24 : index
    %c0_380 = arith.constant 0 : index
    %428 = vector.load %arg4[%c24_379, %c0_380] : memref<27x512xf32, #tpu.memory_space<vmem>>, vector<1x512xf32>
    %429 = vector.broadcast %428 : vector<1x512xf32> to vector<4x512xf32>
    %430 = arith.mulf %427, %429 : vector<4x512xf32>
    %c24_381 = arith.constant 24 : index
    %c0_382 = arith.constant 0 : index
    %c0_383 = arith.constant 0 : index
    %431 = vector.load %arg6[%c24_381, %c0_382, %c0_383] : memref<27x4x4xf32, #tpu.memory_space<vmem>>, vector<1x4x4xf32>
    %432 = vector.shape_cast %431 : vector<1x4x4xf32> to vector<4x4xf32>
    %cst_384 = arith.constant dense<0.000000e+00> : vector<4x512xf32>
    %433 = tpu.matmul %432, %430, %cst_384 {dimension_numbers = #tpu.dot_dimension_numbers<[1], [0], [0], [1], [0, 0, 1, 1], [], []>} : vector<4x4xf32>, vector<4x512xf32>, vector<4x512xf32> -> vector<4x512xf32>
    %434 = arith.addf %426, %433 : vector<4x512xf32>
    %c0_385 = arith.constant 0 : index
    %c200_386 = arith.constant 200 : index
    %435 = vector.load %arg10[%c0_385, %c200_386] : memref<8x768xf32, #tpu.memory_space<vmem>>, vector<4x512xf32>
    %c25_387 = arith.constant 25 : index
    %c0_388 = arith.constant 0 : index
    %436 = vector.load %arg4[%c25_387, %c0_388] : memref<27x512xf32, #tpu.memory_space<vmem>>, vector<1x512xf32>
    %437 = vector.broadcast %436 : vector<1x512xf32> to vector<4x512xf32>
    %438 = arith.mulf %435, %437 : vector<4x512xf32>
    %c25_389 = arith.constant 25 : index
    %c0_390 = arith.constant 0 : index
    %c0_391 = arith.constant 0 : index
    %439 = vector.load %arg6[%c25_389, %c0_390, %c0_391] : memref<27x4x4xf32, #tpu.memory_space<vmem>>, vector<1x4x4xf32>
    %440 = vector.shape_cast %439 : vector<1x4x4xf32> to vector<4x4xf32>
    %cst_392 = arith.constant dense<0.000000e+00> : vector<4x512xf32>
    %441 = tpu.matmul %440, %438, %cst_392 {dimension_numbers = #tpu.dot_dimension_numbers<[1], [0], [0], [1], [0, 0, 1, 1], [], []>} : vector<4x4xf32>, vector<4x512xf32>, vector<4x512xf32> -> vector<4x512xf32>
    %442 = arith.addf %434, %441 : vector<4x512xf32>
    %c0_393 = arith.constant 0 : index
    %c201_394 = arith.constant 201 : index
    %443 = vector.load %arg10[%c0_393, %c201_394] : memref<8x768xf32, #tpu.memory_space<vmem>>, vector<4x512xf32>
    %c26_395 = arith.constant 26 : index
    %c0_396 = arith.constant 0 : index
    %444 = vector.load %arg4[%c26_395, %c0_396] : memref<27x512xf32, #tpu.memory_space<vmem>>, vector<1x512xf32>
    %445 = vector.broadcast %444 : vector<1x512xf32> to vector<4x512xf32>
    %446 = arith.mulf %443, %445 : vector<4x512xf32>
    %c26_397 = arith.constant 26 : index
    %c0_398 = arith.constant 0 : index
    %c0_399 = arith.constant 0 : index
    %447 = vector.load %arg6[%c26_397, %c0_398, %c0_399] : memref<27x4x4xf32, #tpu.memory_space<vmem>>, vector<1x4x4xf32>
    %448 = vector.shape_cast %447 : vector<1x4x4xf32> to vector<4x4xf32>
    %cst_400 = arith.constant dense<0.000000e+00> : vector<4x512xf32>
    %449 = tpu.matmul %448, %446, %cst_400 {dimension_numbers = #tpu.dot_dimension_numbers<[1], [0], [0], [1], [0, 0, 1, 1], [], []>} : vector<4x4xf32>, vector<4x512xf32>, vector<4x512xf32> -> vector<4x512xf32>
    %450 = arith.addf %442, %449 : vector<4x512xf32>
    %c0_401 = arith.constant 0 : index
    %c0_402 = arith.constant 0 : index
    %451 = vector.load %arg8[%c0_401, %c0_402] : memref<4x1xf32, #tpu.memory_space<vmem>>, vector<4x1xf32>
    %452 = vector.broadcast %451 : vector<4x1xf32> to vector<4x512xf32>
    %453 = arith.addf %450, %452 : vector<4x512xf32>
    %cst_403 = arith.constant 0.000000e+00 : f32
    %454 = vector.broadcast %cst_403 : f32 to vector<4x512xf32>
    %455 = arith.maximumf %453, %454 : vector<4x512xf32>
    %c0_404 = arith.constant 0 : index
    %c0_405 = arith.constant 0 : index
    %c0_406 = arith.constant 0 : index
    %456 = vector.load %arg9[%c0_404, %c0_405, %c0_406] : memref<1x4x512xf32, #tpu.memory_space<vmem>>, vector<1x4x512xf32>
    %457 = vector.shape_cast %456 : vector<1x4x512xf32> to vector<4x512xf32>
    %458 = vector.shape_cast %455 : vector<4x512xf32> to vector<1x4x512xf32>
    tpu.vector_store %arg9[%c0_404, %c0_405, %c0_406], %458 {strides = array<i32>} : memref<1x4x512xf32, #tpu.memory_space<vmem>>, vector<1x4x512xf32>,
    return
  }
  func.func @transform_0(%arg0: i32) -> (i32, i32, i32) {
    %c0_i32 = arith.constant 0 : i32
    %c0_i32_0 = arith.constant 0 : i32
    %c0_i32_1 = arith.constant 0 : i32
    return %arg0, %c0_i32, %c0_i32_0 : i32, i32, i32
  }
  func.func @transform_1(%arg0: i32) -> (i32, i32, i32) {
    %c0_i32 = arith.constant 0 : i32
    %c0_i32_0 = arith.constant 0 : i32
    %c0_i32_1 = arith.constant 0 : i32
    return %arg0, %c0_i32, %c0_i32_0 : i32, i32, i32
  }
  func.func @transform_2(%arg0: i32) -> (i32, i32) {
    %c0_i32 = arith.constant 0 : i32
    %c0_i32_0 = arith.constant 0 : i32
    %c0_i32_1 = arith.constant 0 : i32
    return %c0_i32, %c0_i32_0 : i32, i32
  }
  func.func @transform_3(%arg0: i32) -> (i32, i32) {
    %c0_i32 = arith.constant 0 : i32
    %c0_i32_0 = arith.constant 0 : i32
    %c0_i32_1 = arith.constant 0 : i32
    return %c0_i32, %c0_i32_0 : i32, i32
  }
  func.func @transform_4(%arg0: i32) -> (i32, i32, i32) {
    %c0_i32 = arith.constant 0 : i32
    %c0_i32_0 = arith.constant 0 : i32
    %c0_i32_1 = arith.constant 0 : i32
    %c0_i32_2 = arith.constant 0 : i32
    return %c0_i32, %c0_i32_0, %c0_i32_1 : i32, i32, i32
  }
  func.func @transform_5(%arg0: i32) -> (i32, i32, i32) {
    %c0_i32 = arith.constant 0 : i32
    %c0_i32_0 = arith.constant 0 : i32
    %c0_i32_1 = arith.constant 0 : i32
    %c0_i32_2 = arith.constant 0 : i32
    return %c0_i32, %c0_i32_0, %c0_i32_1 : i32, i32, i32
  }
  func.func @transform_6(%arg0: i32) -> (i32, i32) {
    %c0_i32 = arith.constant 0 : i32
    %c0_i32_0 = arith.constant 0 : i32
    %c0_i32_1 = arith.constant 0 : i32
    return %c0_i32, %c0_i32_0 : i32, i32
  }
  func.func @transform_7(%arg0: i32) -> (i32, i32) {
    %c0_i32 = arith.constant 0 : i32
    %c0_i32_0 = arith.constant 0 : i32
    %c0_i32_1 = arith.constant 0 : i32
    return %c0_i32, %c0_i32_0 : i32, i32
  }
  func.func @transform_8(%arg0: i32) -> (i32, i32, i32) {
    %c0_i32 = arith.constant 0 : i32
    %c0_i32_0 = arith.constant 0 : i32
    %c0_i32_1 = arith.constant 0 : i32
    return %arg0, %c0_i32, %c0_i32_0 : i32, i32, i32
  }
}

</mosaic_0001>

<bundles_post_ra>
// kernel: up3d_forward.1
= control target key start
LH: loop header
LB: loop body
LE: loop exit
PB: predicated region body
PF: predicated region fallthrough
CT: control target
= control target key end

     0   :  { %s12911_s27 = smov 0   ;;  %s16084_s0 = inlined_call_operand.vmem [shape: f32[2,4,48], index: 0, kind: input, shape index: {}]   ;;  %s16085_s1 = inlined_call_operand.vmem [shape: f32[2,4,512], index: 1, kind: input, shape index: {}]   ;;  %s16086_s2 = inlined_call_operand.vmem [shape: f32[48,512], index: 2, kind: input, shape index: {}]   ;;  %s16087_s3 = inlined_call_operand.vmem [shape: f32[27,512], index: 3, kind: input, shape index: {}]   ;;  %s16088_s4 = inlined_call_operand.vmem [shape: f32[27,4,8], index: 4, kind: input, shape index: {}]   ;;  %s16089_s5 = inlined_call_operand.vmem [shape: f32[27,4,4], index: 5, kind: input, shape index: {}]   ;;  %s16090_s6 = inlined_call_operand.vmem [shape: f32[4,1], index: 6, kind: input, shape index: {}]   ;;  %s16091_s7 = inlined_call_operand.vmem [shape: f32[4,1], index: 7, kind: input, shape index: {}]   ;;  %s16092_s8 = inlined_call_operand.vmem [shape: f32[2,4,512], index: 8, kind: output, shape index: {}]  }
   0x1 LB: > { %s12226_s28 = sadd.s32 4294967295, %s12845_s27   ;;  %p12230_p0 = scmp.ge.s32.totalorder %s12845_s27, 1  ;;  %s12845_s27 = sphi %s12911_s27, %s18_s27  }
   0x2   : > { %p271_p1 = scmp.lt.s32.totalorder %s12845_s27, 3 }
   0x4   : > { %p272_p2 = pnand %p12230_p0, %p271_p1 }
   0x6   : > { %275 = sbr.rel (%p272_p2) target bundleno = 1598 (0x63e), region = 52 }
   0xd   : > { %v327_v0 = vld [vmem:[%s16086_s2 + $0x8] sm:$0xff]  ;;  %v329_v2 = vld [vmem:[%s16086_s2 + $0x18] sm:$0xff]  ;;  %v531_v3 = vlaneseq  ;;  %p12930_p3 = scmp.lt.s32.totalorder %s12226_s28, 1  ;;  %v326_v6 = vld [vmem:[%s16086_s2] sm:$0xff]  ;;  %v12847_v8 = vmov 0.0   ;;  %s12848_s19 = smov 56  }
   0xe   : > { %v331_v1 = vld [vmem:[%s16086_s2 + $0x28] sm:$0xff]  ;;  %v333_v5 = vld [vmem:[%s16086_s2 + $0x38] sm:$0xff]  ;;  %v330_v7 = vld [vmem:[%s16086_s2 + $0x20] sm:$0xff]  ;;  %418 = vmatprep.mubr.f32.mxu0 %v12847_v8  ;;  %323 = vst [vmem:[#allocation2] sm:$0xff] %v12847_v8  ;;  %489 = vmatprep.mubr.f32.mxu1 %v12847_v8  ;;  %vm350_vm0 = vcmask 392192   ;;  %s12849_s10 = smov 55  }
   0xf   : > { %v12562_v4 = vpack.c.bf16 %v331_v1, %v327_v0  ;;  %324 = vst [vmem:[#allocation2 + $0x28] sm:$0xff] %v12847_v8  ;;  %v12574_v9 = vpack.c.bf16 %v333_v5, %v329_v2  ;;  %v12564_v10 = vpack.c.bf16 %v330_v7, %v326_v6  ;;  %v328_v11 = vld [vmem:[%s16086_s2 + $0x10] sm:$0xff]  ;;  %v335_v13 = vld [vmem:[%s16086_s2 + $0x48] sm:$0xff]  ;;  %v532_v14 = vshrl.u32 %v531_v3, 7  ;;  %v337_v17 = vld [vmem:[%s16086_s2 + $0x58] sm:$0xff]  ;;  %s16238_s28 = smov (!%p12930_p3, %s12226_s28), 1 }
  0x10   : > { %v332_v12 = vld [vmem:[%s16086_s2 + $0x30] sm:$0xff]  ;;  %v339_v16 = vld [vmem:[%s16086_s2 + $0x68] sm:$0xff]  ;;  %v341_v18 = vld [vmem:[%s16086_s2 + $0x78] sm:$0xff]  ;;  %s16093_s30 = sshll.u32 %s16238_s28, 4  ;;  %s12231_s16 = sshll.u32 %s16238_s28, 2  ;;  %vm597_vm1 = vcmask 457728  }
  0x11   : > { %12563 = vmatprep.subr.bf16.mxu0 %v12562_v4  ;;  %v12576_v15 = vpack.c.bf16 %v332_v12, %v328_v11  ;;  %12575 = vmatprep.subr.bf16.mxu1 %v12574_v9  ;;  %v12566_v19 = vpack.c.bf16 %v339_v16, %v335_v13  ;;  %v12578_v20 = vpack.c.bf16 %v341_v18, %v337_v17  ;;  %v12971_v21 = vsub.s32 2, %v532_v14  ;;  %v12238_v22 = vld [vmem:[%s16087_s3 + $0x1] ss:$8 sm:$0xf]  ;;  %s317_s18 = scalar_lea.vmem %s16085_s1, %s16093_s30  ;;  %s312_s26 = scalar_lea.vmem %s16084_s0, %s12231_s16 }
  0x12   : > { %12565 = vmatpush1.bf16.msra.mxu0 %v12564_v10  ;;  %v12976_v23 = vsub.s32 0, %v532_v14  ;;  %v334_v24 = vld [vmem:[%s16086_s2 + $0x40] sm:$0xff]  ;;  %v336_v26 = vld [vmem:[%s16086_s2 + $0x50] sm:$0xff]  ;;  %v12990_v28 = vsub.s32 3, %v532_v14  ;;  %v12992_v29 = vsub.s32 1, %v532_v14  ;;  %v343_v33 = vld [vmem:[%s16086_s2 + $0x88] sm:$0xff] }
  0x13   : > { %16128 = vst [vmem:[#allocation3_spill] sm:$0xff] %v12971_v21  ;;  %12577 = vmatpush1.bf16.msra.mxu1 %v12576_v15  ;;  %v338_v25 = vld [vmem:[%s16086_s2 + $0x60] sm:$0xff]  ;;  %v340_v27 = vld [vmem:[%s16086_s2 + $0x70] sm:$0xff]  ;;  %12567 = vmatprep.subr.bf16.mxu0 %v12566_v19  ;;  %v584_v30 = vrot.slane %v12238_v22, %v12971_v21  ;;  %v347_v34 = vld [vmem:[%s16086_s2 + $0xa8] sm:$0xff]  ;;  %s12850_s14 = smov 57   ;;  %s12851_s13 = smov 63  }
  0x14   : > { %16129 = vst [vmem:[#allocation4_spill] sm:$0xff] %v12976_v23  ;;  %16130 = vst [vmem:[#allocation5_spill] sm:$0xff] %v12990_v28  ;;  %12579 = vmatprep.subr.bf16.mxu1 %v12578_v20  ;;  %v576_v31 = vrot.slane %v12238_v22, %v12976_v23  ;;  %v12568_v32 = vpack.c.bf16 %v338_v25, %v334_v24  ;;  %v345_v35 = vld [vmem:[%s16086_s2 + $0x98] sm:$0xff]  ;;  %v12580_v36 = vpack.c.bf16 %v340_v27, %v336_v26  ;;  %v342_v39 = vld [vmem:[%s16086_s2 + $0x80] sm:$0xff]  ;;  %s12852_s20 = smov 64   ;;  %s12853_s23 = smov 65  }
  0x15   : > { %16131 = vst [vmem:[#allocation6_spill] sm:$0xff] %v12992_v29  ;;  %v12570_v37 = vpack.c.bf16 %v347_v34, %v343_v33  ;;  %v349_v38 = vld [vmem:[%s16086_s2 + $0xb8] sm:$0xff]  ;;  %v346_v40 = vld [vmem:[%s16086_s2 + $0xa0] sm:$0xff]  ;;  %593 = vrot.lane.b32.xlu1 %v584_v30, %s12848_s19  ;;  %v588_v42 = vrot.slane %v12238_v22, %v12990_v28  ;;  %v580_v43 = vrot.slane %v12238_v22, %v12992_v29  ;;  %v344_v44 = vld [vmem:[%s16086_s2 + $0x90] sm:$0xff]  ;;  %s12855_s11 = smov 72   ;;  %s12856_s16 = smov 73  }
  0x16   : > { %589 = vrot.lane.b32.xlu0 %v576_v31, %s12848_s19  ;;  %v12582_v41 = vpack.c.bf16 %v349_v38, %v345_v35  ;;  %v348_v45 = vld [vmem:[%s16086_s2 + $0xb0] sm:$0xff]  ;;  %12569 = vmatpush1.bf16.msra.mxu0 %v12568_v32  ;;  %v12572_v46 = vpack.c.bf16 %v346_v40, %v342_v39  ;;  %v496_v48 = vld [vmem:[%s317_s18] sm:$0xff]  ;;  %v497_v49 = vld [vmem:[%s317_s18 + $0x8] sm:$0xff]  ;;  %s12857_s21 = smov 119   ;;  %s12858_s25 = smov 120   ;;  %vm555_vm2 = vcmask 449536  }
  0x17   : > { %12581 = vmatpush1.bf16.msra.mxu1 %v12580_v36  ;;  %v12584_v47 = vpack.c.bf16 %v348_v45, %v344_v44  ;;  %12571 = vmatprep.subr.bf16.mxu0 %v12570_v37  ;;  %v500_v50 = vcombine.high %v496_v48, %v496_v48  ;;  %v501_v51 = vcombine.high %v497_v49, %v497_v49  ;;  %v529_v52 = vld [vmem:[%s16087_s3] ss:$8 sm:$0xf]  ;;  %v12244_v58 = vld [vmem:[%s16087_s3 + $0x2] ss:$8 sm:$0xf] }
  0x18   : > { %12583 = vmatprep.subr.bf16.mxu1 %v12582_v41  ;;  %504 = vst [vmem:[#allocation2 + $0x8] sm:$0xf] %v496_v48  ;;  %506 = vst [vmem:[#allocation2 + $0x18] sm:$0xf] %v497_v49  ;;  %v325_v53 = vld [vmem:[%s312_s26] sm:$0xf]  ;;  %v538_v54 = vrot.slane %v529_v52, %v12992_v29  ;;  %v534_v55 = vrot.slane %v529_v52, %v12976_v23  ;;  %v546_v56 = vrot.slane %v529_v52, %v12990_v28 }
  0x19   : > { %595 = vrot.lane.b32.xlu1 %v588_v42, %s12848_s19  ;;  %505 = vst [vmem:[#allocation2 + $0x10] sm:$0xf] %v500_v50  ;;  %507 = vst [vmem:[#allocation2 + $0x20] sm:$0xf] %v501_v51  ;;  %v542_v57 = vrot.slane %v529_v52, %v12971_v21  ;;  %v962_v59 = vrot.slane %v12244_v58, %v12992_v29  ;;  %v958_v60 = vrot.slane %v12244_v58, %v12976_v23  ;;  %s12854_s26 = smov 71   ;;  %s12859_s12 = smov 121  }
  0x1a   : > { %591 = vrot.lane.b32.xlu0 %v580_v43, %s12848_s19  ;;  %12573 = vmatpush1.bf16.msra.mxu0 %v12572_v46  ;;  %v970_v61 = vrot.slane %v12244_v58, %v12990_v28  ;;  %v966_v62 = vrot.slane %v12244_v58, %v12971_v21  ;;  %v12248_v63 = vld [vmem:[%s16087_s3 + $0x3] ss:$8 sm:$0xf]  ;;  %v12252_v4 = vld [vmem:[%s16087_s3 + $0x4] ss:$8 sm:$0xf] }
  0x1b   : > { %12585 = vmatpush1.bf16.msra.mxu1 %v12584_v47  ;;  %v1178_v0 = vrot.slane %v12248_v63, %v12992_v29  ;;  %v1174_v1 = vrot.slane %v12248_v63, %v12976_v23  ;;  %v1186_v2 = vrot.slane %v12248_v63, %v12990_v28  ;;  %v1182_v3 = vrot.slane %v12248_v63, %v12971_v21  ;;  %v12256_v9 = vld [vmem:[%s16087_s3 + $0x5] ss:$8 sm:$0xf]  ;;  %v12260_v14 = vld [vmem:[%s16087_s3 + $0x6] ss:$8 sm:$0xf] }
  0x1c   : > { %v1394_v5 = vrot.slane %v12252_v4, %v12992_v29  ;;  %v1390_v6 = vrot.slane %v12252_v4, %v12976_v23  ;;  %v1402_v7 = vrot.slane %v12252_v4, %v12990_v28  ;;  %v1609_v10 = vrot.slane %v12256_v9, %v12992_v29  ;;  %v12264_v19 = vld [vmem:[%s16087_s3 + $0x7] ss:$8 sm:$0xf]  ;;  %v12268_v26 = vld [vmem:[%s16087_s3 + $0x20] ss:$8 sm:$0xf] }
  0x1d   : > { %12236 = vmatmul.mubr.msk.f32.vlgmr.msra.gmra.mrb[0].mxu0 %vm350_vm0, %v325_v53  ;;  %549 = vrot.lane.b32.xlu1 %v538_v54, %s12849_s10  ;;  %v1605_v11 = vrot.slane %v12256_v9, %v12976_v23  ;;  %v1617_v12 = vrot.slane %v12256_v9, %v12990_v28  ;;  %v1613_v13 = vrot.slane %v12256_v9, %v12971_v21  ;;  %v12272_v33 = vld [vmem:[%s16087_s3 + $0x21] ss:$8 sm:$0xf]  ;;  %v12276_v38 = vld [vmem:[%s16087_s3 + $0x22] ss:$8 sm:$0xf] }
  0x1e   : > { %12237 = vmatmul.mubr.msk.f32.vlgmr.msra.gmra.mrb[0].mxu1 %vm350_vm0, %v325_v53  ;;  %547 = vrot.lane.b32.xlu0 %v534_v55, %s12849_s10  ;;  %v1823_v15 = vrot.slane %v12260_v14, %v12992_v29  ;;  %v1819_v16 = vrot.slane %v12260_v14, %v12976_v23  ;;  %v1831_v17 = vrot.slane %v12260_v14, %v12990_v28  ;;  %v12280_v43 = vld [vmem:[%s16087_s3 + $0x23] ss:$8 sm:$0xf]  ;;  %v12284_v48 = vld [vmem:[%s16087_s3 + $0x24] ss:$8 sm:$0xf] }
  0x1f   : > { %705 = vmatprep.mubr.f32.mxu0 %v12847_v8  ;;  %776 = vmatprep.mubr.f32.mxu1 %v12847_v8  ;;  %v1398_v8 = vrot.slane %v12252_v4, %v12971_v21  ;;  %v1827_v18 = vrot.slane %v12260_v14, %v12971_v21  ;;  %v2037_v20 = vrot.slane %v12264_v19, %v12992_v29  ;;  %s12860_s18 = smov 127   ;;  %v12292_v53 = vld [vmem:[%s16087_s3 + $0x26] ss:$8 sm:$0xf]  ;;  %s12861_s29 = smov 1   ;;  %vm979_vm3 = vcmask 465920  }
  0x20   : > { %v2033_v22 = vrot.slane %v12264_v19, %v12976_v23  ;;  %v2045_v24 = vrot.slane %v12264_v19, %v12990_v28  ;;  %v2041_v25 = vrot.slane %v12264_v19, %v12971_v21  ;;  %v2247_v27 = vrot.slane %v12268_v26, %v12976_v23  ;;  %s16103_s17 = smov 7   ;;  %s16101_s9 = smov 8  }
  0x21   : > { %553 = vrot.lane.b32.xlu1 %v546_v56, %s12849_s10  ;;  %v2251_v30 = vrot.slane %v12268_v26, %v12992_v29  ;;  %v2259_v31 = vrot.slane %v12268_v26, %v12990_v28  ;;  %v2255_v32 = vrot.slane %v12268_v26, %v12971_v21  ;;  %v2461_v34 = vrot.slane %v12272_v33, %v12976_v23  ;;  %s16094_s24 = smov 9   ;;  %s16138_s15 = smov 7  }
  0x22   : > { %551 = vrot.lane.b32.xlu0 %v542_v57, %s12849_s10  ;;  %v2465_v35 = vrot.slane %v12272_v33, %v12992_v29  ;;  %v2473_v36 = vrot.slane %v12272_v33, %v12990_v28  ;;  %v2469_v37 = vrot.slane %v12272_v33, %v12971_v21  ;;  %v2677_v39 = vrot.slane %v12276_v38, %v12976_v23  ;;  %s16140_s22 = smov 9  }
  0x23   : > { %v2681_v40 = vrot.slane %v12276_v38, %v12992_v29  ;;  %v2685_v41 = vrot.slane %v12276_v38, %v12971_v21  ;;  %v2689_v42 = vrot.slane %v12276_v38, %v12990_v28  ;;  %v2896_v44 = vrot.slane %v12280_v43, %v12992_v29 }
  0x24   : > { %v2892_v45 = vrot.slane %v12280_v43, %v12976_v23  ;;  %v2904_v46 = vrot.slane %v12280_v43, %v12990_v28  ;;  %v2900_v47 = vrot.slane %v12280_v43, %v12971_v21  ;;  %v3108_v49 = vrot.slane %v12284_v48, %v12976_v23 }
  0x25   : > { %973 = vrot.lane.b32.xlu1 %v962_v59, %s12850_s14  ;;  %v3112_v50 = vrot.slane %v12284_v48, %v12992_v29  ;;  %v3116_v51 = vrot.slane %v12284_v48, %v12971_v21  ;;  %v3120_v52 = vrot.slane %v12284_v48, %v12990_v28  ;;  %v3507_v54 = vrot.slane %v12292_v53, %v12976_v23 }
  0x26   : > { %971 = vrot.lane.b32.xlu0 %v958_v60, %s12850_s14  ;;  %v3511_v55 = vrot.slane %v12292_v53, %v12992_v29  ;;  %v3515_v56 = vrot.slane %v12292_v53, %v12971_v21  ;;  %v3519_v57 = vrot.slane %v12292_v53, %v12990_v28  ;;  %v12304_v53 = vld [vmem:[%s16087_s3 + $0x41] ss:$8 sm:$0xf]  ;;  %vm1195_vm4 = vcmask 515072  }
  0x27   : > { %vm1411_vm5 = vcmask 523264   ;;  %vm1226_vm6 = vcmask 531456   ;;  %vm1010_vm7 = vcmask 580608   ;;  %vm628_vm8 = vcmask 588800  }
  0x28   : > { %vm16096_vm9 = vcmask 596992   ;;  %vm2482_vm10 = vcmask 973824   ;;  %vm2698_vm11 = vcmask 982016   ;;  %vm2913_vm12 = vcmask 990208  }
  0x29   : > { %977 = vrot.lane.b32.xlu1 %v970_v61, %s12850_s14  ;;  %vm16100_vm13 = vcmask 1039360   ;;  %vm16099_vm14 = vcmask 7168   ;;  %vm16098_vm15 = vcmask 56320   ;;  %vm637_vm0 = vcmask 64512  }
  0x2a   : > { %975 = vrot.lane.b32.xlu0 %v966_v62, %s12850_s14 }
  0x2d   : > { %1189 = vrot.lane.b32.xlu1 %v1178_v0, %s12851_s13 }
  0x2e   : > { %1187 = vrot.lane.b32.xlu0 %v1174_v1, %s12851_s13 }
  0x31   : > { %1193 = vrot.lane.b32.xlu1 %v1186_v2, %s12851_s13 }
  0x32   : > { %1191 = vrot.lane.b32.xlu0 %v1182_v3, %s12851_s13 }
  0x35   : > { %1405 = vrot.lane.b32.xlu1 %v1394_v5, %s12852_s20 }
  0x36   : > { %1403 = vrot.lane.b32.xlu0 %v1390_v6, %s12852_s20 }
  0x39   : > { %1409 = vrot.lane.b32.xlu1 %v1402_v7, %s12852_s20 }
  0x3a   : > { %1407 = vrot.lane.b32.xlu0 %v1398_v8, %s12852_s20 }
  0x3d   : > { %1620 = vrot.lane.b32.xlu1 %v1609_v10, %s12853_s23 }
  0x3e   : > { %1618 = vrot.lane.b32.xlu0 %v1605_v11, %s12853_s23 }
  0x41   : > { %1624 = vrot.lane.b32.xlu1 %v1617_v12, %s12853_s23 }
  0x42   : > { %1622 = vrot.lane.b32.xlu0 %v1613_v13, %s12853_s23 }
  0x45   : > { %1834 = vrot.lane.b32.xlu1 %v1823_v15, %s12854_s26 }
  0x46   : > { %1832 = vrot.lane.b32.xlu0 %v1819_v16, %s12854_s26 }
  0x49   : > { %1838 = vrot.lane.b32.xlu1 %v1831_v17, %s12854_s26 }
  0x4a   : > { %1836 = vrot.lane.b32.xlu0 %v1827_v18, %s12854_s26 }
  0x4d   : > { %2048 = vrot.lane.b32.xlu1 %v2037_v20, %s12855_s11 }
  0x4e   : > { %2046 = vrot.lane.b32.xlu0 %v2033_v22, %s12855_s11 }
  0x51   : > { %2052 = vrot.lane.b32.xlu1 %v2045_v24, %s12855_s11 }
  0x52   : > { %2050 = vrot.lane.b32.xlu0 %v2041_v25, %s12855_s11 }
  0x55   : > { %2260 = vrot.lane.b32.xlu1 %v2247_v27, %s12856_s16 }
  0x56   : > { %2262 = vrot.lane.b32.xlu0 %v2251_v30, %s12856_s16  ;;  %v12296_v30 = vld [vmem:[%s16087_s3 + $0x27] ss:$8 sm:$0xf] }
  0x59   : > { %2264 = vrot.lane.b32.xlu1 %v2255_v32, %s12856_s16  ;;  %v3721_v32 = vrot.slane %v12296_v30, %v12976_v23 }
  0x5a   : > { %2266 = vrot.lane.b32.xlu0 %v2259_v31, %s12856_s16 }
  0x5d   : > { %2476 = vrot.lane.b32.xlu1 %v2465_v35, %s12857_s21  ;;  %v3729_v35 = vrot.slane %v12296_v30, %v12971_v21 }
  0x5e   : > { %2474 = vrot.lane.b32.xlu0 %v2461_v34, %s12857_s21 }
  0x61   : > { %2480 = vrot.lane.b32.xlu1 %v2473_v36, %s12857_s21 }
  0x62   : > { %2478 = vrot.lane.b32.xlu0 %v2469_v37, %s12857_s21 }
  0x65   : > { %2690 = vrot.lane.b32.xlu1 %v2677_v39, %s12858_s25  ;;  %v3725_v39 = vrot.slane %v12296_v30, %v12992_v29 }
  0x66   : > { %2692 = vrot.lane.b32.xlu0 %v2681_v40, %s12858_s25 }
  0x69   : > { %2694 = vrot.lane.b32.xlu1 %v2685_v41, %s12858_s25 }
  0x6a   : > { %2696 = vrot.lane.b32.xlu0 %v2689_v42, %s12858_s25  ;;  %v3733_v42 = vrot.slane %v12296_v30, %v12990_v28 }
  0x6d   : > { %2907 = vrot.lane.b32.xlu1 %v2896_v44, %s12859_s12 }
  0x6e   : > { %2905 = vrot.lane.b32.xlu0 %v2892_v45, %s12859_s12  ;;  %v12300_v45 = vld [vmem:[%s16087_s3 + $0x40] ss:$8 sm:$0xf] }
  0x6f   : > { %v3935_v48 = vrot.slane %v12300_v45, %v12976_v23 }
  0x71   : > { %2911 = vrot.lane.b32.xlu1 %v2904_v46, %s12859_s12 }
  0x72   : > { %2909 = vrot.lane.b32.xlu0 %v2900_v47, %s12859_s12  ;;  %v3939_v47 = vrot.slane %v12300_v45, %v12992_v29 }
  0x75   : > { %3121 = vrot.lane.b32.xlu1 %v3108_v49, %s12860_s18 }
  0x76   : > { %3123 = vrot.lane.b32.xlu0 %v3112_v50, %s12860_s18  ;;  %v3947_v50 = vrot.slane %v12300_v45, %v12990_v28 }
  0x79   : > { %3125 = vrot.lane.b32.xlu1 %v3116_v51, %s12860_s18  ;;  %v3943_v51 = vrot.slane %v12300_v45, %v12971_v21 }
  0x7a   : > { %3127 = vrot.lane.b32.xlu0 %v3120_v52, %s12860_s18 }
  0x7d   : > { %3520 = vrot.lane.b32.xlu1 %v3507_v54, %s12861_s29 }
  0x7e   : > { %3522 = vrot.lane.b32.xlu0 %v3511_v55, %s12861_s29  ;;  %v4149_v55 = vrot.slane %v12304_v53, %v12976_v23 }
  0x81   : > { %3524 = vrot.lane.b32.xlu1 %v3515_v56, %s12861_s29  ;;  %v4157_v56 = vrot.slane %v12304_v53, %v12971_v21 }
  0x82   : > { %3526 = vrot.lane.b32.xlu0 %v3519_v57, %s12861_s29  ;;  %v4153_v57 = vrot.slane %v12304_v53, %v12992_v29 }
  0x87   : > { %v13181_v58 = vpop.permute.xlu1 %593 }
  0x88   : > { %v13183_v59 = vpop.permute.xlu0 %589 }
  0x89   : > { %v606_v60 = vmul.f32 0.0, %v13183_v59 }
  0x8b   : > { %618 = vrot.lane.b32.xlu0 %v606_v60, %s12855_s11  ;;  %v13187_v61 = vpop.permute.xlu1 %595  ;;  %v4161_v60 = vrot.slane %v12304_v53, %v12990_v28 }
  0x8c   : > { %v13189_v62 = vpop.permute.xlu0 %591 }
  0x8f   : > { %v13191_v63 = vpop.permute.xlu1 %549 }
  0x90   : > { %v13193_v0 = vpop.permute.xlu0 %547 }
  0x91   : > { %v564_v1 = vmul.f32 0.0, %v13193_v0  ;;  %v556_v45 = vsel %vm555_vm2, %v13193_v0, %v13191_v63 }
  0x93   : > { %788 = vrot.lane.b32.xlu1 %v564_v1, %s12856_s16  ;;  %v13197_v2 = vpop.permute.xlu1 %553 }
  0x94   : > { %v13199_v3 = vpop.permute.xlu0 %551 }
  0x95   : > { %v558_v0 = vsel %vm555_vm2, %v13199_v3, %v13197_v2 }
  0x97   : > { %v13201_v4 = vpop.permute.xlu1 %973 }
  0x98   : > { %v13203_v5 = vpop.permute.xlu0 %971 }
  0x99   : > { %v988_v6 = vmul.f32 0.0, %v13203_v5 }
  0x9b   : > { %1000 = vrot.lane.b32.xlu0 %v988_v6, %s12854_s26  ;;  %v13207_v7 = vpop.permute.xlu1 %977 }
  0x9c   : > { %v13209_v8 = vpop.permute.xlu0 %975 }
  0x9f   : > { %v13211_v9 = vpop.permute.xlu1 %1189 }
  0xa0   : > { %v13213_v10 = vpop.permute.xlu0 %1187 }
  0xa1   : > { %v1204_v11 = vmul.f32 0.0, %v13213_v10 }
  0xa3   : > { %1216 = vrot.lane.b32.xlu1 %v1204_v11, %s12853_s23  ;;  %v13217_v12 = vpop.permute.xlu1 %1193 }
  0xa4   : > { %v13219_v13 = vpop.permute.xlu0 %1191 }
  0xa7   : > { %v13221_v14 = vpop.permute.xlu1 %1405 }
  0xa8   : > { %v13223_v15 = vpop.permute.xlu0 %1403 }
  0xa9   : > { %v1420_v16 = vmul.f32 0.0, %v13223_v15 }
  0xab   : > { %1432 = vrot.lane.b32.xlu0 %v1420_v16, %s12852_s20  ;;  %v13227_v17 = vpop.permute.xlu1 %1409 }
  0xac   : > { %v13229_v18 = vpop.permute.xlu0 %1407 }
  0xaf   : > { %v13231_v19 = vpop.permute.xlu1 %1620 }
  0xb0   : > { %v13233_v20 = vpop.permute.xlu0 %1618 }
  0xb1   : > { %v1634_v22 = vmul.f32 0.0, %v13233_v20 }
  0xb3   : > { %1646 = vrot.lane.b32.xlu1 %v1634_v22, %s12851_s13  ;;  %v13237_v24 = vpop.permute.xlu1 %1624 }
  0xb4   : > { %v13239_v25 = vpop.permute.xlu0 %1622 }
  0xb7   : > { %v13241_v26 = vpop.permute.xlu1 %1834 }
  0xb8   : > { %v13243_v27 = vpop.permute.xlu0 %1832 }
  0xb9   : > { %v1848_v31 = vmul.f32 0.0, %v13243_v27 }
  0xbb   : > { %1860 = vrot.lane.b32.xlu0 %v1848_v31, %s12850_s14  ;;  %v13251_v33 = vpop.permute.xlu1 %1838 }
  0xbc   : > { %v13253_v34 = vpop.permute.xlu0 %1836 }
  0xbf   : > { %3734 = vrot.lane.b32.xlu0 %v3721_v32, %s16103_s17  ;;  %v13257_v36 = vpop.permute.xlu1 %2048 }
  0xc0   : > { %v13259_v37 = vpop.permute.xlu0 %2046 }
  0xc1   : > { %v2062_v38 = vmul.f32 0.0, %v13259_v37 }
  0xc3   : > { %2074 = vrot.lane.b32.xlu1 %v2062_v38, %s12848_s19  ;;  %3738 = vrot.lane.b32.xlu0 %v3729_v35, %s16103_s17  ;;  %v13265_v40 = vpop.permute.xlu1 %2052 }
  0xc4   : > { %v13267_v41 = vpop.permute.xlu0 %2050 }
  0xc7   : > { %3736 = vrot.lane.b32.xlu1 %v3725_v39, %s16103_s17  ;;  %v13271_v43 = vpop.permute.xlu1 %2260 }
  0xc8   : > { %v13273_v44 = vpop.permute.xlu0 %2262  ;;  %v2276_v46 = vmul.f32 0.0, %v13271_v43 }
  0xca   : > { %2288 = vrot.lane.b32.xlu0 %v2276_v46, %s12849_s10 }
  0xcb   : > { %3740 = vrot.lane.b32.xlu1 %v3733_v42, %s16103_s17  ;;  %v13306_v35 = vpop.permute.xlu1 %2264  ;;  %v598_v42 = vsel %vm597_vm1, %v13183_v59, %v13189_v62  ;;  %v600_v59 = vsel %vm597_vm1, %v13181_v58, %v13187_v61 }
  0xcc   : > { %v13283_v49 = vpop.permute.xlu0 %2266 }
  0xce   : > { %3950 = vrot.lane.b32.xlu0 %v3939_v47, %s16101_s9 }
  0xcf   : > { %3948 = vrot.lane.b32.xlu1 %v3935_v48, %s16101_s9  ;;  %v13308_v38 = vpop.permute.xlu1 %2476 }
  0xd0   : > { %v13289_v52 = vpop.permute.xlu0 %2474 }
  0xd1   : > { %v2491_v54 = vmul.f32 0.0, %v13289_v52 }
  0xd2   : > { %3954 = vrot.lane.b32.xlu0 %v3947_v50, %s16101_s9 }
  0xd3   : > { %3952 = vrot.lane.b32.xlu1 %v3943_v51, %s16101_s9  ;;  %v13322_v50 = vpop.permute.xlu1 %2480 }
  0xd4   : > { %v13332_v51 = vpop.permute.xlu0 %2478 }
  0xd6   : > { %4162 = vrot.lane.b32.xlu0 %v4149_v55, %s16094_s24  ;;  %v980_v55 = vsel %vm979_vm3, %v13203_v5, %v13201_v4  ;;  %v982_v5 = vsel %vm979_vm3, %v13209_v8, %v13207_v7 }
  0xd7   : > { %2503 = vrot.lane.b32.xlu1 %v2491_v54, %s16094_s24 }
  0xda   : > { %4166 = vrot.lane.b32.xlu0 %v4157_v56, %s16094_s24  ;;  %v1196_v56 = vsel %vm1195_vm4, %v13213_v10, %v13211_v9  ;;  %v1198_v10 = vsel %vm1195_vm4, %v13219_v13, %v13217_v12 }
  0xdb   : > { %4164 = vrot.lane.b32.xlu1 %v4153_v57, %s16094_s24  ;;  %v13344_v57 = vpop.permute.xlu1 %2690 }
  0xdf   : > { %4168 = vrot.lane.b32.xlu1 %v4161_v60, %s16094_s24 }
  0xf0   : > { %v420_v1 = vpop.f32.mrb[0].mxu0 }
  0xf1   : > { %v491_v6 = vpop.f32.mrb[0].mxu1  ;;  %v512_v11 = vrot.slane %v420_v1, 4  ;;  %v422_v22 = vpop.f32.mrb[1].mxu0 }
  0xf2   : > { %v514_v16 = vrot.slane %v491_v6, 4  ;;  %v493_v30 = vpop.f32.mrb[1].mxu1  ;;  %v513_v31 = vrot.slane %v422_v22, 4  ;;  %v13348_v6 = vpop.permute.xlu0 %2692 }
  0xf3   : > { %v515_v32 = vrot.slane %v493_v30, 4  ;;  %520 = vst [vmem:[#allocation2 + $0x8] sm:$0xf0] %v512_v11  ;;  %v13360_v22 = vpop.permute.xlu1 %2694  ;;  %v1412_v30 = vsel %vm1411_vm5, %v13223_v15, %v13221_v14  ;;  %v1628_v15 = vsel %vm1226_vm6, %v13239_v25, %v13237_v24 }
  0xf4   : > { %522 = vst [vmem:[#allocation2 + $0x18] sm:$0xf0] %v514_v16  ;;  %521 = vst [vmem:[#allocation2 + $0x10] sm:$0xf0] %v513_v31  ;;  %v1626_v31 = vsel %vm1226_vm6, %v13233_v20, %v13231_v19 }
  0xf5   : > { %523 = vst [vmem:[#allocation2 + $0x20] sm:$0xf0] %v515_v32 }
  0xf6   : > { %v13370_v32 = vpop.permute.xlu0 %2696 }
  0xf7   : > { %v13382_v20 = vpop.permute.xlu1 %2907 }
  0xfa   : > { %v13310_v39 = vld [vmem:[#allocation2 + $0x8] sm:$0xff] }
  0xfb   : > { %v607_v46 = vmul.f32 %v598_v42, %v13310_v39  ;;  %v565_v47 = vmul.f32 %v556_v45, %v13310_v39  ;;  %v13320_v48 = vld [vmem:[#allocation2 + $0x18] sm:$0xff]  ;;  %v989_v60 = vmul.f32 %v980_v55, %v13310_v39  ;;  %v1205_v1 = vmul.f32 %v1196_v56, %v13310_v39 }
  0xfc   : > { %v609_v53 = vmul.f32 %v600_v59, %v13320_v48  ;;  %v567_v54 = vmul.f32 %v558_v0, %v13320_v48  ;;  %v991_v11 = vmul.f32 %v982_v5, %v13320_v48  ;;  %v1207_v16 = vmul.f32 %v1198_v10, %v13320_v48  ;;  %v13386_v0 = vpop.permute.xlu0 %2905 }
  0xfd   : > { %620 = vrot.lane.b32.xlu0 %v607_v46, %s12855_s11  ;;  %790 = vrot.lane.b32.xlu1 %v565_v47, %s12856_s16  ;;  %v1421_v42 = vmul.f32 %v1412_v30, %v13310_v39  ;;  %v1635_v45 = vmul.f32 %v1626_v31, %v13310_v39  ;;  %v1414_v46 = vsel %vm1411_vm5, %v13229_v18, %v13227_v17 }
  0xfe   : > { %v1423_v47 = vmul.f32 %v1414_v46, %v13320_v48  ;;  %v1637_v59 = vmul.f32 %v1628_v15, %v13320_v48 }
 0x101   : > { %624 = vrot.lane.b32.xlu0 %v609_v53, %s12855_s11  ;;  %794 = vrot.lane.b32.xlu1 %v567_v54, %s12856_s16  ;;  %v1840_v53 = vsel %vm1010_vm7, %v13243_v27, %v13241_v26  ;;  %v2054_v54 = vsel %vm628_vm8, %v13259_v37, %v13257_v36  ;;  %v2056_v27 = vsel %vm628_vm8, %v13267_v41, %v13265_v40  ;;  %v13408_v37 = vpop.permute.xlu0 %2909 }
 0x102   : > { %v1849_v55 = vmul.f32 %v1840_v53, %v13310_v39  ;;  %v2063_v56 = vmul.f32 %v2054_v54, %v13310_v39  ;;  %v2065_v10 = vmul.f32 %v2056_v27, %v13320_v48  ;;  %v599_v54 = vsel %vm597_vm1, %v13189_v62, %v13181_v58 }
 0x103   : > { %v2701_v27 = vsel %vm2698_vm11, %v13360_v22, %v13370_v32 }
 0x104   : > { %v2710_v58 = vmul.f32 %v2701_v27, %v13320_v48 }
 0x105   : > { %1002 = vrot.lane.b32.xlu0 %v989_v60, %s12854_s26  ;;  %1218 = vrot.lane.b32.xlu1 %v1205_v1, %s12853_s23  ;;  %v13398_v60 = vpop.permute.xlu1 %2911  ;;  %v1842_v1 = vsel %vm1010_vm7, %v13253_v34, %v13251_v33  ;;  %v13427_v46 = vpop.permute.xlu0 %3123 }
 0x106   : > { %v1851_v5 = vmul.f32 %v1842_v1, %v13320_v48 }
 0x109   : > { %1006 = vrot.lane.b32.xlu0 %v991_v11, %s12854_s26  ;;  %1222 = vrot.lane.b32.xlu1 %v1207_v16, %s12853_s23  ;;  %v2268_v11 = vsel %vm16096_vm9, %v13271_v43, %v13273_v44  ;;  %v2483_v16 = vsel %vm2482_vm10, %v13289_v52, %v13308_v38  ;;  %v13420_v30 = vpop.permute.xlu1 %3121  ;;  %v2270_v43 = vsel %vm16096_vm9, %v13306_v35, %v13283_v49 }
 0x10a   : > { %v2277_v31 = vmul.f32 %v2268_v11, %v13310_v39  ;;  %v2279_v52 = vmul.f32 %v2270_v43, %v13320_v48 }
 0x10d   : > { %1434 = vrot.lane.b32.xlu0 %v1421_v42, %s12852_s20  ;;  %1648 = vrot.lane.b32.xlu1 %v1635_v45, %s12851_s13  ;;  %v2492_v42 = vmul.f32 %v2483_v16, %v13310_v39  ;;  %v2485_v45 = vsel %vm2482_vm10, %v13332_v51, %v13322_v50  ;;  %v13441_v53 = vpop.permute.xlu1 %3125  ;;  %v557_v16 = vsel %vm555_vm2, %v13191_v63, %v13199_v3 }
 0x10e   : > { %v2494_v15 = vmul.f32 %v2485_v45, %v13320_v48 }
 0x111   : > { %1438 = vrot.lane.b32.xlu0 %v1423_v47, %s12852_s20  ;;  %1652 = vrot.lane.b32.xlu1 %v1637_v59, %s12851_s13  ;;  %v2699_v47 = vsel %vm2698_vm11, %v13344_v57, %v13348_v6  ;;  %v13439_v59 = vld [vmem:[#allocation2 + $0x10] sm:$0xff] }
 0x112   : > { %v608_v1 = vmul.f32 %v599_v54, %v13439_v59  ;;  %v566_v45 = vmul.f32 %v557_v16, %v13439_v59 }
 0x115   : > { %1862 = vrot.lane.b32.xlu0 %v1849_v55, %s12850_s14  ;;  %2076 = vrot.lane.b32.xlu1 %v2063_v56, %s12848_s19  ;;  %v13448_v55 = vpop.permute.xlu0 %3127  ;;  %v2708_v56 = vmul.f32 %v2699_v47, %v13310_v39 }
 0x119   : > { %1866 = vrot.lane.b32.xlu0 %v1851_v5, %s12850_s14  ;;  %2080 = vrot.lane.b32.xlu1 %v2065_v10, %s12848_s19  ;;  %v13455_v5 = vld [vmem:[#allocation2 + $0x20] sm:$0xff]  ;;  %v13459_v10 = vpop.permute.xlu1 %3520  ;;  %v13464_v11 = vpop.permute.xlu0 %3522 }
 0x11a   : > { %v610_v62 = vmul.f32 %v13187_v61, %v13455_v5  ;;  %v568_v63 = vmul.f32 %v13197_v2, %v13455_v5  ;;  %v2280_v16 = vmul.f32 %v13283_v49, %v13455_v5 }
 0x11d   : > { %2290 = vrot.lane.b32.xlu0 %v2277_v31, %s12849_s10  ;;  %2505 = vrot.lane.b32.xlu1 %v2492_v42, %s16094_s24  ;;  %v981_v31 = vsel %vm979_vm3, %v13201_v4, %v13209_v8  ;;  %v13476_v43 = vpop.permute.xlu1 %3524  ;;  %v13480_v61 = vpop.permute.xlu0 %3526  ;;  %v1197_v4 = vsel %vm1195_vm4, %v13211_v9, %v13219_v13  ;;  %v1413_v8 = vsel %vm1411_vm5, %v13221_v14, %v13229_v18 }
 0x11e   : > { %v990_v42 = vmul.f32 %v981_v31, %v13439_v59  ;;  %v1206_v2 = vmul.f32 %v1197_v4, %v13439_v59  ;;  %v1424_v9 = vmul.f32 %v13227_v17, %v13455_v5  ;;  %v1208_v13 = vmul.f32 %v13217_v12, %v13455_v5 }
 0x11f   : > { %v1627_v14 = vsel %vm1226_vm6, %v13231_v19, %v13239_v25  ;;  %v1841_v18 = vsel %vm1010_vm7, %v13241_v26, %v13253_v34  ;;  %v1852_v12 = vmul.f32 %v13251_v33, %v13455_v5  ;;  %v1638_v19 = vmul.f32 %v13237_v24, %v13455_v5 }
 0x120   : > { %v1636_v17 = vmul.f32 %v1627_v14, %v13439_v59  ;;  %v2055_v26 = vsel %vm628_vm8, %v13257_v36, %v13267_v41  ;;  %v2269_v34 = vsel %vm16096_vm9, %v13273_v44, %v13306_v35  ;;  %v2066_v36 = vmul.f32 %v13265_v40, %v13455_v5 }
 0x121   : > { %2294 = vrot.lane.b32.xlu0 %v2279_v52, %s12849_s10  ;;  %2509 = vrot.lane.b32.xlu1 %v2494_v15, %s16094_s24  ;;  %v992_v52 = vmul.f32 %v13207_v7, %v13455_v5  ;;  %v13486_v3 = vpop.permute.xlu1 %788  ;;  %v13496_v15 = vpop.permute.xlu0 %618  ;;  %v1422_v7 = vmul.f32 %v1413_v8, %v13439_v59  ;;  %v2278_v33 = vmul.f32 %v2269_v34, %v13439_v59 }
 0x122   : > { %v2064_v24 = vmul.f32 %v2055_v26, %v13439_v59  ;;  %v2484_v41 = vsel %vm2482_vm10, %v13308_v38, %v13332_v51  ;;  %v2700_v44 = vsel %vm2698_vm11, %v13348_v6, %v13360_v22  ;;  %v12308_v38 = vld [vmem:[%s16087_s3 + $0x42] ss:$8 sm:$0xf]  ;;  %v2711_v51 = vmul.f32 %v13370_v32, %v13455_v5 }
 0x123   : > { %v2709_v31 = vmul.f32 %v2700_v44, %v13439_v59  ;;  %v2493_v49 = vmul.f32 %v2484_v41, %v13439_v59  ;;  %v2495_v6 = vmul.f32 %v13322_v50, %v13455_v5  ;;  %v4363_v22 = vrot.slane %v12308_v38, %v12976_v23 }
 0x124   : > { %v4371_v32 = vrot.slane %v12308_v38, %v12971_v21  ;;  %v4367_v50 = vrot.slane %v12308_v38, %v12992_v29  ;;  %v2914_v4 = vsel %vm2913_vm12, %v13386_v0, %v13382_v20  ;;  %v3131_v41 = vsel %vm16100_vm13, %v13427_v46, %v13441_v53 }
 0x125   : > { %2721 = vrot.lane.b32.xlu0 %v2708_v56, %s16101_s9  ;;  %622 = vrot.lane.b32.xlu1 %v608_v1, %s12855_s11  ;;  %v13500_v47 = vpop.permute.xlu1 %1216  ;;  %v13504_v54 = vpop.permute.xlu0 %1000  ;;  %v1850_v1 = vmul.f32 %v1841_v18, %v13439_v59 }
 0x129   : > { %2725 = vrot.lane.b32.xlu0 %v2710_v58, %s16101_s9  ;;  %626 = vrot.lane.b32.xlu1 %v610_v62, %s12855_s11  ;;  %v13518_v56 = vpop.permute.xlu1 %1646  ;;  %v13522_v27 = vpop.permute.xlu0 %1432 }
 0x12d   : > { %1004 = vrot.lane.b32.xlu1 %v990_v42, %s12854_s26  ;;  %792 = vrot.lane.b32.xlu0 %v566_v45, %s12856_s16  ;;  %v13540_v58 = vpop.permute.xlu0 %1860  ;;  %v2707_v45 = vmul.f32 0.0, %v13344_v57 }
 0x131   : > { %1008 = vrot.lane.b32.xlu1 %v992_v52, %s12854_s26  ;;  %796 = vrot.lane.b32.xlu0 %v568_v63, %s12856_s16  ;;  %v13558_v35 = vpop.permute.xlu0 %3734 }
 0x135   : > { %1436 = vrot.lane.b32.xlu1 %v1422_v7, %s12852_s20  ;;  %1220 = vrot.lane.b32.xlu0 %v1206_v2, %s12853_s23  ;;  %v13530_v25 = vpop.permute.xlu1 %2074  ;;  %v13564_v42 = vpop.permute.xlu0 %3738  ;;  %v4375_v7 = vrot.slane %v12308_v38, %v12990_v28  ;;  %v2923_v2 = vmul.f32 %v2914_v4, %v13310_v39 }
 0x139   : > { %1440 = vrot.lane.b32.xlu1 %v1424_v9, %s12852_s20  ;;  %1224 = vrot.lane.b32.xlu0 %v1208_v13, %s12853_s23  ;;  %v13546_v62 = vpop.permute.xlu1 %3736  ;;  %v2915_v9 = vsel %vm2913_vm12, %v13382_v20, %v13408_v37  ;;  %v2916_v13 = vsel %vm2913_vm12, %v13408_v37, %v13398_v60  ;;  %v12312_v20 = vld [vmem:[%s16087_s3 + $0x43] ss:$8 sm:$0xf]  ;;  %v2922_v37 = vmul.f32 0.0, %v13386_v0 }
 0x13a   : > { %v4581_v34 = vrot.slane %v12312_v20, %v12992_v29  ;;  %v4589_v0 = vrot.slane %v12312_v20, %v12990_v28 }
 0x13c   : > { %v13581_v52 = vpop.permute.xlu0 %2288 }
 0x13d   : > { %1864 = vrot.lane.b32.xlu1 %v1850_v1, %s12850_s14  ;;  %1650 = vrot.lane.b32.xlu0 %v1636_v17, %s12851_s13  ;;  %v13566_v40 = vpop.permute.xlu1 %3740  ;;  %v2925_v1 = vmul.f32 %v2916_v13, %v13320_v48  ;;  %v2924_v17 = vmul.f32 %v2915_v9, %v13439_v59  ;;  %v12320_v13 = vld [vmem:[%s16087_s3 + $0x45] ss:$8 sm:$0xf] }
 0x140   : > { %v13592_v8 = vpop.permute.xlu0 %3950 }
 0x141   : > { %1868 = vrot.lane.b32.xlu1 %v1852_v12, %s12850_s14  ;;  %1654 = vrot.lane.b32.xlu0 %v1638_v19, %s12851_s13  ;;  %v13583_v63 = vpop.permute.xlu1 %3948  ;;  %v2926_v12 = vmul.f32 %v13398_v60, %v13455_v5  ;;  %v4585_v60 = vrot.slane %v12312_v20, %v12971_v21 }
 0x144   : > { %v13608_v14 = vpop.permute.xlu0 %3954 }
 0x145   : > { %2292 = vrot.lane.b32.xlu1 %v2278_v33, %s12849_s10  ;;  %2078 = vrot.lane.b32.xlu0 %v2064_v24, %s12848_s19  ;;  %v13594_v57 = vpop.permute.xlu1 %3952  ;;  %v4577_v33 = vrot.slane %v12312_v20, %v12976_v23 }
 0x148   : > { %v13622_v19 = vpop.permute.xlu0 %4162 }
 0x149   : > { %2296 = vrot.lane.b32.xlu1 %v2280_v16, %s12849_s10  ;;  %2082 = vrot.lane.b32.xlu0 %v2066_v36, %s12848_s19  ;;  %v13610_v18 = vpop.permute.xlu1 %2503  ;;  %v3130_v36 = vsel %vm16100_vm13, %v13420_v30, %v13427_v46  ;;  %v12316_v46 = vld [vmem:[%s16087_s3 + $0x44] ss:$8 sm:$0xf] }
 0x14a   : > { %v3139_v44 = vmul.f32 %v3130_v36, %v13310_v39  ;;  %v4795_v9 = vrot.slane %v12316_v46, %v12992_v29  ;;  %v4803_v20 = vrot.slane %v12316_v46, %v12990_v28  ;;  %v3528_v36 = vsel %vm16099_vm14, %v13459_v10, %v13464_v11 }
 0x14c   : > { %v13634_v24 = vpop.permute.xlu0 %4166 }
 0x14d   : > { %2723 = vrot.lane.b32.xlu1 %v2709_v31, %s16101_s9  ;;  %2507 = vrot.lane.b32.xlu0 %v2493_v49, %s16094_s24  ;;  %v13624_v26 = vpop.permute.xlu1 %4164  ;;  %v3140_v31 = vmul.f32 %v3131_v41, %v13439_v59  ;;  %v5017_v41 = vrot.slane %v12320_v13, %v12990_v28 }
 0x151   : > { %2727 = vrot.lane.b32.xlu1 %v2711_v51, %s16101_s9  ;;  %2511 = vrot.lane.b32.xlu0 %v2495_v6, %s16094_s24  ;;  %v13636_v16 = vpop.permute.xlu1 %4168  ;;  %v3132_v51 = vsel %vm16100_vm13, %v13441_v53, %v13448_v55  ;;  %v4791_v53 = vrot.slane %v12316_v46, %v12976_v23 }
 0x152   : > { %v3141_v6 = vmul.f32 %v3132_v51, %v13320_v48 }
 0x155   : > { %4376 = vrot.lane.b32.xlu1 %v4363_v22, %s12849_s10  ;;  %2719 = vrot.lane.b32.xlu0 %v2707_v45, %s16101_s9  ;;  %v3142_v22 = vmul.f32 %v13448_v55, %v13455_v5  ;;  %v4799_v55 = vrot.slane %v12316_v46, %v12971_v21  ;;  %v3529_v46 = vsel %vm16099_vm14, %v13464_v11, %v13476_v43  ;;  %v12324_v11 = vld [vmem:[%s16087_s3 + $0x46] ss:$8 sm:$0xf]  ;;  %s16139_s9 = smov 8  }
 0x159   : > { %4380 = vrot.lane.b32.xlu1 %v4371_v32, %s12849_s10  ;;  %4378 = vrot.lane.b32.xlu0 %v4367_v50, %s12849_s10  ;;  %v13670_v50 = vld [vmem:[#allocation2] sm:$0xff] }
 0x15a   : > { %v3138_v4 = vmul.f32 %v13670_v50, %v13420_v30  ;;  %v5005_v30 = vrot.slane %v12320_v13, %v12976_v23 }
 0x15d   : > { %2936 = vrot.lane.b32.xlu1 %v2923_v2, %s16103_s17  ;;  %4382 = vrot.lane.b32.xlu0 %v4375_v7, %s12849_s10 }
 0x161   : > { %2940 = vrot.lane.b32.xlu1 %v2925_v1, %s16103_s17  ;;  %2938 = vrot.lane.b32.xlu0 %v2924_v17, %s16103_s17 }
 0x165   : > { %2934 = vrot.lane.b32.xlu1 %v2922_v37, %s16103_s17  ;;  %2942 = vrot.lane.b32.xlu0 %v2926_v12, %s16103_s17 }
 0x169   : > { %4592 = vrot.lane.b32.xlu1 %v4581_v34, %s12848_s19  ;;  %4590 = vrot.lane.b32.xlu0 %v4577_v33, %s12848_s19  ;;  %v5013_v34 = vrot.slane %v12320_v13, %v12971_v21  ;;  %v5009_v33 = vrot.slane %v12320_v13, %v12992_v29 }
 0x16d   : > { %4596 = vrot.lane.b32.xlu1 %v4589_v0, %s12848_s19  ;;  %4594 = vrot.lane.b32.xlu0 %v4585_v60, %s12848_s19 }
 0x16f   : > { %v13648_v49 = vpop.permute.xlu0 %620  ;;  %v13650_v38 = vpop.permute.xlu1 %790 }
 0x171   : > { %3154 = vrot.lane.b32.xlu1 %v3140_v31, %s12861_s29  ;;  %3152 = vrot.lane.b32.xlu0 %v3139_v44, %s12861_s29  ;;  %v3537_v44 = vmul.f32 %v3528_v36, %v13439_v59 }
 0x173   : > { %v13663_v45 = vpop.permute.xlu0 %624  ;;  %v13665_v32 = vpop.permute.xlu1 %794 }
 0x175   : > { %3158 = vrot.lane.b32.xlu1 %v3142_v22, %s12861_s29  ;;  %3156 = vrot.lane.b32.xlu0 %v3141_v6, %s12861_s29  ;;  %v3530_v6 = vsel %vm16099_vm14, %v13476_v43, %v13480_v61  ;;  %v3538_v22 = vmul.f32 %v3529_v46, %v13320_v48  ;;  %v3536_v43 = vmul.f32 %v13459_v10, %v13310_v39 }
 0x176   : > { %v5231_v10 = vrot.slane %v12324_v11, %v12990_v28  ;;  %v3743_v46 = vsel %vm16098_vm15, %v13546_v62, %v13564_v42 }
 0x177   : > { %v13674_v7 = vpop.permute.xlu0 %1002  ;;  %v13676_v2 = vpop.permute.xlu1 %1218 }
 0x179   : > { %4804 = vrot.lane.b32.xlu1 %v4791_v53, %s12850_s14  ;;  %3150 = vrot.lane.b32.xlu0 %v3138_v4, %s12861_s29  ;;  %v3539_v53 = vmul.f32 %v3530_v6, %v13455_v5 }
 0x17b   : > { %v13685_v1 = vpop.permute.xlu0 %1006  ;;  %v13687_v17 = vpop.permute.xlu1 %1222 }
 0x17d   : > { %4808 = vrot.lane.b32.xlu1 %v4799_v55, %s12850_s14  ;;  %4806 = vrot.lane.b32.xlu0 %v4795_v9, %s12850_s14  ;;  %v3540_v9 = vmul.f32 %v13670_v50, %v13480_v61  ;;  %v5227_v61 = vrot.slane %v12324_v11, %v12971_v21 }
 0x17f   : > { %v13693_v37 = vpop.permute.xlu0 %1434  ;;  %v13695_v12 = vpop.permute.xlu1 %1648 }
 0x181   : > { %5018 = vrot.lane.b32.xlu1 %v5005_v30, %s12851_s13  ;;  %4810 = vrot.lane.b32.xlu0 %v4803_v20, %s12850_s14  ;;  %v5223_v20 = vrot.slane %v12324_v11, %v12992_v29 }
 0x183   : > { %v13701_v0 = vpop.permute.xlu0 %1438  ;;  %v13703_v60 = vpop.permute.xlu1 %1652 }
 0x185   : > { %5022 = vrot.lane.b32.xlu1 %v5013_v34, %s12851_s13  ;;  %5020 = vrot.lane.b32.xlu0 %v5009_v33, %s12851_s13  ;;  %v5219_v34 = vrot.slane %v12324_v11, %v12976_v23  ;;  %v629_v11 = vsel %vm628_vm8, %v13496_v15, %v13648_v49  ;;  %v3744_v15 = vsel %vm16098_vm15, %v13564_v42, %v13566_v40 }
 0x187   : > { %v13712_v31 = vpop.permute.xlu0 %1862  ;;  %v13714_v51 = vpop.permute.xlu1 %2076 }
 0x189   : > { %3550 = vrot.lane.b32.xlu1 %v3537_v44, %s12860_s18  ;;  %5024 = vrot.lane.b32.xlu0 %v5017_v41, %s12851_s13 }
 0x18b   : > { %v13726_v4 = vpop.permute.xlu0 %1866  ;;  %v13728_v55 = vpop.permute.xlu1 %2080 }
 0x18d   : > { %3554 = vrot.lane.b32.xlu1 %v3539_v53, %s12860_s18  ;;  %3552 = vrot.lane.b32.xlu0 %v3538_v22, %s12860_s18  ;;  %v12239_v22 = vld [vmem:[%s16088_s4 + $0x4] sm:$0xf]  ;;  %v3742_v53 = vsel %vm16098_vm15, %v13558_v35, %v13546_v62 }
 0x18e   : > { %v3751_v62 = vmul.f32 %v3742_v53, %v13439_v59 }
 0x18f   : > { %v13739_v13 = vpop.permute.xlu0 %2290  ;;  %v13741_v30 = vpop.permute.xlu1 %2505 }
 0x191   : > { %3548 = vrot.lane.b32.xlu1 %v3536_v43, %s12860_s18  ;;  %3556 = vrot.lane.b32.xlu0 %v3540_v9, %s12860_s18  ;;  %v3752_v43 = vmul.f32 %v3743_v46, %v13320_v48 }
 0x193   : > { %v13747_v33 = vpop.permute.xlu0 %2294  ;;  %v13749_v36 = vpop.permute.xlu1 %2509 }
 0x195   : > { %5234 = vrot.lane.b32.xlu1 %v5223_v20, %s12852_s20  ;;  %5232 = vrot.lane.b32.xlu0 %v5219_v34, %s12852_s20 }
 0x197   : > { %v13755_v41 = vpop.permute.xlu0 %2721  ;;  %v623_v44 = vpop.permute.xlu1 %622 }
 0x198   : > { %v630_v6 = vsel %vm628_vm8, %v13648_v49, %v623_v44  ;;  %v631_v49 = vsel %vm628_vm8, %v623_v44, %v13663_v45 }
 0x199   : > { %5238 = vrot.lane.b32.xlu1 %v5231_v10, %s12852_s20  ;;  %641 = vmatprep.subr.mxu0 %v630_v6  ;;  %v12328_v10 = vld [vmem:[%s16087_s3 + $0x47] ss:$8 sm:$0xf]  ;;  %v3753_v6 = vmul.f32 %v3744_v15, %v13455_v5 }
 0x19a   : > { %5236 = vrot.lane.b32.xlu0 %v5227_v61, %s12852_s20  ;;  %642 = vmatpush1.msra.mxu0 %v629_v11  ;;  %v3754_v61 = vmul.f32 %v13670_v50, %v13566_v40  ;;  %v799_v40 = vsel %vm16096_vm9, %v13486_v3, %v13650_v38  ;;  %v5433_v44 = vrot.slane %v12328_v10, %v12976_v23 }
 0x19b   : > { %v13774_v9 = vpop.permute.xlu0 %2725  ;;  %12240 = vmatmul.mubr.msk.f32.vlgmr.msra.gmra.mrb[2].mxu0 %vm637_vm0, %v12239_v22  ;;  %v627_v20 = vpop.permute.xlu1 %626  ;;  %v3750_v3 = vmul.f32 %v13558_v35, %v13310_v39  ;;  %v5437_v35 = vrot.slane %v12328_v10, %v12992_v29 }
 0x19c   : > { %v632_v34 = vsel %vm628_vm8, %v13663_v45, %v627_v20  ;;  %874 = vmatprep.mubr.f32.mxu0 %v13670_v50  ;;  %v569_v45 = vld [vmem:[%s16088_s4] sm:$0xf]  ;;  %v1011_v20 = vsel %vm1010_vm7, %v13504_v54, %v13674_v7 }
 0x19d   : > { %3766 = vrot.lane.b32.xlu1 %v3752_v43, %s12859_s12  ;;  %712 = vmatprep.subr.mxu1 %v632_v34  ;;  %v5441_v34 = vrot.slane %v12328_v10, %v12971_v21 }
 0x19e   : > { %3764 = vrot.lane.b32.xlu0 %v3751_v62, %s12859_s12  ;;  %713 = vmatpush1.msra.mxu1 %v631_v49 }
 0x19f   : > { %12241 = vmatmul.mubr.msk.f32.vlgmr.msra.gmra.mrb[2].mxu1 %vm637_vm0, %v12239_v22  ;;  %v1005_v46 = vpop.permute.xlu1 %1004  ;;  %v793_v42 = vpop.permute.xlu0 %792 }
 0x1a0   : > { %v800_v53 = vsel %vm16096_vm9, %v13650_v38, %v793_v42  ;;  %945 = vmatprep.mubr.f32.mxu1 %v13670_v50  ;;  %v1012_v22 = vsel %vm1010_vm7, %v13674_v7, %v1005_v46  ;;  %v801_v62 = vsel %vm16096_vm9, %v793_v42, %v13665_v32  ;;  %v1013_v49 = vsel %vm1010_vm7, %v1005_v46, %v13685_v1  ;;  %v12245_v42 = vld [vmem:[%s16088_s4 + $0x8] sm:$0xf] }
 0x1a1   : > { %3770 = vrot.lane.b32.xlu1 %v3754_v61, %s12859_s12  ;;  %810 = vmatprep.subr.mxu0 %v800_v53  ;;  %v1227_v53 = vsel %vm1226_vm6, %v13500_v47, %v13676_v2 }
 0x1a2   : > { %3768 = vrot.lane.b32.xlu0 %v3753_v6, %s12859_s12  ;;  %811 = vmatpush1.msra.mxu0 %v799_v40  ;;  %v3958_v40 = vsel %vm637_vm0, %v13594_v57, %v13608_v14 }
 0x1a3   : > { %v1009_v11 = vpop.permute.xlu1 %1008  ;;  %12242 = vmatmul.mubr.msk.f32.vlgmr.msra.gmra.mrb[2].mxu0 %vm637_vm0, %v569_v45  ;;  %1022 = vmatprep.subr.mxu0 %v1012_v22  ;;  %v797_v43 = vpop.permute.xlu0 %796  ;;  %v3957_v22 = vsel %vm637_vm0, %v13592_v8, %v13594_v57  ;;  %v3967_v47 = vmul.f32 %v3958_v40, %v13455_v5  ;;  %v12249_v57 = vld [vmem:[%s16088_s4 + $0xc] sm:$0xf] }
 0x1a4   : > { %1023 = vmatpush1.msra.mxu0 %v1011_v20  ;;  %v802_v38 = vsel %vm16096_vm9, %v13665_v32, %v797_v43  ;;  %1086 = vmatprep.mubr.f32.mxu0 %v13670_v50  ;;  %v1014_v54 = vsel %vm1010_vm7, %v13685_v1, %v1009_v11  ;;  %v3956_v32 = vsel %vm637_vm0, %v13583_v63, %v13592_v8  ;;  %vm16097_vm9 = vcmask 72704  }
 0x1a5   : > { %5446 = vrot.lane.b32.xlu1 %v5433_v44, %s12853_s23  ;;  %881 = vmatprep.subr.mxu1 %v802_v38  ;;  %v5445_v1 = vrot.slane %v12328_v10, %v12990_v28  ;;  %v3965_v46 = vmul.f32 %v3956_v32, %v13439_v59  ;;  %v3966_v20 = vmul.f32 %v3957_v22, %v13320_v48  ;;  %v12253_v32 = vld [vmem:[%s16088_s4 + $0x10] sm:$0xf] }
 0x1a6   : > { %3762 = vrot.lane.b32.xlu0 %v3750_v3, %s12859_s12  ;;  %882 = vmatpush1.msra.mxu1 %v801_v62  ;;  %v3964_v3 = vmul.f32 %v13583_v63, %v13310_v39  ;;  %v1442_v62 = vsel %vm1411_vm5, %v13522_v27, %v13693_v37  ;;  %v4172_v22 = vsel %vm16097_vm9, %v13634_v24, %v13636_v16 }
 0x1a7   : > { %v1437_v7 = vpop.permute.xlu1 %1436  ;;  %12243 = vmatmul.mubr.msk.f32.vlgmr.msra.gmra.mrb[2].mxu1 %vm637_vm0, %v569_v45  ;;  %1093 = vmatprep.subr.mxu1 %v1014_v54  ;;  %v1221_v15 = vpop.permute.xlu0 %1220  ;;  %v3968_v54 = vmul.f32 %v13670_v50, %v13608_v14 }
 0x1a8   : > { %1094 = vmatpush1.msra.mxu1 %v1013_v49  ;;  %v1228_v61 = vsel %vm1226_vm6, %v13676_v2, %v1221_v15  ;;  %1157 = vmatprep.mubr.f32.mxu1 %v13670_v50  ;;  %v1443_v44 = vsel %vm1411_vm5, %v13693_v37, %v1437_v7  ;;  %v1229_v11 = vsel %vm1226_vm6, %v1221_v15, %v13687_v17 }
 0x1a9   : > { %5450 = vrot.lane.b32.xlu1 %v5441_v34, %s12853_s23  ;;  %1238 = vmatprep.subr.mxu0 %v1228_v61  ;;  %v1444_v14 = vsel %vm1411_vm5, %v1437_v7, %v13701_v0 }
 0x1aa   : > { %5448 = vrot.lane.b32.xlu0 %v5437_v35, %s12853_s23 }
 0x1ab   : > { %v1441_v6 = vpop.permute.xlu1 %1440  ;;  %12246 = vmatmul.mubr.msk.f32.vlgmr.msra.gmra.mrb[2].mxu0 %vm637_vm0, %v12245_v42  ;;  %v1225_v45 = vpop.permute.xlu0 %1224 }
 0x1ac   : > { %1239 = vmatpush1.msra.mxu0 %v1227_v53  ;;  %v1230_v10 = vsel %vm1226_vm6, %v13687_v17, %v1225_v45  ;;  %1302 = vmatprep.mubr.f32.mxu0 %v13670_v50  ;;  %v1445_v8 = vsel %vm1411_vm5, %v13701_v0, %v1441_v6  ;;  %v12332_v17 = vld [vmem:[%s16087_s3 + $0x60] ss:$8 sm:$0xf]  ;;  %v4170_v53 = vsel %vm16097_vm9, %v13622_v19, %v13624_v26 }
 0x1ad   : > { %1453 = vmatprep.subr.mxu0 %v1443_v44  ;;  %3978 = vrot.lane.b32.xlu1 %v3965_v46, %s12858_s25  ;;  %v5651_v63 = vrot.slane %v12332_v17, %v12992_v29  ;;  %v5647_v15 = vrot.slane %v12332_v17, %v12976_v23  ;;  %v5659_v61 = vrot.slane %v12332_v17, %v12990_v28 }
 0x1ae   : > { %5452 = vrot.lane.b32.xlu0 %v5445_v1, %s12853_s23  ;;  %1309 = vmatprep.subr.mxu1 %v1230_v10  ;;  %v5655_v0 = vrot.slane %v12332_v17, %v12971_v21  ;;  %v4171_v46 = vsel %vm16097_vm9, %v13624_v26, %v13634_v24  ;;  %v4179_v44 = vmul.f32 %v4170_v53, %v13439_v59  ;;  %v12257_v10 = vld [vmem:[%s16088_s4 + $0x14] sm:$0xf] }
 0x1af   : > { %v13860_v2 = vpop.permute.xlu1 %1864  ;;  %12247 = vmatmul.mubr.msk.f32.vlgmr.msra.gmra.mrb[2].mxu1 %vm637_vm0, %v12245_v42  ;;  %v1651_v43 = vpop.permute.xlu0 %1650  ;;  %v1656_v42 = vsel %vm1195_vm4, %v13518_v56, %v13695_v12  ;;  %v4180_v56 = vmul.f32 %v4171_v46, %v13320_v48  ;;  %v1870_v24 = vsel %vm979_vm3, %v13540_v58, %v13712_v31  ;;  %v4178_v17 = vmul.f32 %v13622_v19, %v13310_v39 }
 0x1b0   : > { %1310 = vmatpush1.msra.mxu1 %v1229_v11  ;;  %1373 = vmatprep.mubr.f32.mxu1 %v13670_v50  ;;  %v1657_v35 = vsel %vm1195_vm4, %v13695_v12, %v1651_v43  ;;  %v1871_v6 = vsel %vm979_vm3, %v13712_v31, %v13860_v2  ;;  %v1658_v45 = vsel %vm1195_vm4, %v1651_v43, %v13703_v60 }
 0x1b1   : > { %1524 = vmatprep.subr.mxu1 %v1445_v8  ;;  %3982 = vrot.lane.b32.xlu1 %v3967_v47, %s12858_s25  ;;  %v4182_v47 = vmul.f32 %v13670_v50, %v13636_v16  ;;  %v1872_v58 = vsel %vm979_vm3, %v13860_v2, %v13726_v4 }
 0x1b2   : > { %3980 = vrot.lane.b32.xlu0 %v3966_v20, %s12858_s25  ;;  %v4181_v20 = vmul.f32 %v4172_v22, %v13455_v5 }
 0x1b3   : > { %v1869_v38 = vpop.permute.xlu1 %1868  ;;  %12250 = vmatmul.mubr.msk.f32.vlgmr.msra.gmra.mrb[2].mxu0 %vm637_vm0, %v12249_v57  ;;  %v1655_v34 = vpop.permute.xlu0 %1654 }
 0x1b4   : > { %1454 = vmatpush1.msra.mxu0 %v1442_v62  ;;  %1517 = vmatprep.mubr.f32.mxu0 %v13670_v50  ;;  %v1659_v49 = vsel %vm1195_vm4, %v13703_v60, %v1655_v34  ;;  %v1873_v26 = vsel %vm979_vm3, %v13726_v4, %v1869_v38  ;;  %v12336_v60 = vld [vmem:[%s16087_s3 + $0x61] ss:$8 sm:$0xf]  ;;  %v2084_v62 = vsel %vm597_vm1, %v13530_v25, %v13714_v51 }
 0x1b5   : > { %1667 = vmatprep.subr.mxu0 %v1657_v35  ;;  %3976 = vrot.lane.b32.xlu1 %v3964_v3, %s12858_s25  ;;  %v5861_v16 = vrot.slane %v12336_v60, %v12976_v23  ;;  %v12261_v38 = vld [vmem:[%s16088_s4 + $0x18] sm:$0xf]  ;;  %v5869_v4 = vrot.slane %v12336_v60, %v12971_v21  ;;  %v5865_v2 = vrot.slane %v12336_v60, %v12992_v29 }
 0x1b6   : > { %3984 = vrot.lane.b32.xlu0 %v3968_v54, %s12858_s25 }
 0x1b7   : > { %v13892_v27 = vpop.permute.xlu1 %2292  ;;  %12251 = vmatmul.mubr.msk.f32.vlgmr.msra.gmra.mrb[2].mxu1 %vm637_vm0, %v12249_v57  ;;  %v13897_v37 = vpop.permute.xlu0 %2078 }
 0x1b8   : > { %1525 = vmatpush1.msra.mxu1 %v1444_v14  ;;  %1588 = vmatprep.mubr.f32.mxu1 %v13670_v50  ;;  %v2085_v8 = vsel %vm597_vm1, %v13714_v51, %v13897_v37  ;;  %v2299_v35 = vsel %vm555_vm2, %v13739_v13, %v13892_v27  ;;  %v2086_v51 = vsel %vm597_vm1, %v13897_v37, %v13728_v55 }
 0x1b9   : > { %1738 = vmatprep.subr.mxu1 %v1659_v49  ;;  %5662 = vrot.lane.b32.xlu1 %v5651_v63, %s12854_s26  ;;  %v5873_v63 = vrot.slane %v12336_v60, %v12990_v28 }
 0x1ba   : > { %5660 = vrot.lane.b32.xlu0 %v5647_v15, %s12854_s26 }
 0x1bb   : > { %v13909_v7 = vpop.permute.xlu1 %2296  ;;  %12254 = vmatmul.mubr.msk.f32.vlgmr.msra.gmra.mrb[2].mxu0 %vm637_vm0, %v12253_v32  ;;  %v2083_v1 = vpop.permute.xlu0 %2082 }
 0x1bc   : > { %1668 = vmatpush1.msra.mxu0 %v1656_v42  ;;  %1731 = vmatprep.mubr.f32.mxu0 %v13670_v50  ;;  %v2087_v3 = vsel %vm597_vm1, %v13728_v55, %v2083_v1 }
 0x1bd   : > { %1881 = vmatprep.subr.mxu0 %v1871_v6  ;;  %5666 = vrot.lane.b32.xlu1 %v5659_v61, %s12854_s26  ;;  %v12265_v61 = vld [vmem:[%s16088_s4 + $0x1c] sm:$0xf] }
 0x1be   : > { %5664 = vrot.lane.b32.xlu0 %v5655_v0, %s12854_s26 }
 0x1bf   : > { %v13928_v12 = vpop.permute.xlu1 %2723  ;;  %12255 = vmatmul.mubr.msk.f32.vlgmr.msra.gmra.mrb[2].mxu1 %vm637_vm0, %v12253_v32  ;;  %v13933_v40 = vpop.permute.xlu0 %2507  ;;  %v2301_v32 = vsel %vm555_vm2, %v13747_v33, %v13909_v7  ;;  %v2298_v7 = vsel %vm555_vm2, %v13581_v52, %v13739_v13  ;;  %v12340_v52 = vld [vmem:[%s16087_s3 + $0x62] ss:$8 sm:$0xf] }
 0x1c0   : > { %1739 = vmatpush1.msra.mxu1 %v1658_v45  ;;  %1802 = vmatprep.mubr.f32.mxu1 %v13670_v50  ;;  %v2515_v46 = vsel %vm16097_vm9, %v13741_v30, %v13933_v40  ;;  %v2730_v22 = vsel %vm637_vm0, %v13755_v41, %v13928_v12  ;;  %v6087_v60 = vrot.slane %v12340_v52, %v12990_v28 }
 0x1c1   : > { %1952 = vmatprep.subr.mxu1 %v1873_v26  ;;  %4194 = vrot.lane.b32.xlu1 %v4180_v56, %s12857_s21  ;;  %v2514_v26 = vsel %vm16097_vm9, %v13610_v18, %v13741_v30  ;;  %v2516_v18 = vsel %vm16097_vm9, %v13933_v40, %v13749_v36  ;;  %v14084_v40 = vld [vmem:[#allocation2 + $0x18] sm:$0xff] }
 0x1c2   : > { %4192 = vrot.lane.b32.xlu0 %v4179_v44, %s12857_s21  ;;  %v6079_v44 = vrot.slane %v12340_v52, %v12992_v29 }
 0x1c3   : > { %v13952_v11 = vpop.permute.xlu1 %2727  ;;  %12258 = vmatmul.mubr.msk.f32.vlgmr.msra.gmra.mrb[2].mxu0 %vm637_vm0, %v12257_v10  ;;  %v13958_v43 = vpop.permute.xlu0 %2511 }
 0x1c4   : > { %1882 = vmatpush1.msra.mxu0 %v1870_v24  ;;  %1945 = vmatprep.mubr.f32.mxu0 %v13670_v50  ;;  %v2517_v45 = vsel %vm16097_vm9, %v13749_v36, %v13958_v43  ;;  %v12865_v43 = vmov 0   ;;  %vm16132_vm9 = vcmask 596992  }
 0x1c5   : > { %2095 = vmatprep.subr.mxu0 %v2085_v8  ;;  %4198 = vrot.lane.b32.xlu1 %v4182_v47, %s12857_s21  ;;  %v6083_v47 = vrot.slane %v12340_v52, %v12971_v21  ;;  %v2732_v8 = vsel %vm637_vm0, %v13774_v9, %v13952_v11 }
 0x1c6   : > { %4196 = vrot.lane.b32.xlu0 %v4181_v20, %s12857_s21 }
 0x1c7   : > { %v4377_v57 = vpop.permute.xlu1 %4376  ;;  %12259 = vmatmul.mubr.msk.f32.vlgmr.msra.gmra.mrb[2].mxu1 %vm637_vm0, %v12257_v10  ;;  %v13972_v31 = vpop.permute.xlu0 %2719  ;;  %12821 = vset.pattern.permute.xlu0 %v12865_v43 }
 0x1c8   : > { %1953 = vmatpush1.msra.mxu1 %v1872_v58  ;;  %2016 = vmatprep.mubr.f32.mxu1 %v13670_v50  ;;  %v4392_v13 = vmul.f32 %v4377_v57, %v13310_v39  ;;  %v12269_v39 = vld [vmem:[%s16088_s4 + $0x20] sm:$0xf]  ;;  %v2729_v36 = vsel %vm637_vm0, %v13972_v31, %v13755_v41 }
 0x1c9   : > { %2166 = vmatprep.subr.mxu1 %v2087_v3  ;;  %5874 = vrot.lane.b32.xlu1 %v5861_v16, %s12855_s11  ;;  %v12273_v16 = vld [vmem:[%s16088_s4 + $0x24] sm:$0xf] }
 0x1ca   : > { %4190 = vrot.lane.b32.xlu0 %v4178_v17, %s12857_s21 }
 0x1cb   : > { %v4381_v19 = vpop.permute.xlu1 %4380  ;;  %12262 = vmatmul.mubr.msk.f32.vlgmr.msra.gmra.mrb[2].mxu0 %vm637_vm0, %v12261_v38  ;;  %v4379_v34 = vpop.permute.xlu0 %4378 }
 0x1cc   : > { %2096 = vmatpush1.msra.mxu0 %v2084_v62  ;;  %v4384_v54 = vsel %vm555_vm2, %v4377_v57, %v4379_v34  ;;  %2159 = vmatprep.mubr.f32.mxu0 %v13670_v50  ;;  %v4385_v0 = vsel %vm555_vm2, %v4379_v34, %v4381_v19  ;;  %v12277_v34 = vld [vmem:[%s16088_s4 + $0x28] sm:$0xf] }
 0x1cd   : > { %2309 = vmatprep.subr.mxu0 %v2299_v35  ;;  %5878 = vrot.lane.b32.xlu1 %v5869_v4, %s12855_s11  ;;  %v4393_v15 = vmul.f32 %v4384_v54, %v13439_v59  ;;  %v4394_v1 = vmul.f32 %v4385_v0, %v13320_v48  ;;  %v2300_v48 = vsel %vm555_vm2, %v13892_v27, %v13747_v33  ;;  %v14116_v54 = vld [vmem:[#allocation2 + $0x8] sm:$0xff] }
 0x1ce   : > { %5876 = vrot.lane.b32.xlu0 %v5865_v2, %s12855_s11  ;;  %v6075_v33 = vrot.slane %v12340_v52, %v12976_v23 }
 0x1cf   : > { %v13999_v25 = vpop.permute.xlu1 %2936  ;;  %12263 = vmatmul.mubr.msk.f32.vlgmr.msra.gmra.mrb[2].mxu1 %vm637_vm0, %v12261_v38  ;;  %v4383_v14 = vpop.permute.xlu0 %4382 }
 0x1d0   : > { %2167 = vmatpush1.msra.mxu1 %v2086_v51  ;;  %v4386_v49 = vsel %vm555_vm2, %v4381_v19, %v4383_v14  ;;  %2230 = vmatprep.mubr.f32.mxu1 %v13670_v50  ;;  %v4396_v56 = vmul.f32 %v13670_v50, %v4383_v14 }
 0x1d1   : > { %2380 = vmatprep.subr.mxu1 %v2301_v32  ;;  %4406 = vrot.lane.b32.xlu1 %v4393_v15, %s12856_s16  ;;  %v4395_v55 = vmul.f32 %v4386_v49, %v13455_v5  ;;  %v12288_v15 = vld [vmem:[%s16087_s3 + $0x25] ss:$8 sm:$0xf] }
 0x1d2   : > { %5880 = vrot.lane.b32.xlu0 %v5873_v63, %s12855_s11  ;;  %v3328_v49 = vrot.slane %v12288_v15, %v12992_v29 }
 0x1d3   : > { %v14017_v37 = vpop.permute.xlu1 %2940  ;;  %12266 = vmatmul.mubr.msk.f32.vlgmr.msra.gmra.mrb[2].mxu0 %vm637_vm0, %v12265_v61  ;;  %v14023_v42 = vpop.permute.xlu0 %2938 }
 0x1d4   : > { %2310 = vmatpush1.msra.mxu0 %v2298_v7  ;;  %2373 = vmatprep.mubr.f32.mxu0 %v13670_v50  ;;  %v2946_v38 = vsel %vm16098_vm15, %v13999_v25, %v14023_v42  ;;  %v2947_v51 = vsel %vm16098_vm15, %v14023_v42, %v14017_v37  ;;  %v14138_v7 = vld [vmem:[#allocation2 + $0x10] sm:$0xff] }
 0x1d5   : > { %2525 = vmatprep.subr.mxu0 %v2515_v46  ;;  %4410 = vrot.lane.b32.xlu1 %v4395_v55, %s12856_s16  ;;  %v12281_v55 = vld [vmem:[%s16088_s4 + $0x2c] sm:$0xf] }
 0x1d6   : > { %4408 = vrot.lane.b32.xlu0 %v4394_v1, %s12856_s16 }
 0x1d7   : > { %v14036_v6 = vpop.permute.xlu1 %2934  ;;  %12267 = vmatmul.mubr.msk.f32.vlgmr.msra.gmra.mrb[2].mxu1 %vm637_vm0, %v12265_v61  ;;  %v2943_v53 = vpop.permute.xlu0 %2942 }
 0x1d8   : > { %2381 = vmatpush1.msra.mxu1 %v2300_v48  ;;  %2444 = vmatprep.mubr.f32.mxu1 %v13670_v50  ;;  %v2948_v62 = vsel %vm16098_vm15, %v14017_v37, %v2943_v53 }
 0x1d9   : > { %2596 = vmatprep.subr.mxu1 %v2517_v45  ;;  %4404 = vrot.lane.b32.xlu1 %v4392_v13, %s12856_s16  ;;  %v3342_v13 = vmul.f32 %v14138_v7, %v3328_v49 }
 0x1da   : > { %4412 = vrot.lane.b32.xlu0 %v4396_v56, %s12856_s16  ;;  %v14150_v56 = vld [vmem:[#allocation2 + $0x20] sm:$0xff] }
 0x1db   : > { %v4593_v27 = vpop.permute.xlu1 %4592  ;;  %12270 = vmatmul.mubr.msk.f32.vlgmr.msra.gmra.mrb[2].mxu0 %vm637_vm0, %v12269_v39  ;;  %v4591_v10 = vpop.permute.xlu0 %4590 }
 0x1dc   : > { %2526 = vmatpush1.msra.mxu0 %v2514_v26  ;;  %2589 = vmatprep.mubr.f32.mxu0 %v13670_v50  ;;  %v4598_v57 = vsel %vm597_vm1, %v4591_v10, %v4593_v27  ;;  %v4606_v35 = vmul.f32 %v14116_v54, %v4591_v10 }
 0x1dd   : > { %2740 = vmatprep.subr.mxu0 %v2730_v22  ;;  %6090 = vrot.lane.b32.xlu1 %v6079_v44, %s12856_s16  ;;  %v4607_v3 = vmul.f32 %v4598_v57, %v13439_v59  ;;  %v2731_v59 = vsel %vm637_vm0, %v13928_v12, %v13774_v9  ;;  %v2945_v9 = vsel %vm16098_vm15, %v14036_v6, %v13999_v25  ;;  %v12285_v22 = vld [vmem:[%s16088_s4 + $0x30] sm:$0xf]  ;;  %vm16133_vm15 = vmmov %vm16132_vm9 }
 0x1de   : > { %6088 = vrot.lane.b32.xlu0 %v6075_v33, %s12856_s16  ;;  %v3336_v6 = vrot.slane %v12288_v15, %v12990_v28 }
 0x1df   : > { %v4597_v24 = vpop.permute.xlu1 %4596  ;;  %12271 = vmatmul.mubr.msk.f32.vlgmr.msra.gmra.mrb[2].mxu1 %vm637_vm0, %v12269_v39  ;;  %v4595_v30 = vpop.permute.xlu0 %4594  ;;  %v3324_v39 = vrot.slane %v12288_v15, %v12976_v23 }
 0x1e0   : > { %2597 = vmatpush1.msra.mxu1 %v2516_v18  ;;  %v4599_v20 = vsel %vm597_vm1, %v4593_v27, %v4595_v30  ;;  %2660 = vmatprep.mubr.f32.mxu1 %v13670_v50  ;;  %v4600_v41 = vsel %vm597_vm1, %v4595_v30, %v4597_v24  ;;  %v4610_v31 = vmul.f32 %v13670_v50, %v4597_v24 }
 0x1e1   : > { %2811 = vmatprep.subr.mxu1 %v2732_v8  ;;  %6094 = vrot.lane.b32.xlu1 %v6087_v60, %s12856_s16  ;;  %v4608_v11 = vmul.f32 %v14084_v40, %v4599_v20  ;;  %v4609_v19 = vmul.f32 %v4600_v41, %v13455_v5  ;;  %v3344_v26 = vmul.f32 %v14150_v56, %v3336_v6 }
 0x1e2   : > { %6092 = vrot.lane.b32.xlu0 %v6083_v47, %s12856_s16  ;;  %v3341_v24 = vmul.f32 %v14116_v54, %v3324_v39  ;;  %v3332_v18 = vrot.slane %v12288_v15, %v12971_v21 }
 0x1e3   : > { %v14087_v58 = vpop.permute.xlu1 %3154  ;;  %12274 = vmatmul.mubr.msk.f32.vlgmr.msra.gmra.mrb[2].mxu0 %vm637_vm0, %v12273_v16  ;;  %v3153_v17 = vpop.permute.xlu0 %3152 }
 0x1e4   : > { %2741 = vmatpush1.msra.mxu0 %v2729_v36  ;;  %2804 = vmatprep.mubr.f32.mxu0 %v13670_v50  ;;  %v3162_v63 = vsel %vm16099_vm14, %v3153_v17, %v14087_v58  ;;  %v3343_v36 = vmul.f32 %v14084_v40, %v3332_v18 }
 0x1e5   : > { %2956 = vmatprep.subr.mxu0 %v2946_v38  ;;  %4622 = vrot.lane.b32.xlu1 %v4608_v11, %s12855_s11 }
 0x1e6   : > { %4620 = vrot.lane.b32.xlu0 %v4607_v3, %s12855_s11  ;;  %v12289_v3 = vld [vmem:[%s16088_s4 + $0x34] sm:$0xf] }
 0x1e7   : > { %v3159_v4 = vpop.permute.xlu1 %3158  ;;  %12275 = vmatmul.mubr.msk.f32.vlgmr.msra.gmra.mrb[2].mxu1 %vm637_vm0, %v12273_v16  ;;  %v3157_v2 = vpop.permute.xlu0 %3156 }
 0x1e8   : > { %2812 = vmatpush1.msra.mxu1 %v2731_v59  ;;  %2875 = vmatprep.mubr.f32.mxu1 %v13670_v50  ;;  %v3164_v0 = vsel %vm16099_vm14, %v3157_v2, %v3159_v4  ;;  %v3163_v33 = vsel %vm16099_vm14, %v14087_v58, %v3157_v2 }
 0x1e9   : > { %3027 = vmatprep.subr.mxu1 %v2948_v62  ;;  %4626 = vrot.lane.b32.xlu1 %v4610_v31, %s12855_s11 }
 0x1ea   : > { %4624 = vrot.lane.b32.xlu0 %v4609_v19, %s12855_s11 }
 0x1eb   : > { %v4805_v5 = vpop.permute.xlu1 %4804  ;;  %12278 = vmatmul.mubr.msk.f32.vlgmr.msra.gmra.mrb[2].mxu0 %vm637_vm0, %v12277_v34  ;;  %v3151_v12 = vpop.permute.xlu0 %3150 }
 0x1ec   : > { %2957 = vmatpush1.msra.mxu0 %v2945_v9  ;;  %3020 = vmatprep.mubr.f32.mxu0 %v13670_v50  ;;  %v3161_v1 = vsel %vm16099_vm14, %v3151_v12, %v3153_v17  ;;  %v4820_v47 = vmul.f32 %v14116_v54, %v4805_v5  ;;  %v12293_v12 = vld [vmem:[%s16088_s4 + $0x38] sm:$0xf]  ;;  %vm16134_vm14 = vmmov %vm16132_vm9 }
 0x1ed   : > { %3172 = vmatprep.subr.mxu0 %v3162_v63 }
 0x1ee   : > { %4618 = vrot.lane.b32.xlu0 %v4606_v35, %s12855_s11 }
 0x1ef   : > { %v4809_v25 = vpop.permute.xlu1 %4808  ;;  %12279 = vmatmul.mubr.msk.f32.vlgmr.msra.gmra.mrb[2].mxu1 %vm637_vm0, %v12277_v34  ;;  %v4807_v14 = vpop.permute.xlu0 %4806 }
 0x1f0   : > { %3028 = vmatpush1.msra.mxu1 %v2947_v51  ;;  %v4812_v32 = vsel %vm979_vm3, %v4805_v5, %v4807_v14  ;;  %v4813_v61 = vsel %vm979_vm3, %v4807_v14, %v4809_v25  ;;  %3091 = vmatprep.mubr.f32.mxu1 %v13670_v50 }
 0x1f1   : > { %v4821_v37 = vmul.f32 %v14138_v7, %v4812_v32  ;;  %v4822_v42 = vmul.f32 %v14084_v40, %v4813_v61  ;;  %3243 = vmatprep.subr.mxu1 %v3164_v0 }
 0x1f3   : > { %v5019_v46 = vpop.permute.xlu1 %5018  ;;  %12282 = vmatmul.mubr.msk.f32.vlgmr.msra.gmra.mrb[2].mxu0 %vm637_vm0, %v12281_v55  ;;  %4836 = vrot.lane.b32.xlu0 %v4822_v42, %s12854_s26  ;;  %v4811_v52 = vpop.permute.xlu0 %4810 }
 0x1f4   : > { %3173 = vmatpush1.msra.mxu0 %v3161_v1  ;;  %4834 = vrot.lane.b32.xlu1 %v4821_v37, %s12854_s26  ;;  %v4814_v48 = vsel %vm979_vm3, %v4809_v25, %v4811_v52  ;;  %v4824_v53 = vmul.f32 %v13670_v50, %v4811_v52  ;;  %v5034_v38 = vmul.f32 %v14116_v54, %v5019_v46  ;;  %v12297_v52 = vld [vmem:[%s16088_s4 + $0x3c] sm:$0xf] }
 0x1f5   : > { %v4823_v45 = vmul.f32 %v14150_v56, %v4814_v48  ;;  %3350 = vmatprep.subr.mxu0 %v3342_v13  ;;  %3236 = vmatprep.mubr.f32.mxu0 %v13670_v50 }
 0x1f7   : > { %v5023_v44 = vpop.permute.xlu1 %5022  ;;  %12283 = vmatmul.mubr.msk.f32.vlgmr.msra.gmra.mrb[2].mxu1 %vm637_vm0, %v12281_v55  ;;  %4840 = vrot.lane.b32.xlu0 %v4824_v53, %s12854_s26  ;;  %v5021_v27 = vpop.permute.xlu0 %5020 }
 0x1f8   : > { %3244 = vmatpush1.msra.mxu1 %v3163_v33  ;;  %4838 = vrot.lane.b32.xlu1 %v4823_v45, %s12854_s26  ;;  %v5026_v10 = vsel %vm1195_vm4, %v5019_v46, %v5021_v27  ;;  %v5027_v30 = vsel %vm1195_vm4, %v5021_v27, %v5023_v44 }
 0x1f9   : > { %v5035_v60 = vmul.f32 %v14138_v7, %v5026_v10  ;;  %3421 = vmatprep.subr.mxu1 %v3344_v26  ;;  %3307 = vmatprep.mubr.f32.mxu1 %v13670_v50  ;;  %v5036_v57 = vmul.f32 %v14084_v40, %v5027_v30 }
 0x1fb   : > { %v3551_v43 = vpop.permute.xlu1 %3550  ;;  %12286 = vmatmul.mubr.msk.f32.vlgmr.msra.gmra.mrb[2].mxu0 %vm637_vm0, %v12285_v22  ;;  %5048 = vrot.lane.b32.xlu0 %v5035_v60, %s12853_s23  ;;  %v5025_v20 = vpop.permute.xlu0 %5024 }
 0x1fc   : > { %3351 = vmatpush1.msra.mxu0 %v3341_v24  ;;  %4832 = vrot.lane.b32.xlu1 %v4820_v47, %s12854_s26  ;;  %v5028_v8 = vsel %vm1195_vm4, %v5023_v44, %v5025_v20  ;;  %v5038_v41 = vmul.f32 %v13670_v50, %v5025_v20 }
 0x1fd   : > { %v5037_v16 = vmul.f32 %v14150_v56, %v5028_v8  ;;  %3414 = vmatprep.mubr.f32.mxu0 %v13670_v50 }
 0x1ff   : > { %v3555_v11 = vpop.permute.xlu1 %3554  ;;  %12287 = vmatmul.mubr.msk.f32.vlgmr.msra.gmra.mrb[2].mxu1 %vm637_vm0, %v12285_v22  ;;  %5052 = vrot.lane.b32.xlu0 %v5037_v16, %s12853_s23  ;;  %v3553_v58 = vpop.permute.xlu0 %3552 }
 0x200   : > { %3422 = vmatpush1.msra.mxu1 %v3343_v36  ;;  %5050 = vrot.lane.b32.xlu1 %v5036_v57, %s12853_s23  ;;  %v3559_v17 = vsel %vm16100_vm13, %v3551_v43, %v3553_v58  ;;  %v3560_v62 = vsel %vm16100_vm13, %v3553_v58, %v3555_v11  ;;  %v12301_v57 = vld [vmem:[%s16088_s4 + $0x40] sm:$0xf] }
 0x201   : > { %3569 = vmatprep.subr.mxu0 %v3559_v17  ;;  %3485 = vmatprep.mubr.f32.mxu1 %v13670_v50  ;;  %v14250_v58 = vld [vmem:[#allocation2] sm:$0xff] }
 0x203   : > { %v3549_v31 = vpop.permute.xlu1 %3548  ;;  %5046 = vrot.lane.b32.xlu0 %v5034_v38, %s12853_s23  ;;  %v3557_v4 = vpop.permute.xlu0 %3556  ;;  %12290 = vmatmul.mubr.msk.f32.vlgmr.msra.gmra.mrb[2].mxu0 %vm637_vm0, %v12289_v3 }
 0x204   : > { %v3558_v59 = vsel %vm16100_vm13, %v3549_v31, %v3551_v43  ;;  %5054 = vrot.lane.b32.xlu1 %v5038_v41, %s12853_s23  ;;  %v3561_v2 = vsel %vm16100_vm13, %v3555_v11, %v3557_v4  ;;  %3633 = vmatprep.mubr.f32.mxu0 %v13670_v50  ;;  %vm16135_vm13 = vmmov %vm16132_vm9 }
 0x205   : > { %3570 = vmatpush1.msra.mxu0 %v3558_v59  ;;  %3640 = vmatprep.subr.mxu1 %v3561_v2 }
 0x207   : > { %v5235_v19 = vpop.permute.xlu1 %5234  ;;  %12291 = vmatmul.mubr.msk.f32.vlgmr.msra.gmra.mrb[2].mxu1 %vm637_vm0, %v12289_v3  ;;  %v5233_v34 = vpop.permute.xlu0 %5232 }
 0x208   : > { %3641 = vmatpush1.msra.mxu1 %v3560_v62  ;;  %v5240_v9 = vsel %vm1411_vm5, %v5233_v34, %v5235_v19  ;;  %3704 = vmatprep.mubr.f32.mxu1 %v13670_v50  ;;  %v5248_v0 = vmul.f32 %v14116_v54, %v5233_v34 }
 0x209   : > { %v5249_v5 = vmul.f32 %v14138_v7, %v5240_v9 }
 0x20b   : > { %v5239_v35 = vpop.permute.xlu1 %5238  ;;  %5262 = vrot.lane.b32.xlu1 %v5249_v5, %s12852_s20  ;;  %12294 = vmatmul.mubr.msk.f32.vlgmr.msra.gmra.mrb[2].mxu0 %vm637_vm0, %v12293_v12 }
 0x20c   : > { %v5237_v63 = vpop.permute.xlu0 %5236  ;;  %3847 = vmatprep.mubr.f32.mxu0 %v13670_v50  ;;  %v5252_v55 = vmul.f32 %v13670_v50, %v5239_v35 }
 0x20d   : > { %v5241_v15 = vsel %vm1411_vm5, %v5235_v19, %v5237_v63  ;;  %v5242_v25 = vsel %vm1411_vm5, %v5237_v63, %v5239_v35 }
 0x20e   : > { %v5250_v51 = vmul.f32 %v14084_v40, %v5241_v15  ;;  %v5251_v14 = vmul.f32 %v14150_v56, %v5242_v25 }
 0x20f   : > { %v3767_v49 = vpop.permute.xlu1 %3766  ;;  %12295 = vmatmul.mubr.msk.f32.vlgmr.msra.gmra.mrb[2].mxu1 %vm637_vm0, %v12293_v12 }
 0x210   : > { %5266 = vrot.lane.b32.xlu1 %v5251_v14, %s12852_s20  ;;  %5264 = vrot.lane.b32.xlu0 %v5250_v51, %s12852_s20  ;;  %v3765_v32 = vpop.permute.xlu0 %3764  ;;  %v12305_v51 = vld [vmem:[%s16088_s4 + $0x44] sm:$0xf] }
 0x211   : > { %v3773_v61 = vsel %vm2913_vm12, %v3765_v32, %v3767_v49  ;;  %3918 = vmatprep.mubr.f32.mxu1 %v13670_v50 }
 0x212   : > { %3783 = vmatprep.subr.mxu0 %v3773_v61 }
 0x213   : > { %v3771_v37 = vpop.permute.xlu1 %3770 }
 0x214   : > { %5260 = vrot.lane.b32.xlu1 %v5248_v0, %s12852_s20  ;;  %5268 = vrot.lane.b32.xlu0 %v5252_v55, %s12852_s20  ;;  %v3769_v42 = vpop.permute.xlu0 %3768 }
 0x215   : > { %v3775_v1 = vsel %vm2913_vm12, %v3769_v42, %v3771_v37  ;;  %v3774_v46 = vsel %vm2913_vm12, %v3767_v49, %v3769_v42 }
 0x216   : > { %3854 = vmatprep.subr.mxu1 %v3775_v1 }
 0x217   : > { %3855 = vmatpush1.msra.mxu1 %v3774_v46  ;;  %v5447_v13 = vpop.permute.xlu1 %5446 }
 0x218   : > { %v3763_v6 = vpop.permute.xlu0 %3762  ;;  %12299 = vmatmul.mubr.msk.f32.vlgmr.msra.gmra.mrb[2].mxu1 %vm637_vm0, %v12297_v52  ;;  %v5462_v43 = vmul.f32 %v14116_v54, %v5447_v13 }
 0x219   : > { %v3772_v48 = vsel %vm2913_vm12, %v3763_v6, %v3765_v32  ;;  %4132 = vmatprep.mubr.f32.mxu1 %v13670_v50 }
 0x21a   : > { %3784 = vmatpush1.msra.mxu0 %v3772_v48 }
 0x21b   : > { %v5451_v53 = vpop.permute.xlu1 %5450  ;;  %12298 = vmatmul.mubr.msk.f32.vlgmr.msra.gmra.mrb[2].mxu0 %vm637_vm0, %v12297_v52 }
 0x21c   : > { %v5449_v45 = vpop.permute.xlu0 %5448  ;;  %4061 = vmatprep.mubr.f32.mxu0 %v13670_v50 }
 0x21d   : > { %v5454_v39 = vsel %vm1226_vm6, %v5447_v13, %v5449_v45  ;;  %v5455_v44 = vsel %vm1226_vm6, %v5449_v45, %v5451_v53 }
 0x21e   : > { %v5463_v33 = vmul.f32 %v14138_v7, %v5454_v39  ;;  %v5464_v27 = vmul.f32 %v14084_v40, %v5455_v44 }
 0x21f   : > { %v3979_v26 = vpop.permute.xlu1 %3978 }
 0x220   : > { %5478 = vrot.lane.b32.xlu1 %v5464_v27, %s12851_s13  ;;  %5476 = vrot.lane.b32.xlu0 %v5463_v33, %s12851_s13  ;;  %v5453_v10 = vpop.permute.xlu0 %5452 }
 0x221   : > { %v5456_v22 = vsel %vm1226_vm6, %v5451_v53, %v5453_v10  ;;  %v5466_v60 = vmul.f32 %v13670_v50, %v5453_v10 }
 0x222   : > { %v5465_v47 = vmul.f32 %v14150_v56, %v5456_v22  ;;  %v12309_v22 = vld [vmem:[%s16088_s4 + $0x48] sm:$0xf] }
 0x223   : > { %v3983_v24 = vpop.permute.xlu1 %3982 }
 0x224   : > { %5482 = vrot.lane.b32.xlu1 %v5466_v60, %s12851_s13  ;;  %5480 = vrot.lane.b32.xlu0 %v5465_v47, %s12851_s13  ;;  %v3981_v18 = vpop.permute.xlu0 %3980 }
 0x225   : > { %v3987_v30 = vsel %vm2698_vm11, %v3979_v26, %v3981_v18  ;;  %v3988_v36 = vsel %vm2698_vm11, %v3981_v18, %v3983_v24 }
 0x226   : > { %3997 = vmatprep.subr.mxu0 %v3987_v30 }
 0x227   : > { %v3977_v20 = vpop.permute.xlu1 %3976 }
 0x228   : > { %v3986_v8 = vsel %vm2698_vm11, %v3977_v20, %v3979_v26  ;;  %5474 = vrot.lane.b32.xlu0 %v5462_v43, %s12851_s13  ;;  %v3985_v16 = vpop.permute.xlu0 %3984 }
 0x229   : > { %3998 = vmatpush1.msra.mxu0 %v3986_v8  ;;  %v3989_v50 = vsel %vm2698_vm11, %v3983_v24, %v3985_v16 }
 0x22a   : > { %4068 = vmatprep.subr.mxu1 %v3989_v50  ;;  %12302 = vmatmul.mubr.msk.f32.vlgmr.msra.gmra.mrb[2].mxu0 %vm637_vm0, %v12301_v57 }
 0x22b   : > { %4069 = vmatpush1.msra.mxu1 %v3988_v36  ;;  %v5663_v11 = vpop.permute.xlu1 %5662  ;;  %4275 = vmatprep.mubr.f32.mxu0 %v14250_v58 }
 0x22c   : > { %v5661_v17 = vpop.permute.xlu0 %5660  ;;  %12303 = vmatmul.mubr.msk.f32.vlgmr.msra.gmra.mrb[2].mxu1 %vm637_vm0, %v12301_v57 }
 0x22d   : > { %v5668_v3 = vsel %vm1010_vm7, %v5661_v17, %v5663_v11  ;;  %4346 = vmatprep.mubr.f32.mxu1 %v14250_v58  ;;  %v5676_v5 = vmul.f32 %v14116_v54, %v5661_v17  ;;  %v12344_v17 = vld [vmem:[%s16087_s3 + $0x1] ss:$8 sm:$0xf] }
 0x22e   : > { %v5677_v38 = vmul.f32 %v14138_v7, %v5668_v3 }
 0x22f   : > { %v5667_v41 = vpop.permute.xlu1 %5666 }
 0x230   : > { %5690 = vrot.lane.b32.xlu1 %v5677_v38, %s12850_s14  ;;  %v5665_v31 = vpop.permute.xlu0 %5664  ;;  %v5680_v12 = vmul.f32 %v14250_v58, %v5667_v41 }
 0x231   : > { %v5669_v4 = vsel %vm1010_vm7, %v5663_v11, %v5665_v31  ;;  %v5670_v59 = vsel %vm1010_vm7, %v5665_v31, %v5667_v41  ;;  %v6351_v41 = vrot.slane %v12344_v17, %v12976_v23 }
 0x232   : > { %v5678_v2 = vmul.f32 %v14084_v40, %v5669_v4  ;;  %v5679_v19 = vmul.f32 %v14150_v56, %v5670_v59  ;;  %v6283_v59 = vld [vmem:[%s16090_s6] sm:$0xf] }
 0x233   : > { %v4195_v62 = vpop.permute.xlu1 %4194 }
 0x234   : > { %5694 = vrot.lane.b32.xlu1 %v5679_v19, %s12850_s14  ;;  %5692 = vrot.lane.b32.xlu0 %v5678_v2, %s12850_s14  ;;  %v4193_v34 = vpop.permute.xlu0 %4192  ;;  %v6359_v19 = vrot.slane %v12344_v17, %v12971_v21 }
 0x235   : > { %v4201_v9 = vsel %vm2482_vm10, %v4193_v34, %v4195_v62 }
 0x236   : > { %4211 = vmatprep.subr.mxu0 %v4201_v9  ;;  %v6355_v9 = vrot.slane %v12344_v17, %v12992_v29 }
 0x237   : > { %v4199_v35 = vpop.permute.xlu1 %4198 }
 0x238   : > { %5688 = vrot.lane.b32.xlu1 %v5676_v5, %s12850_s14  ;;  %5696 = vrot.lane.b32.xlu0 %v5680_v12, %s12850_s14  ;;  %v4197_v63 = vpop.permute.xlu0 %4196 }
 0x239   : > { %v4203_v15 = vsel %vm2482_vm10, %v4197_v63, %v4199_v35  ;;  %v4202_v25 = vsel %vm2482_vm10, %v4195_v62, %v4197_v63  ;;  %v6363_v35 = vrot.slane %v12344_v17, %v12990_v28 }
 0x23a   : > { %4282 = vmatprep.subr.mxu1 %v4203_v15 }
 0x23b   : > { %4283 = vmatpush1.msra.mxu1 %v4202_v25  ;;  %v5875_v14 = vpop.permute.xlu1 %5874 }
 0x23c   : > { %v4191_v49 = vpop.permute.xlu0 %4190  ;;  %12307 = vmatmul.mubr.msk.f32.vlgmr.msra.gmra.mrb[2].mxu1 %vm637_vm0, %v12305_v51  ;;  %v5890_v44 = vmul.f32 %v14116_v54, %v5875_v14 }
 0x23d   : > { %v4200_v32 = vsel %vm2482_vm10, %v4191_v49, %v4193_v34  ;;  %4560 = vmatprep.mubr.f32.mxu1 %v14250_v58  ;;  %v6306_v34 = vld [vmem:[%s16087_s3] ss:$8 sm:$0xf] }
 0x23e   : > { %4212 = vmatpush1.msra.mxu0 %v4200_v32  ;;  %v6311_v5 = vrot.slane %v6306_v34, %v12976_v23  ;;  %v6319_v25 = vrot.slane %v6306_v34, %v12971_v21  ;;  %v6315_v49 = vrot.slane %v6306_v34, %v12992_v29 }
 0x23f   : > { %v5879_v61 = vpop.permute.xlu1 %5878  ;;  %12306 = vmatmul.mubr.msk.f32.vlgmr.msra.gmra.mrb[2].mxu0 %vm637_vm0, %v12305_v51 }
 0x240   : > { %v5877_v0 = vpop.permute.xlu0 %5876  ;;  %4489 = vmatprep.mubr.f32.mxu0 %v14250_v58 }
 0x241   : > { %v5882_v55 = vsel %vm628_vm8, %v5875_v14, %v5877_v0  ;;  %v5883_v37 = vsel %vm628_vm8, %v5877_v0, %v5879_v61  ;;  %v12358_v14 = vld [vmem:[%s16087_s3 + $0x2] ss:$8 sm:$0xf] }
 0x242   : > { %v5891_v42 = vmul.f32 %v14138_v7, %v5882_v55  ;;  %v5892_v1 = vmul.f32 %v14084_v40, %v5883_v37  ;;  %v12317_v55 = vld [vmem:[%s16088_s4 + $0x50] sm:$0xf]  ;;  %v6738_v37 = vrot.slane %v12358_v14, %v12976_v23 }
 0x243   : > { %v4407_v46 = vpop.permute.xlu1 %4406 }
 0x244   : > { %5906 = vrot.lane.b32.xlu1 %v5892_v1, %s12848_s19  ;;  %5904 = vrot.lane.b32.xlu0 %v5891_v42, %s12848_s19  ;;  %v5881_v52 = vpop.permute.xlu0 %5880  ;;  %v6323_v1 = vrot.slane %v6306_v34, %v12990_v28 }
 0x245   : > { %v5884_v13 = vsel %vm628_vm8, %v5879_v61, %v5881_v52  ;;  %v5894_v6 = vmul.f32 %v14250_v58, %v5881_v52 }
 0x246   : > { %v5893_v48 = vmul.f32 %v14150_v56, %v5884_v13  ;;  %v6746_v13 = vrot.slane %v12358_v14, %v12971_v21 }
 0x247   : > { %v4411_v53 = vpop.permute.xlu1 %4410 }
 0x248   : > { %5910 = vrot.lane.b32.xlu1 %v5894_v6, %s12848_s19  ;;  %5908 = vrot.lane.b32.xlu0 %v5893_v48, %s12848_s19  ;;  %v4409_v45 = vpop.permute.xlu0 %4408  ;;  %v12366_v48 = vld [vmem:[%s16087_s3 + $0x3] ss:$8 sm:$0xf] }
 0x249   : > { %v4415_v39 = vsel %vm16132_vm9, %v4407_v46, %v4409_v45  ;;  %v4416_v60 = vsel %vm16135_vm13, %v4409_v45, %v4411_v53  ;;  %vm16136_vm13 = vmmov %vm16132_vm9 }
 0x24a   : > { %4425 = vmatprep.subr.mxu0 %v4415_v39 }
 0x24b   : > { %v4405_v33 = vpop.permute.xlu1 %4404 }
 0x24c   : > { %v4414_v27 = vsel %vm16133_vm15, %v4405_v33, %v4407_v46  ;;  %5902 = vrot.lane.b32.xlu0 %v5890_v44, %s12848_s19  ;;  %v4413_v26 = vpop.permute.xlu0 %4412  ;;  %v6955_v44 = vrot.slane %v12366_v48, %v12976_v23  ;;  %vm16154_vm15 = vmmov %vm16132_vm9 }
 0x24d   : > { %4426 = vmatpush1.msra.mxu0 %v4414_v27  ;;  %v4417_v10 = vsel %vm16134_vm14, %v4411_v53, %v4413_v26  ;;  %vm16137_vm14 = vmmov %vm16132_vm9  ;;  %v6742_v53 = vrot.slane %v12358_v14, %v12992_v29 }
 0x24e   : > { %4496 = vmatprep.subr.mxu1 %v4417_v10  ;;  %12310 = vmatmul.mubr.msk.f32.vlgmr.msra.gmra.mrb[2].mxu0 %vm637_vm0, %v12309_v22  ;;  %v12321_v10 = vld [vmem:[%s16088_s4 + $0x54] sm:$0xf] }
 0x24f   : > { %4497 = vmatpush1.msra.mxu1 %v4416_v60  ;;  %v6091_v47 = vpop.permute.xlu1 %6090  ;;  %4703 = vmatprep.mubr.f32.mxu0 %v14250_v58 }
 0x250   : > { %v6089_v24 = vpop.permute.xlu0 %6088  ;;  %12311 = vmatmul.mubr.msk.f32.vlgmr.msra.gmra.mrb[2].mxu1 %vm637_vm0, %v12309_v22  ;;  %v6750_v22 = vrot.slane %v12358_v14, %v12990_v28 }
 0x251   : > { %v6096_v18 = vsel %vm16132_vm9, %v6089_v24, %v6091_v47  ;;  %4774 = vmatprep.mubr.f32.mxu1 %v14250_v58  ;;  %v6104_v3 = vmul.f32 %v14116_v54, %v6089_v24  ;;  %v12313_v54 = vld [vmem:[%s16088_s4 + $0x4c] sm:$0xf]  ;;  %v6963_v24 = vrot.slane %v12366_v48, %v12971_v21 }
 0x252   : > { %v6105_v30 = vmul.f32 %v14138_v7, %v6096_v18  ;;  %v12374_v18 = vld [vmem:[%s16087_s3 + $0x4] ss:$8 sm:$0xf] }
 0x253   : > { %v6095_v43 = vpop.permute.xlu1 %6094 }
 0x254   : > { %6118 = vrot.lane.b32.xlu1 %v6105_v30, %s12849_s10  ;;  %v6093_v20 = vpop.permute.xlu0 %6092  ;;  %v6108_v38 = vmul.f32 %v14250_v58, %v6095_v43  ;;  %v6959_v30 = vrot.slane %v12366_v48, %v12992_v29 }
 0x255   : > { %v6097_v8 = vsel %vm16136_vm13, %v6091_v47, %v6093_v20  ;;  %v6098_v16 = vsel %vm16137_vm14, %v6093_v20, %v6095_v43  ;;  %v7172_v43 = vrot.slane %v12374_v18, %v12976_v23  ;;  %vm16158_vm13 = vcmask 1039360  }
 0x256   : > { %v6106_v50 = vmul.f32 %v14084_v40, %v6097_v8  ;;  %v6107_v57 = vmul.f32 %v14150_v56, %v6098_v16  ;;  %v6967_v8 = vrot.slane %v12366_v48, %v12990_v28  ;;  %v7180_v16 = vrot.slane %v12374_v18, %v12971_v21  ;;  %vm16162_vm14 = vmmov %vm16158_vm13 }
 0x257   : > { %v4623_v36 = vpop.permute.xlu1 %4622 }
 0x258   : > { %6122 = vrot.lane.b32.xlu1 %v6107_v57, %s12849_s10  ;;  %6120 = vrot.lane.b32.xlu0 %v6106_v50, %s12849_s10  ;;  %v4621_v11 = vpop.permute.xlu0 %4620 }
 0x259   : > { %v4629_v7 = vsel %vm628_vm8, %v4621_v11, %v4623_v36 }
 0x25a   : > { %4639 = vmatprep.subr.mxu0 %v4629_v7  ;;  %v12382_v7 = vld [vmem:[%s16087_s3 + $0x5] ss:$8 sm:$0xf] }
 0x25b   : > { %v4627_v40 = vpop.permute.xlu1 %4626 }
 0x25c   : > { %6116 = vrot.lane.b32.xlu1 %v6104_v3, %s12849_s10  ;;  %6124 = vrot.lane.b32.xlu0 %v6108_v38, %s12849_s10  ;;  %v4625_v56 = vpop.permute.xlu0 %4624  ;;  %v7184_v38 = vrot.slane %v12374_v18, %v12990_v28 }
 0x25d   : > { %v4631_v31 = vsel %vm628_vm8, %v4625_v56, %v4627_v40  ;;  %v4630_v4 = vsel %vm628_vm8, %v4623_v36, %v4625_v56  ;;  %v7176_v36 = vrot.slane %v12374_v18, %v12992_v29 }
 0x25e   : > { %4710 = vmatprep.subr.mxu1 %v4631_v31  ;;  %v7389_v31 = vrot.slane %v12382_v7, %v12976_v23 }
 0x25f   : > { %4711 = vmatpush1.msra.mxu1 %v4630_v4 }
 0x260   : > { %6364 = vrot.lane.b32.xlu1 %v6351_v41, %s12848_s19  ;;  %6286 = vperm.xlu0 %12821, %v6283_v59   ;;  %v4619_v2 = vpop.permute.xlu0 %4618  ;;  %v12325_v41 = vld [vmem:[%s16088_s4 + $0x58] sm:$0xf]  ;;  %v7393_v59 = vrot.slane %v12382_v7, %v12992_v29 }
 0x261   : > { %v4628_v62 = vsel %vm628_vm8, %v4619_v2, %v4621_v11  ;;  %12315 = vmatmul.mubr.msk.f32.vlgmr.msra.gmra.mrb[2].mxu1 %vm637_vm0, %v12313_v54  ;;  %v12390_v2 = vld [vmem:[%s16087_s3 + $0x6] ss:$8 sm:$0xf] }
 0x262   : > { %4640 = vmatpush1.msra.mxu0 %v4628_v62  ;;  %4988 = vmatprep.mubr.f32.mxu1 %v14250_v58  ;;  %v7606_v62 = vrot.slane %v12390_v2, %v12976_v23 }
 0x263   : > { %12314 = vmatmul.mubr.msk.f32.vlgmr.msra.gmra.mrb[2].mxu0 %vm637_vm0, %v12313_v54  ;;  %v7397_v54 = vrot.slane %v12382_v7, %v12971_v21 }
 0x264   : > { %6368 = vrot.lane.b32.xlu0 %v6359_v19, %s12848_s19  ;;  %4917 = vmatprep.mubr.f32.mxu0 %v14250_v58  ;;  %v7401_v19 = vrot.slane %v12382_v7, %v12990_v28 }
 0x265   : > { %v4837_v12 = vpop.permute.xlu0 %4836  ;;  %6366 = vrot.lane.b32.xlu1 %v6355_v9, %s12848_s19 }
 0x266   : > { %v4835_v63 = vpop.permute.xlu1 %4834 }
 0x267   : > { %v4843_v15 = vsel %vm1010_vm7, %v4835_v63, %v4837_v12 }
 0x268   : > { %4853 = vmatprep.subr.mxu0 %v4843_v15  ;;  %6324 = vrot.lane.b32.xlu0 %v6311_v5, %s12849_s10  ;;  %v7610_v5 = vrot.slane %v12390_v2, %v12992_v29 }
 0x269   : > { %v4841_v51 = vpop.permute.xlu0 %4840  ;;  %6370 = vrot.lane.b32.xlu1 %v6363_v35, %s12848_s19  ;;  %v7614_v35 = vrot.slane %v12390_v2, %v12971_v21 }
 0x26a   : > { %v4839_v32 = vpop.permute.xlu1 %4838 }
 0x26b   : > { %v4845_v61 = vsel %vm1010_vm7, %v4839_v32, %v4841_v51  ;;  %v4844_v0 = vsel %vm1010_vm7, %v4837_v12, %v4839_v32  ;;  %v12398_v51 = vld [vmem:[%s16087_s3 + $0x7] ss:$8 sm:$0xf] }
 0x26c   : > { %4924 = vmatprep.subr.mxu1 %v4845_v61  ;;  %6328 = vrot.lane.b32.xlu0 %v6319_v25, %s12849_s10  ;;  %v7618_v25 = vrot.slane %v12390_v2, %v12990_v28  ;;  %v12329_v32 = vld [vmem:[%s16088_s4 + $0x5c] sm:$0xf]  ;;  %v7823_v61 = vrot.slane %v12398_v51, %v12976_v23 }
 0x26d   : > { %4925 = vmatpush1.msra.mxu1 %v4844_v0  ;;  %v5049_v42 = vpop.permute.xlu0 %5048  ;;  %6326 = vrot.lane.b32.xlu1 %v6315_v49, %s12849_s10 }
 0x26e   : > { %v4833_v46 = vpop.permute.xlu1 %4832  ;;  %12319 = vmatmul.mubr.msk.f32.vlgmr.msra.gmra.mrb[2].mxu1 %vm637_vm0, %v12317_v55 }
 0x26f   : > { %v4842_v52 = vsel %vm1010_vm7, %v4833_v46, %v4835_v63  ;;  %5202 = vmatprep.mubr.f32.mxu1 %v14250_v58  ;;  %v14463_v46 = vld [vmem:[%s16087_s3 + $0x20] ss:$8 sm:$0xf] }
 0x270   : > { %4854 = vmatpush1.msra.mxu0 %v4842_v52  ;;  %6751 = vrot.lane.b32.xlu0 %v6738_v37, %s12850_s14  ;;  %v8052_v2 = vrot.slane %v14463_v46, %v12990_v28 }
 0x271   : > { %v5053_v6 = vpop.permute.xlu0 %5052  ;;  %12318 = vmatmul.mubr.msk.f32.vlgmr.msra.gmra.mrb[2].mxu0 %vm637_vm0, %v12317_v55  ;;  %6330 = vrot.lane.b32.xlu1 %v6323_v1, %s12849_s10  ;;  %v7827_v55 = vrot.slane %v12398_v51, %v12992_v29  ;;  %v7835_v1 = vrot.slane %v12398_v51, %v12990_v28 }
 0x272   : > { %v5051_v45 = vpop.permute.xlu1 %5050  ;;  %5131 = vmatprep.mubr.f32.mxu0 %v14250_v58 }
 0x273   : > { %v5057_v39 = vsel %vm1226_vm6, %v5049_v42, %v5051_v45  ;;  %v5058_v47 = vsel %vm1226_vm6, %v5051_v45, %v5053_v6 }
 0x274   : > { %5067 = vmatprep.subr.mxu0 %v5057_v39  ;;  %6755 = vrot.lane.b32.xlu0 %v6746_v13, %s12850_s14  ;;  %v8040_v13 = vrot.slane %v14463_v46, %v12976_v23 }
 0x275   : > { %v5047_v33 = vpop.permute.xlu0 %5046  ;;  %6753 = vrot.lane.b32.xlu1 %v6742_v53, %s12850_s14  ;;  %v8048_v53 = vrot.slane %v14463_v46, %v12971_v21 }
 0x276   : > { %v5055_v27 = vpop.permute.xlu1 %5054  ;;  %v5056_v26 = vsel %vm1226_vm6, %v5047_v33, %v5049_v42  ;;  %v7831_v42 = vrot.slane %v12398_v51, %v12971_v21 }
 0x277   : > { %5068 = vmatpush1.msra.mxu0 %v5056_v26  ;;  %v5059_v60 = vsel %vm1226_vm6, %v5053_v6, %v5055_v27  ;;  %v12333_v26 = vld [vmem:[%s16088_s4 + $0x60] sm:$0xf] }
 0x278   : > { %5138 = vmatprep.subr.mxu1 %v5059_v60  ;;  %6968 = vrot.lane.b32.xlu0 %v6955_v44, %s12851_s13 }
 0x279   : > { %5139 = vmatpush1.msra.mxu1 %v5058_v47  ;;  %12322 = vmatmul.mubr.msk.f32.vlgmr.msra.gmra.mrb[2].mxu0 %vm637_vm0, %v12321_v10 }
 0x27a   : > { %12323 = vmatmul.mubr.msk.f32.vlgmr.msra.gmra.mrb[2].mxu1 %vm637_vm0, %v12321_v10  ;;  %6757 = vrot.lane.b32.xlu1 %v6750_v22, %s12850_s14 }
 0x27b   : > { %5416 = vmatprep.mubr.f32.mxu1 %v14250_v58  ;;  %5345 = vmatprep.mubr.f32.mxu0 %v14250_v58 }
 0x27c   : > { %6972 = vrot.lane.b32.xlu0 %v6963_v24, %s12851_s13 }
 0x27d   : > { %v5263_v20 = vpop.permute.xlu1 %5262 }
 0x27e   : > { %6970 = vrot.lane.b32.xlu1 %v6959_v30, %s12851_s13 }
 0x280   : > { %7185 = vrot.lane.b32.xlu0 %v7172_v43, %s12852_s20 }
 0x282   : > { %v5267_v50 = vpop.permute.xlu1 %5266  ;;  %v5265_v57 = vpop.permute.xlu0 %5264  ;;  %6974 = vrot.lane.b32.xlu1 %v6967_v8, %s12851_s13 }
 0x283   : > { %v5271_v11 = vsel %vm1411_vm5, %v5263_v20, %v5265_v57  ;;  %v5272_v4 = vsel %vm1411_vm5, %v5265_v57, %v5267_v50 }
 0x284   : > { %5281 = vmatprep.subr.mxu0 %v5271_v11  ;;  %7189 = vrot.lane.b32.xlu0 %v7180_v16, %s12852_s20 }
 0x286   : > { %v5261_v17 = vpop.permute.xlu1 %5260  ;;  %v5269_v3 = vpop.permute.xlu0 %5268  ;;  %7187 = vrot.lane.b32.xlu1 %v7176_v36, %s12852_s20 }
 0x287   : > { %v5270_v40 = vsel %vm1411_vm5, %v5261_v17, %v5263_v20  ;;  %v5273_v56 = vsel %vm1411_vm5, %v5267_v50, %v5269_v3  ;;  %v12337_v20 = vld [vmem:[%s16088_s4 + $0x64] sm:$0xf]  ;;  %v12341_v3 = vld [vmem:[%s16088_s4 + $0x68] sm:$0xf] }
 0x288   : > { %5282 = vmatpush1.msra.mxu0 %v5270_v40  ;;  %5352 = vmatprep.subr.mxu1 %v5273_v56 }
 0x289   : > { %5353 = vmatpush1.msra.mxu1 %v5272_v4  ;;  %12326 = vmatmul.mubr.msk.f32.vlgmr.msra.gmra.mrb[2].mxu0 %vm637_vm0, %v12325_v41 }
 0x28a   : > { %12327 = vmatmul.mubr.msk.f32.vlgmr.msra.gmra.mrb[2].mxu1 %vm637_vm0, %v12325_v41  ;;  %7191 = vrot.lane.b32.xlu1 %v7184_v38, %s12852_s20  ;;  %v14502_v41 = vld [vmem:[#allocation2] sm:$0xf] }
 0x28b   : > { %7402 = vrot.lane.b32.xlu0 %v7389_v31, %s12853_s23  ;;  %5559 = vmatprep.mubr.f32.mxu0 %v14250_v58 }
 0x28c   : > { %5630 = vmatprep.mubr.f32.mxu1 %v14250_v58 }
 0x28e   : > { %7404 = vrot.lane.b32.xlu1 %v7393_v59, %s12853_s23  ;;  %v8044_v59 = vrot.slane %v14463_v46, %v12992_v29 }
 0x28f   : > { %7406 = vrot.lane.b32.xlu0 %v7397_v54, %s12853_s23 }
 0x292   : > { %v5479_v34 = vpop.permute.xlu1 %5478  ;;  %v5477_v9 = vpop.permute.xlu0 %5476  ;;  %7408 = vrot.lane.b32.xlu1 %v7401_v19, %s12853_s23  ;;  %v12414_v19 = vld [vmem:[%s16087_s3 + $0x21] ss:$8 sm:$0xf] }
 0x293   : > { %v5485_v12 = vsel %vm1195_vm4, %v5477_v9, %v5479_v34  ;;  %7619 = vrot.lane.b32.xlu0 %v7606_v62, %s12854_s26  ;;  %v8261_v51 = vrot.slane %v12414_v19, %v12992_v29 }
 0x294   : > { %5495 = vmatprep.subr.mxu0 %v5485_v12 }
 0x296   : > { %v5483_v63 = vpop.permute.xlu1 %5482  ;;  %v5481_v15 = vpop.permute.xlu0 %5480  ;;  %7621 = vrot.lane.b32.xlu1 %v7610_v5, %s12854_s26  ;;  %v8265_v5 = vrot.slane %v12414_v19, %v12971_v21 }
 0x297   : > { %v5487_v14 = vsel %vm1195_vm4, %v5481_v15, %v5483_v63  ;;  %v5486_v49 = vsel %vm1195_vm4, %v5479_v34, %v5481_v15  ;;  %7623 = vrot.lane.b32.xlu0 %v7614_v35, %s12854_s26 }
 0x298   : > { %5566 = vmatprep.subr.mxu1 %v5487_v14 }
 0x299   : > { %5567 = vmatpush1.msra.mxu1 %v5486_v49 }
 0x29a   : > { %v5475_v0 = vpop.permute.xlu0 %5474  ;;  %12331 = vmatmul.mubr.msk.f32.vlgmr.msra.gmra.mrb[2].mxu1 %vm637_vm0, %v12329_v32  ;;  %7625 = vrot.lane.b32.xlu1 %v7618_v25, %s12854_s26 }
 0x29b   : > { %v5484_v37 = vsel %vm1195_vm4, %v5475_v0, %v5477_v9  ;;  %7836 = vrot.lane.b32.xlu0 %v7823_v61, %s12855_s11  ;;  %5844 = vmatprep.mubr.f32.mxu1 %v14250_v58  ;;  %v12422_v0 = vld [vmem:[%s16087_s3 + $0x22] ss:$8 sm:$0xf] }
 0x29c   : > { %5496 = vmatpush1.msra.mxu0 %v5484_v37 }
 0x29d   : > { %12330 = vmatmul.mubr.msk.f32.vlgmr.msra.gmra.mrb[2].mxu0 %vm637_vm0, %v12329_v32  ;;  %v8269_v32 = vrot.slane %v12414_v19, %v12990_v28 }
 0x29e   : > { %7838 = vrot.lane.b32.xlu1 %v7827_v55, %s12855_s11  ;;  %5773 = vmatprep.mubr.f32.mxu0 %v14250_v58 }
 0x29f   : > { %7840 = vrot.lane.b32.xlu0 %v7831_v42, %s12855_s11  ;;  %v8474_v42 = vrot.slane %v12422_v0, %v12976_v23 }
 0x2a2   : > { %v5691_v52 = vpop.permute.xlu1 %5690  ;;  %7842 = vrot.lane.b32.xlu1 %v7835_v1, %s12855_s11  ;;  %v8478_v1 = vrot.slane %v12422_v0, %v12992_v29 }
 0x2a6   : > { %v5695_v6 = vpop.permute.xlu1 %5694  ;;  %v5693_v48 = vpop.permute.xlu0 %5692  ;;  %8053 = vrot.lane.b32.xlu1 %v8040_v13, %s12856_s16  ;;  %v8482_v13 = vrot.slane %v12422_v0, %v12971_v21 }
 0x2a7   : > { %v5699_v45 = vsel %vm979_vm3, %v5691_v52, %v5693_v48  ;;  %v5700_v10 = vsel %vm979_vm3, %v5693_v48, %v5695_v6 }
 0x2a8   : > { %5709 = vmatprep.subr.mxu0 %v5699_v45 }
 0x2aa   : > { %v5689_v39 = vpop.permute.xlu1 %5688  ;;  %v5697_v44 = vpop.permute.xlu0 %5696  ;;  %8057 = vrot.lane.b32.xlu1 %v8048_v53, %s12856_s16  ;;  %v12430_v53 = vld [vmem:[%s16087_s3 + $0x23] ss:$8 sm:$0xf] }
 0x2ab   : > { %v5698_v33 = vsel %vm979_vm3, %v5689_v39, %v5691_v52  ;;  %v5701_v27 = vsel %vm979_vm3, %v5695_v6, %v5697_v44  ;;  %v8486_v6 = vrot.slane %v12422_v0, %v12990_v28  ;;  %v8691_v44 = vrot.slane %v12430_v53, %v12976_v23 }
 0x2ac   : > { %5710 = vmatpush1.msra.mxu0 %v5698_v33  ;;  %5780 = vmatprep.subr.mxu1 %v5701_v27 }
 0x2ad   : > { %5781 = vmatpush1.msra.mxu1 %v5700_v10  ;;  %12334 = vmatmul.mubr.msk.f32.vlgmr.msra.gmra.mrb[2].mxu0 %vm637_vm0, %v12333_v26  ;;  %v8699_v10 = vrot.slane %v12430_v53, %v12971_v21 }
 0x2ae   : > { %12335 = vmatmul.mubr.msk.f32.vlgmr.msra.gmra.mrb[2].mxu1 %vm637_vm0, %v12333_v26  ;;  %5987 = vmatprep.mubr.f32.mxu0 %v14250_v58  ;;  %v8695_v26 = vrot.slane %v12430_v53, %v12992_v29 }
 0x2af   : > { %6058 = vmatprep.mubr.f32.mxu1 %v14250_v58 }
 0x2b6   : > { %v5907_v22 = vpop.permute.xlu1 %5906  ;;  %v5905_v60 = vpop.permute.xlu0 %5904 }
 0x2b7   : > { %v5913_v47 = vsel %vm597_vm1, %v5905_v60, %v5907_v22 }
 0x2b8   : > { %5923 = vmatprep.subr.mxu0 %v5913_v47  ;;  %v8703_v47 = vrot.slane %v12430_v53, %v12990_v28  ;;  %v12470_v53 = vld [vmem:[%s16087_s3 + $0x40] ss:$8 sm:$0xf] }
 0x2ba   : > { %v5911_v24 = vpop.permute.xlu1 %5910  ;;  %v5909_v18 = vpop.permute.xlu0 %5908 }
 0x2bb   : > { %v5915_v30 = vsel %vm597_vm1, %v5909_v18, %v5911_v24  ;;  %v5914_v43 = vsel %vm597_vm1, %v5907_v22, %v5909_v18  ;;  %v12438_v18 = vld [vmem:[%s16087_s3 + $0x24] ss:$8 sm:$0xf] }
 0x2bc   : > { %5994 = vmatprep.subr.mxu1 %v5915_v30 }
 0x2bd   : > { %5995 = vmatpush1.msra.mxu1 %v5914_v43 }
 0x2be   : > { %v5903_v8 = vpop.permute.xlu0 %5902  ;;  %12339 = vmatmul.mubr.msk.f32.vlgmr.msra.gmra.mrb[2].mxu1 %vm637_vm0, %v12337_v20 }
 0x2bf   : > { %v5912_v16 = vsel %vm597_vm1, %v5903_v8, %v5905_v60  ;;  %6272 = vmatprep.mubr.f32.mxu1 %v14250_v58  ;;  %v8912_v8 = vrot.slane %v12438_v18, %v12992_v29 }
 0x2c0   : > { %5924 = vmatpush1.msra.mxu0 %v5912_v16 }
 0x2c1   : > { %12338 = vmatmul.mubr.msk.f32.vlgmr.msra.gmra.mrb[2].mxu0 %vm637_vm0, %v12337_v20  ;;  %v8908_v20 = vrot.slane %v12438_v18, %v12976_v23 }
 0x2c2   : > { %6201 = vmatprep.mubr.f32.mxu0 %v14250_v58 }
 0x2c6   : > { %v6119_v50 = vpop.permute.xlu1 %6118 }
 0x2ca   : > { %v6123_v57 = vpop.permute.xlu1 %6122  ;;  %v6121_v36 = vpop.permute.xlu0 %6120 }
 0x2cb   : > { %v6127_v11 = vsel %vm555_vm2, %v6119_v50, %v6121_v36  ;;  %v6128_v56 = vsel %vm555_vm2, %v6121_v36, %v6123_v57  ;;  %v8916_v36 = vrot.slane %v12438_v18, %v12971_v21 }
 0x2cc   : > { %6137 = vmatprep.subr.mxu0 %v6127_v11 }
 0x2ce   : > { %v6117_v7 = vpop.permute.xlu1 %6116  ;;  %v6125_v17 = vpop.permute.xlu0 %6124 }
 0x2cf   : > { %v6126_v38 = vsel %vm555_vm2, %v6117_v7, %v6119_v50  ;;  %v6129_v40 = vsel %vm555_vm2, %v6123_v57, %v6125_v17  ;;  %v8920_v57 = vrot.slane %v12438_v18, %v12990_v28 }
 0x2d0   : > { %6138 = vmatpush1.msra.mxu0 %v6126_v38  ;;  %6208 = vmatprep.subr.mxu1 %v6129_v40  ;;  %v12454_v38 = vld [vmem:[%s16087_s3 + $0x26] ss:$8 sm:$0xf] }
 0x2d1   : > { %12342 = vmatmul.mubr.msk.f32.vlgmr.msra.gmra.mrb[2].mxu0 %vm637_vm0, %v12341_v3  ;;  %6209 = vmatpush1.msra.mxu1 %v6128_v56  ;;  %v9323_v56 = vrot.slane %v12454_v38, %v12992_v29 }
 0x2d2   : > { %v14505_v31 = vpop.permute.xlu1 %6364  ;;  %12343 = vmatmul.mubr.msk.f32.vlgmr.msra.gmra.mrb[2].mxu1 %vm637_vm0, %v12341_v3  ;;  %6483 = vmatprep.mubr.f32.mxu0 %v14250_v58 }
 0x2d3   : > { %v6380_v4 = vmul.f32 %v14505_v31, %v14502_v41  ;;  %6554 = vmatprep.mubr.f32.mxu1 %v14250_v58  ;;  %v8257_v58 = vrot.slane %v12414_v19, %v12976_v23  ;;  %v9331_v19 = vrot.slane %v12454_v38, %v12990_v28 }
 0x2d5   : > { %6392 = vrot.lane.b32.xlu0 %v6380_v4, %s12855_s11  ;;  %v9319_v4 = vrot.slane %v12454_v38, %v12976_v23 }
 0x2d7   : > { %v14515_v54 = vpop.permute.xlu1 %6366 }
 0x2d9   : > { %8055 = vrot.lane.b32.xlu0 %v8044_v59, %s12856_s16 }
 0x2db   : > { %v14523_v62 = vpop.permute.xlu1 %6370 }
 0x2dd   : > { %8059 = vrot.lane.b32.xlu0 %v8052_v2, %s12856_s16 }
 0x2df   : > { %v14527_v34 = vpop.permute.xlu0 %6286  ;;  %v14529_v9 = vpop.permute.xlu1 %6326 }
 0x2e1   : > { %8270 = vrot.lane.b32.xlu0 %v8257_v58, %s12857_s21  ;;  %v9327_v58 = vrot.slane %v12454_v38, %v12971_v21 }
 0x2e3   : > { %v14533_v12 = vpop.permute.xlu0 %6368  ;;  %v14535_v35 = vpop.permute.xlu1 %6330 }
 0x2e5   : > { %8274 = vrot.lane.b32.xlu0 %v8265_v5, %s12857_s21  ;;  %v12462_v5 = vld [vmem:[%s16087_s3 + $0x27] ss:$8 sm:$0xf] }
 0x2e7   : > { %v14538_v63 = vpop.permute.xlu0 %6324  ;;  %v14540_v15 = vpop.permute.xlu1 %6753 }
 0x2e8   : > { %v6340_v25 = vmul.f32 %v14538_v63, %v14502_v41 }
 0x2ea   : > { %6566 = vrot.lane.b32.xlu1 %v6340_v25, %s12856_s16 }
 0x2eb   : > { %v14546_v14 = vpop.permute.xlu0 %6328 }
 0x2ec   : > { %v14548_v49 = vpop.permute.xlu1 %6757 }
 0x2ee   : > { %8272 = vrot.lane.b32.xlu1 %v8261_v51, %s12857_s21 }
 0x2ef   : > { %v14552_v61 = vpop.permute.xlu0 %6751 }
 0x2f0   : > { %v6767_v55 = vmul.f32 %v14552_v61, %v14502_v41  ;;  %v14559_v37 = vpop.permute.xlu1 %6970 }
 0x2f2   : > { %8276 = vrot.lane.b32.xlu1 %v8269_v32, %s12857_s21  ;;  %6779 = vrot.lane.b32.xlu0 %v6767_v55, %s12854_s26  ;;  %v9536_v32 = vrot.slane %v12462_v5, %v12976_v23  ;;  %v9544_v55 = vrot.slane %v12462_v5, %v12971_v21 }
 0x2f3   : > { %v14565_v46 = vpop.permute.xlu0 %6755 }
 0x2f4   : > { %v14567_v52 = vpop.permute.xlu1 %6974 }
 0x2f6   : > { %8487 = vrot.lane.b32.xlu1 %v8474_v42, %s12858_s25  ;;  %8489 = vrot.lane.b32.xlu0 %v8478_v1, %s12858_s25  ;;  %v9540_v42 = vrot.slane %v12462_v5, %v12992_v29 }
 0x2f7   : > { %v14573_v48 = vpop.permute.xlu0 %6968 }
 0x2f8   : > { %v14578_v45 = vpop.permute.xlu1 %7187  ;;  %v6984_v39 = vmul.f32 %v14573_v48, %v14502_v41 }
 0x2fa   : > { %8491 = vrot.lane.b32.xlu1 %v8482_v13, %s12858_s25  ;;  %8493 = vrot.lane.b32.xlu0 %v8486_v6, %s12858_s25  ;;  %v9548_v6 = vrot.slane %v12462_v5, %v12990_v28 }
 0x2fb   : > { %v14585_v33 = vpop.permute.xlu0 %6972 }
 0x2fc   : > { %v14587_v27 = vpop.permute.xlu1 %7191 }
 0x2fe   : > { %8704 = vrot.lane.b32.xlu0 %v8691_v44, %s12859_s12  ;;  %6996 = vrot.lane.b32.xlu1 %v6984_v39, %s12853_s23  ;;  %v9757_v39 = vrot.slane %v12470_v53, %v12992_v29  ;;  %v9753_v44 = vrot.slane %v12470_v53, %v12976_v23 }
 0x2ff   : > { %v14593_v22 = vpop.permute.xlu0 %7185 }
 0x300   : > { %v14595_v60 = vpop.permute.xlu1 %7404  ;;  %v7201_v24 = vmul.f32 %v14593_v22, %v14502_v41 }
 0x302   : > { %8706 = vrot.lane.b32.xlu1 %v8695_v26, %s12859_s12  ;;  %8708 = vrot.lane.b32.xlu0 %v8699_v10, %s12859_s12  ;;  %v9765_v26 = vrot.slane %v12470_v53, %v12990_v28  ;;  %v9761_v10 = vrot.slane %v12470_v53, %v12971_v21 }
 0x303   : > { %v14605_v30 = vpop.permute.xlu0 %7189 }
 0x304   : > { %v14607_v43 = vpop.permute.xlu1 %7408 }
 0x306   : > { %8710 = vrot.lane.b32.xlu1 %v8703_v47, %s12859_s12  ;;  %7213 = vrot.lane.b32.xlu0 %v7201_v24, %s12852_s20  ;;  %v12478_v47 = vld [vmem:[%s16087_s3 + $0x41] ss:$8 sm:$0xf] }
 0x307   : > { %v14613_v16 = vpop.permute.xlu0 %7402  ;;  %v9970_v24 = vrot.slane %v12478_v47, %v12976_v23  ;;  %v9978_v18 = vrot.slane %v12478_v47, %v12971_v21 }
 0x308   : > { %v14615_v50 = vpop.permute.xlu1 %7621  ;;  %v7418_v17 = vmul.f32 %v14613_v16, %v14502_v41 }
 0x30a   : > { %8921 = vrot.lane.b32.xlu1 %v8908_v20, %s12860_s18  ;;  %8923 = vrot.lane.b32.xlu0 %v8912_v8, %s12860_s18 }
 0x30b   : > { %v14621_v11 = vpop.permute.xlu0 %7406 }
 0x30c   : > { %v14623_v7 = vpop.permute.xlu1 %7625 }
 0x30e   : > { %8927 = vrot.lane.b32.xlu0 %v8920_v57, %s12860_s18  ;;  %8925 = vrot.lane.b32.xlu1 %v8916_v36, %s12860_s18 }
 0x30f   : > { %v14629_v3 = vpop.permute.xlu0 %7619 }
 0x310   : > { %v7635_v40 = vmul.f32 %v14629_v3, %v14502_v41  ;;  %v14640_v59 = vpop.permute.xlu1 %7838 }
 0x312   : > { %7647 = vrot.lane.b32.xlu0 %v7635_v40, %s12850_s14  ;;  %7430 = vrot.lane.b32.xlu1 %v7418_v17, %s12851_s13 }
 0x313   : > { %v14642_v2 = vpop.permute.xlu0 %7623 }
 0x314   : > { %v14653_v51 = vpop.permute.xlu1 %7842 }
 0x316   : > { %9334 = vrot.lane.b32.xlu0 %v9323_v56, %s12861_s29  ;;  %9332 = vrot.lane.b32.xlu1 %v9319_v4, %s12861_s29  ;;  %v9974_v56 = vrot.slane %v12478_v47, %v12992_v29  ;;  %v9982_v4 = vrot.slane %v12478_v47, %v12990_v28 }
 0x317   : > { %v14651_v25 = vpop.permute.xlu0 %7836 }
 0x318   : > { %v7852_v0 = vmul.f32 %v14651_v25, %v14502_v41  ;;  %v14664_v1 = vpop.permute.xlu1 %8053 }
 0x319   : > { %v8069_v13 = vmul.f32 %v14664_v1, %v14502_v41 }
 0x31a   : > { %9338 = vrot.lane.b32.xlu0 %v9331_v19, %s12861_s29  ;;  %9336 = vrot.lane.b32.xlu1 %v9327_v58, %s12861_s29  ;;  %v12486_v19 = vld [vmem:[%s16087_s3 + $0x42] ss:$8 sm:$0xf] }
 0x31b   : > { %v14691_v20 = vpop.permute.xlu0 %7840  ;;  %v10199_v47 = vrot.slane %v12486_v19, %v12990_v28 }
 0x31c   : > { %v14704_v40 = vpop.permute.xlu1 %8057 }
 0x31e   : > { %9549 = vrot.lane.b32.xlu0 %v9536_v32, %s16138_s15  ;;  %7864 = vrot.lane.b32.xlu1 %v7852_v0, %s12848_s19  ;;  %v10187_v32 = vrot.slane %v12486_v19, %v12976_v23 }
 0x322   : > { %9553 = vrot.lane.b32.xlu0 %v9544_v55, %s16138_s15  ;;  %9551 = vrot.lane.b32.xlu1 %v9540_v42, %s16138_s15  ;;  %v10195_v55 = vrot.slane %v12486_v19, %v12971_v21 }
 0x326   : > { %8081 = vrot.lane.b32.xlu0 %v8069_v13, %s12849_s10  ;;  %9555 = vrot.lane.b32.xlu1 %v9548_v6, %s16138_s15 }
 0x32a   : > { %9768 = vrot.lane.b32.xlu0 %v9757_v39, %s16139_s9  ;;  %9766 = vrot.lane.b32.xlu1 %v9753_v44, %s16139_s9  ;;  %v10191_v44 = vrot.slane %v12486_v19, %v12992_v29 }
 0x32e   : > { %9772 = vrot.lane.b32.xlu0 %v9765_v26, %s16139_s9  ;;  %9770 = vrot.lane.b32.xlu1 %v9761_v10, %s16139_s9 }
 0x332   : > { %9983 = vrot.lane.b32.xlu0 %v9970_v24, %s16140_s22 }
 0x336   : > { %9987 = vrot.lane.b32.xlu0 %v9978_v18, %s16140_s22 }
 0x347   : > { %v14693_v8 = vpop.permute.xlu0 %6392 }
 0x348   : > { %16141 = vst [vmem:[#allocation7_spill] sm:$0xff] %v14693_v8 }
 0x34b   : > { %v14695_v57 = vpop.permute.xlu0 %8055 }
 0x34f   : > { %v14697_v36 = vpop.permute.xlu0 %8059 }
 0x353   : > { %v14699_v17 = vpop.permute.xlu0 %8270 }
 0x354   : > { %v8286_v38 = vmul.f32 %v14699_v17, %v14502_v41 }
 0x356   : > { %8298 = vrot.lane.b32.xlu1 %v8286_v38, %s16140_s22  ;;  %v12494_v38 = vld [vmem:[%s16087_s3 + $0x43] ss:$8 sm:$0xf] }
 0x357   : > { %v14715_v5 = vpop.permute.xlu0 %8274 }
 0x35a   : > { %9985 = vrot.lane.b32.xlu1 %v9974_v56, %s16140_s22 }
 0x35c   : > { %v14712_v58 = vpop.permute.xlu1 %6566 }
 0x35d   : > { %16142 = vst [vmem:[#allocation8_spill] sm:$0xff] %v14712_v58 }
 0x35e   : > { %9989 = vrot.lane.b32.xlu1 %v9982_v4, %s16140_s22  ;;  %v10404_v4 = vrot.slane %v12494_v38, %v12976_v23 }
 0x360   : > { %v14718_v0 = vpop.permute.xlu1 %8272 }
 0x362   : > { %10200 = vrot.lane.b32.xlu1 %v10187_v32, %s12849_s10  ;;  %v10408_v32 = vrot.slane %v12494_v38, %v12992_v29 }
 0x364   : > { %v14722_v42 = vpop.permute.xlu1 %8276  ;;  %v14724_v13 = vpop.permute.xlu0 %6779 }
 0x365   : > { %16143 = vst [vmem:[#allocation9_spill] sm:$0xff] %v14724_v13 }
 0x366   : > { %10204 = vrot.lane.b32.xlu1 %v10195_v55, %s12849_s10 }
 0x368   : > { %v14727_v6 = vpop.permute.xlu1 %8487  ;;  %v14729_v53 = vpop.permute.xlu0 %8489 }
 0x369   : > { %v8503_v39 = vmul.f32 %v14727_v6, %v14502_v41 }
 0x36b   : > { %8515 = vrot.lane.b32.xlu0 %v8503_v39, %s16139_s9  ;;  %v10412_v39 = vrot.slane %v12494_v38, %v12971_v21 }
 0x36c   : > { %v14735_v26 = vpop.permute.xlu1 %8491  ;;  %v14737_v10 = vpop.permute.xlu0 %8493 }
 0x36f   : > { %10202 = vrot.lane.b32.xlu0 %v10191_v44, %s12849_s10  ;;  %v10416_v44 = vrot.slane %v12494_v38, %v12990_v28 }
 0x370   : > { %v14741_v24 = vpop.permute.xlu1 %6996  ;;  %v14743_v18 = vpop.permute.xlu0 %8704 }
 0x371   : > { %16144 = vst [vmem:[#allocation10_spill] sm:$0xff] %v14741_v24  ;;  %v8720_v56 = vmul.f32 %v14743_v18, %v14502_v41 }
 0x373   : > { %10206 = vrot.lane.b32.xlu0 %v10199_v47, %s12849_s10  ;;  %8732 = vrot.lane.b32.xlu1 %v8720_v56, %s16138_s15  ;;  %v12502_v47 = vld [vmem:[%s16087_s3 + $0x44] ss:$8 sm:$0xf] }
 0x374   : > { %v14754_v19 = vpop.permute.xlu1 %8706  ;;  %v14756_v55 = vpop.permute.xlu0 %8708  ;;  %v10625_v58 = vrot.slane %v12502_v47, %v12992_v29 }
 0x377   : > { %10417 = vrot.lane.b32.xlu0 %v10404_v4, %s12848_s19  ;;  %10419 = vrot.lane.b32.xlu1 %v10408_v32, %s12848_s19  ;;  %v10621_v4 = vrot.slane %v12502_v47, %v12976_v23 }
 0x378   : > { %v14762_v24 = vpop.permute.xlu1 %8710  ;;  %v14767_v56 = vpop.permute.xlu0 %7213 }
 0x379   : > { %16145 = vst [vmem:[#allocation11_spill] sm:$0xff] %v14767_v56  ;;  %v10629_v56 = vrot.slane %v12502_v47, %v12971_v21 }
 0x37b   : > { %10421 = vrot.lane.b32.xlu0 %v10412_v39, %s12848_s19  ;;  %10423 = vrot.lane.b32.xlu1 %v10416_v44, %s12848_s19  ;;  %v12510_v39 = vld [vmem:[%s16087_s3 + $0x45] ss:$8 sm:$0xf] }
 0x37c   : > { %v14772_v13 = vpop.permute.xlu1 %8921  ;;  %v14774_v32 = vpop.permute.xlu0 %8923 }
 0x37d   : > { %16146 = vst [vmem:[#allocation12_spill] sm:$0xff] %v14772_v13  ;;  %16147 = vst [vmem:[#allocation13_spill] sm:$0xff] %v14774_v32  ;;  %v8937_v38 = vmul.f32 %v14772_v13, %v14502_v41  ;;  %v10633_v41 = vrot.slane %v12502_v47, %v12990_v28  ;;  %v10846_v13 = vrot.slane %v12510_v39, %v12971_v21  ;;  %v14802_v47 = vld [vmem:[#allocation2 + $0x28] sm:$0xf] }
 0x37f   : > { %8949 = vrot.lane.b32.xlu0 %v8937_v38, %s12861_s29  ;;  %10634 = vrot.lane.b32.xlu1 %v10621_v4, %s12850_s14  ;;  %v10838_v38 = vrot.slane %v12510_v39, %v12976_v23  ;;  %v10842_v4 = vrot.slane %v12510_v39, %v12992_v29 }
 0x380   : > { %v14785_v44 = vpop.permute.xlu0 %8927 }
 0x381   : > { %16148 = vst [vmem:[#allocation14_spill] sm:$0xff] %v14785_v44 }
 0x383   : > { %10636 = vrot.lane.b32.xlu0 %v10625_v58, %s12850_s14  ;;  %10638 = vrot.lane.b32.xlu1 %v10629_v56, %s12850_s14  ;;  %v10850_v58 = vrot.slane %v12510_v39, %v12990_v28 }
 0x384   : > { %v14791_v8 = vpop.permute.xlu0 %7647 }
 0x385   : > { %16149 = vst [vmem:[#allocation15_spill] sm:$0xff] %v14791_v8 }
 0x387   : > { %10640 = vrot.lane.b32.xlu0 %v10633_v41, %s12850_s14  ;;  %10851 = vrot.lane.b32.xlu1 %v10838_v38, %s12851_s13 }
 0x388   : > { %v14797_v32 = vpop.permute.xlu0 %9334 }
 0x389   : > { %16150 = vst [vmem:[#allocation16_spill] sm:$0xff] %v14797_v32 }
 0x38b   : > { %10853 = vrot.lane.b32.xlu0 %v10842_v4, %s12851_s13  ;;  %10855 = vrot.lane.b32.xlu1 %v10846_v13, %s12851_s13 }
 0x38c   : > { %v14804_v56 = vpop.permute.xlu0 %9338 }
 0x38d   : > { %v9352_v41 = vmul.f32 %v14804_v56, %v14802_v47 }
 0x38f   : > { %10857 = vrot.lane.b32.xlu0 %v10850_v58, %s12851_s13 }
 0x393   : > { %9368 = vrot.lane.b32.xlu0 %v9352_v41, %s12860_s18  ;;  %v14814_v41 = vpop.permute.xlu1 %8925 }
 0x3a4   : > { %v6203_v38 = vpop.f32.mrb[2].mxu0 }
 0x3a5   : > { %v6289_v8 = vadd.f32 %v14527_v34, %v6203_v38  ;;  %v6205_v21 = vpop.f32.mrb[3].mxu0  ;;  %v6274_v4 = vpop.f32.mrb[2].mxu1  ;;  %v6372_v38 = vsel %vm597_vm1, %v14505_v31, %v14515_v54  ;;  %v6374_v31 = vsel %vm597_vm1, %v14533_v12, %v14523_v62 }
 0x3a6   : > { %v6290_v13 = vadd.f32 %v14527_v34, %v6205_v21  ;;  %v6291_v39 = vadd.f32 %v14527_v34, %v6274_v4  ;;  %v6276_v23 = vpop.f32.mrb[3].mxu1  ;;  %v6332_v21 = vsel %vm555_vm2, %v14538_v63, %v14529_v9  ;;  %v6334_v63 = vsel %vm555_vm2, %v14546_v14, %v14535_v35 }
 0x3a7   : > { %v6293_v28 = vmax.f32 %v6289_v8, 0.0  ;;  %v6292_v29 = vadd.f32 %v14527_v34, %v6276_v23  ;;  %v14828_v34 = vpop.permute.xlu1 %7430  ;;  %v6759_v4 = vsel %vm979_vm3, %v14552_v61, %v14540_v15  ;;  %v6978_v61 = vsel %vm1195_vm4, %v14585_v33, %v14567_v52 }
 0x3a8   : > { %v6294_v32 = vmax.f32 %v6290_v13, 0.0  ;;  %v6295_v58 = vmax.f32 %v6291_v39, 0.0  ;;  %16151 = vst [vmem:[#allocation17_spill] sm:$0xff] %v14828_v34  ;;  %v6976_v13 = vsel %vm1195_vm4, %v14573_v48, %v14559_v37 }
 0x3a9   : > { %6297 = vst [vmem:[#allocation2 + $0x8] sm:$0xf] %v6293_v28  ;;  %v6296_v44 = vmax.f32 %v6292_v29, 0.0 }
 0x3aa   : > { %6298 = vst [vmem:[#allocation2 + $0x10] sm:$0xf] %v6294_v32  ;;  %6299 = vst [vmem:[#allocation2 + $0x18] sm:$0xf] %v6295_v58 }
 0x3ab   : > { %6300 = vst [vmem:[#allocation2 + $0x20] sm:$0xf] %v6296_v44  ;;  %v14848_v39 = vpop.permute.xlu1 %9332 }
 0x3b0   : > { %v14822_v8 = vld [vmem:[#allocation2 + $0x8] sm:$0xf] }
 0x3b1   : > { %v6341_v23 = vmul.f32 %v6332_v21, %v14822_v8  ;;  %v6381_v28 = vmul.f32 %v6372_v38, %v14822_v8  ;;  %v14826_v29 = vld [vmem:[#allocation2 + $0x18] sm:$0xf]  ;;  %v6985_v58 = vmul.f32 %v6976_v13, %v14822_v8  ;;  %v6768_v38 = vmul.f32 %v6759_v4, %v14822_v8 }
 0x3b2   : > { %v6343_v32 = vmul.f32 %v6334_v63, %v14826_v29  ;;  %v6383_v44 = vmul.f32 %v6374_v31, %v14826_v29  ;;  %v6761_v21 = vsel %vm979_vm3, %v14565_v46, %v14548_v49  ;;  %v6987_v48 = vmul.f32 %v6978_v61, %v14826_v29  ;;  %v14864_v31 = vpop.permute.xlu0 %9549 }
 0x3b3   : > { %6568 = vrot.lane.b32.xlu1 %v6341_v23, %s12856_s16  ;;  %6394 = vrot.lane.b32.xlu0 %v6381_v28, %s12855_s11  ;;  %v6770_v23 = vmul.f32 %v6761_v21, %v14826_v29  ;;  %v14862_v28 = vpop.permute.xlu1 %9336  ;;  %v7193_v63 = vsel %vm1411_vm5, %v14593_v22, %v14578_v45  ;;  %v7195_v13 = vsel %vm1411_vm5, %v14605_v30, %v14587_v27 }
 0x3b4   : > { %v7202_v4 = vmul.f32 %v7193_v63, %v14822_v8  ;;  %v7412_v22 = vsel %vm1226_vm6, %v14621_v11, %v14607_v43  ;;  %v7204_v21 = vmul.f32 %v7195_v13, %v14826_v29  ;;  %v7627_v61 = vsel %vm1010_vm7, %v14629_v3, %v14615_v50 }
 0x3b5   : > { %v7636_v63 = vmul.f32 %v7627_v61, %v14822_v8  ;;  %v7629_v3 = vsel %vm1010_vm7, %v14642_v2, %v14623_v7 }
 0x3b6   : > { %v7638_v13 = vmul.f32 %v7629_v3, %v14826_v29 }
 0x3b7   : > { %6572 = vrot.lane.b32.xlu1 %v6343_v32, %s12856_s16  ;;  %6398 = vrot.lane.b32.xlu0 %v6383_v44, %s12855_s11  ;;  %v7410_v32 = vsel %vm1226_vm6, %v14613_v16, %v14595_v60  ;;  %v7421_v16 = vmul.f32 %v7412_v22, %v14826_v29  ;;  %v8061_v22 = vsel %vm16154_vm15, %v14664_v1, %v14695_v57  ;;  %vm16165_vm15 = vcmask 7168  }
 0x3b8   : > { %v7419_v44 = vmul.f32 %v7410_v32, %v14822_v8  ;;  %v8063_v1 = vsel %vm16132_vm9, %v14704_v40, %v14697_v36  ;;  %vm16173_vm9 = vcmask 56320  }
 0x3b9   : > { %v8072_v3 = vmul.f32 %v8063_v1, %v14826_v29 }
 0x3bb   : > { %6998 = vrot.lane.b32.xlu1 %v6985_v58, %s12853_s23  ;;  %6781 = vrot.lane.b32.xlu0 %v6768_v38, %s12854_s26  ;;  %v14884_v58 = vpop.permute.xlu1 %7864  ;;  %v14886_v38 = vpop.permute.xlu0 %9553 }
 0x3bc   : > { %16152 = vst [vmem:[#allocation18_spill] sm:$0xff] %v14884_v58 }
 0x3bf   : > { %7002 = vrot.lane.b32.xlu1 %v6987_v48, %s12853_s23  ;;  %6785 = vrot.lane.b32.xlu0 %v6770_v23, %s12854_s26  ;;  %v7844_v48 = vsel %vm628_vm8, %v14651_v25, %v14640_v59  ;;  %v14900_v32 = vpop.permute.xlu1 %9551  ;;  %v7846_v25 = vsel %vm628_vm8, %v14691_v20, %v14653_v51 }
 0x3c0   : > { %v7853_v23 = vmul.f32 %v7844_v48, %v14822_v8 }
 0x3c3   : > { %7432 = vrot.lane.b32.xlu1 %v7419_v44, %s12851_s13  ;;  %7215 = vrot.lane.b32.xlu0 %v7202_v4, %s12852_s20  ;;  %v14902_v44 = vpop.permute.xlu0 %8081  ;;  %v7855_v4 = vmul.f32 %v7846_v25, %v14826_v29 }
 0x3c4   : > { %16153 = vst [vmem:[#allocation19_spill] sm:$0xff] %v14902_v44 }
 0x3c7   : > { %7436 = vrot.lane.b32.xlu1 %v7421_v16, %s12851_s13  ;;  %7219 = vrot.lane.b32.xlu0 %v7204_v21, %s12852_s20  ;;  %v8278_v16 = vsel %vm2482_vm10, %v14699_v17, %v14718_v0  ;;  %v14922_v21 = vpop.permute.xlu1 %9555  ;;  %v14924_v61 = vpop.permute.xlu0 %9768  ;;  %v8280_v17 = vsel %vm2482_vm10, %v14715_v5, %v14722_v42 }
 0x3c8   : > { %v8287_v48 = vmul.f32 %v8278_v16, %v14822_v8 }
 0x3cb   : > { %7866 = vrot.lane.b32.xlu1 %v7853_v23, %s12848_s19  ;;  %7649 = vrot.lane.b32.xlu0 %v7636_v63, %s12850_s14  ;;  %v8070_v23 = vmul.f32 %v8061_v22, %v14822_v8  ;;  %v8289_v63 = vmul.f32 %v8280_v17, %v14826_v29  ;;  %v14938_v25 = vpop.permute.xlu1 %9766  ;;  %v8712_v22 = vsel %vm2913_vm12, %v14743_v18, %v14754_v19 }
 0x3cc   : > { %v8721_v16 = vmul.f32 %v8712_v22, %v14822_v8  ;;  %v16157_v22 = vld [vmem:[#allocation12_spill] sm:$0xff] }
 0x3cf   : > { %7870 = vrot.lane.b32.xlu1 %v7855_v4, %s12848_s19  ;;  %7653 = vrot.lane.b32.xlu0 %v7638_v13, %s12850_s14  ;;  %v14940_v4 = vpop.permute.xlu0 %9772  ;;  %v8495_v13 = vsel %vm2698_vm11, %v14727_v6, %v14729_v53  ;;  %v8714_v6 = vsel %vm2913_vm12, %v14756_v55, %v14762_v24  ;;  %v14960_v1 = vpop.permute.xlu1 %9770 }
 0x3d0   : > { %v8723_v18 = vmul.f32 %v8714_v6, %v14826_v29 }
 0x3d3   : > { %8300 = vrot.lane.b32.xlu1 %v8287_v48, %s16140_s22  ;;  %8083 = vrot.lane.b32.xlu0 %v8070_v23, %s12849_s10  ;;  %v8504_v48 = vmul.f32 %v8495_v13, %v14822_v8  ;;  %v8497_v23 = vsel %vm2698_vm11, %v14735_v26, %v14737_v10  ;;  %v14962_v17 = vpop.permute.xlu0 %9983  ;;  %v16156_v13 = vld [vmem:[#allocation13_spill] sm:$0xff] }
 0x3d4   : > { %16155 = vst [vmem:[#allocation20_spill] sm:$0xff] %v14962_v17 }
 0x3d7   : > { %8304 = vrot.lane.b32.xlu1 %v8289_v63, %s16140_s22  ;;  %8087 = vrot.lane.b32.xlu0 %v8072_v3, %s12849_s10  ;;  %v8506_v63 = vmul.f32 %v8497_v23, %v14826_v29  ;;  %v14966_v3 = vld [vmem:[#allocation2 + $0x8] sm:$0xf]  ;;  %v14975_v44 = vpop.permute.xlu0 %9987  ;;  %v14980_v23 = vld [vmem:[#allocation2 + $0x10] sm:$0xf] }
 0x3d8   : > { %16160 = vst [vmem:[#allocation12_spill] sm:$0xff] %v14975_v44  ;;  %v9348_v58 = vmul.f32 %v14848_v39, %v14966_v3  ;;  %v14997_v44 = vld [vmem:[#allocation2 + $0x18] sm:$0xf] }
 0x3db   : > { %8734 = vrot.lane.b32.xlu1 %v8721_v16, %s16138_s15  ;;  %8517 = vrot.lane.b32.xlu0 %v8504_v48, %s16139_s9  ;;  %v8929_v16 = vsel %vm16158_vm13, %v16157_v22, %v16156_v13  ;;  %v14973_v48 = vpop.permute.xlu1 %8298  ;;  %vm16177_vm13 = vcmask 596992  }
 0x3dc   : > { %16159 = vst [vmem:[#allocation13_spill] sm:$0xff] %v14973_v48  ;;  %v8938_v6 = vmul.f32 %v8929_v16, %v14822_v8  ;;  %v16164_v16 = vld [vmem:[#allocation16_spill] sm:$0xff] }
 0x3dd   : > { %v14990_v48 = vpop.permute.xlu0 %8515 }
 0x3df   : > { %8738 = vrot.lane.b32.xlu1 %v8723_v18, %s16138_s15  ;;  %8521 = vrot.lane.b32.xlu0 %v8506_v63, %s16139_s9  ;;  %v6373_v18 = vsel %vm597_vm1, %v14515_v54, %v14533_v12  ;;  %v16161_v63 = vld [vmem:[#allocation14_spill] sm:$0xff]  ;;  %v15001_v17 = vpop.permute.xlu1 %9985 }
 0x3e0   : > { %v8931_v22 = vsel %vm16162_vm14, %v14814_v41, %v16161_v63  ;;  %16163 = vst [vmem:[#allocation14_spill] sm:$0xff] %v14990_v48  ;;  %v6382_v34 = vmul.f32 %v6373_v18, %v14980_v23  ;;  %16167 = vst [vmem:[#allocation21_spill] sm:$0xff] %v15001_v17  ;;  %v12518_v54 = vld [vmem:[%s16087_s3 + $0x46] ss:$8 sm:$0xf] }
 0x3e1   : > { %v8940_v8 = vmul.f32 %v8931_v22, %v14826_v29  ;;  %v15011_v18 = vpop.permute.xlu0 %10202  ;;  %v16169_v22 = vld [vmem:[#allocation6_spill] sm:$0xff]  ;;  %vm16179_vm14 = vmmov %vm16173_vm9 }
 0x3e2   : > { %16168 = vst [vmem:[#allocation22_spill] sm:$0xff] %v15011_v18  ;;  %v11059_v48 = vrot.slane %v12518_v54, %v16169_v22 }
 0x3e3   : > { %9360 = vrot.lane.b32.xlu1 %v9348_v58, %s12860_s18  ;;  %8951 = vrot.lane.b32.xlu0 %v8938_v6, %s12861_s29  ;;  %v9341_v58 = vsel %vm16165_vm15, %v16164_v16, %v14862_v28  ;;  %v14999_v6 = vld [vmem:[#allocation2 + $0x20] sm:$0xf]  ;;  %vm16180_vm15 = vcmask 1039360  }
 0x3e4   : > { %16166 = vst [vmem:[#allocation16_spill] sm:$0xff] %v14999_v6  ;;  %v6384_v12 = vmul.f32 %v14523_v62, %v14999_v6  ;;  %v9350_v29 = vmul.f32 %v9341_v58, %v14997_v44  ;;  %v16171_v62 = vld [vmem:[#allocation5_spill] sm:$0xff] }
 0x3e5   : > { %v11067_v58 = vrot.slane %v12518_v54, %v16171_v62  ;;  %v15025_v18 = vpop.permute.xlu0 %10206 }
 0x3e6   : > { %16172 = vst [vmem:[#allocation5_spill] sm:$0xff] %v15025_v18 }
 0x3e7   : > { %6396 = vrot.lane.b32.xlu1 %v6382_v34, %s12855_s11  ;;  %8955 = vrot.lane.b32.xlu0 %v8940_v8, %s12861_s29  ;;  %v6333_v34 = vsel %vm555_vm2, %v14529_v9, %v14546_v14  ;;  %v15019_v8 = vpop.permute.xlu1 %9989  ;;  %v16174_v14 = vld [vmem:[#allocation4_spill] sm:$0xff] }
 0x3e8   : > { %16170 = vst [vmem:[#allocation6_spill] sm:$0xff] %v15019_v8  ;;  %v6342_v17 = vmul.f32 %v6333_v34, %v14980_v23 }
 0x3e9   : > { %v15040_v18 = vpop.permute.xlu0 %10417 }
 0x3ea   : > { %16175 = vst [vmem:[#allocation4_spill] sm:$0xff] %v15040_v18 }
 0x3eb   : > { %6400 = vrot.lane.b32.xlu1 %v6384_v12, %s12855_s11  ;;  %9364 = vrot.lane.b32.xlu0 %v9350_v29, %s12860_s18  ;;  %v6344_v12 = vmul.f32 %v14535_v35, %v14999_v6  ;;  %v9558_v29 = vsel %vm16173_vm9, %v14900_v32, %v14886_v38  ;;  %v15032_v9 = vpop.permute.xlu1 %10200  ;;  %v16176_v35 = vld [vmem:[#allocation3_spill] sm:$0xff] }
 0x3ec   : > { %v11063_v8 = vrot.slane %v12518_v54, %v16176_v35 }
 0x3ef   : > { %11070 = vrot.lane.b32.xlu1 %v11059_v48, %s12852_s20  ;;  %6570 = vrot.lane.b32.xlu0 %v6342_v17, %s12856_s16  ;;  %v11055_v48 = vrot.slane %v12518_v54, %v16174_v14  ;;  %v9567_v17 = vmul.f32 %v9558_v29, %v14997_v44  ;;  %v15038_v34 = vpop.permute.xlu1 %10204  ;;  %v6977_v29 = vsel %vm1195_vm4, %v14559_v37, %v14585_v33 }
 0x3f0   : > { %v6986_v54 = vmul.f32 %v6977_v29, %v14980_v23 }
 0x3f3   : > { %11074 = vrot.lane.b32.xlu1 %v11067_v58, %s12852_s20  ;;  %6574 = vrot.lane.b32.xlu0 %v6344_v12, %s12856_s16  ;;  %v6760_v58 = vsel %vm979_vm3, %v14540_v15, %v14565_v46  ;;  %v15054_v18 = vpop.permute.xlu1 %8732  ;;  %v9569_v15 = vmul.f32 %v14922_v21, %v14802_v47  ;;  %v6988_v46 = vmul.f32 %v14567_v52, %v14999_v6 }
 0x3f4   : > { %v6769_v12 = vmul.f32 %v6760_v58, %v14980_v23 }
 0x3f7   : > { %11068 = vrot.lane.b32.xlu0 %v11055_v48, %s12852_s20  ;;  %9581 = vrot.lane.b32.xlu1 %v9567_v17, %s12859_s12  ;;  %v15056_v48 = vpop.permute.xlu0 %10421  ;;  %v6771_v17 = vmul.f32 %v14548_v49, %v14999_v6  ;;  %v15067_v37 = vpop.permute.xlu1 %10419  ;;  %v7194_v49 = vsel %vm1411_vm5, %v14578_v45, %v14605_v30  ;;  %v7205_v45 = vmul.f32 %v14587_v27, %v14999_v6 }
 0x3f8   : > { %v7203_v52 = vmul.f32 %v7194_v49, %v14980_v23  ;;  %v7845_v30 = vsel %vm628_vm8, %v14640_v59, %v14691_v20  ;;  %v7856_v27 = vmul.f32 %v14653_v51, %v14999_v6  ;;  %v8062_v59 = vsel %vm16177_vm13, %v14695_v57, %v14704_v40 }
 0x3f9   : > { %v8290_v49 = vmul.f32 %v14722_v42, %v14999_v6  ;;  %v8073_v57 = vmul.f32 %v14697_v36, %v14999_v6  ;;  %vm16181_vm13 = vcmask 7168  }
 0x3fb   : > { %11072 = vrot.lane.b32.xlu0 %v11063_v8, %s12852_s20  ;;  %6783 = vrot.lane.b32.xlu1 %v6769_v12, %s12854_s26  ;;  %v15069_v33 = vpop.permute.xlu0 %8949  ;;  %v7411_v8 = vsel %vm1226_vm6, %v14595_v60, %v14621_v11  ;;  %v15083_v12 = vpop.permute.xlu1 %10423  ;;  %v7628_v60 = vsel %vm1010_vm7, %v14615_v50, %v14642_v2  ;;  %v7854_v11 = vmul.f32 %v7845_v30, %v14980_v23  ;;  %v15171_v30 = vld [vmem:[#allocation2 + $0x20] sm:$0xf] }
 0x3fc   : > { %v7420_v58 = vmul.f32 %v7411_v8, %v14980_v23  ;;  %v7639_v50 = vmul.f32 %v14623_v7, %v14999_v6  ;;  %v8279_v2 = vsel %vm2482_vm10, %v14718_v0, %v14715_v5  ;;  %v8071_v7 = vmul.f32 %v8062_v59, %v14980_v23 }
 0x3fd   : > { %v8288_v51 = vmul.f32 %v8279_v2, %v14980_v23  ;;  %v8496_v0 = vsel %vm2698_vm11, %v14729_v53, %v14735_v26  ;;  %v8713_v8 = vsel %vm2913_vm12, %v14754_v19, %v14756_v55  ;;  %v8507_v53 = vmul.f32 %v14737_v10, %v14999_v6  ;;  %v15158_v19 = vld [vmem:[#allocation2 + $0x10] sm:$0xf] }
 0x3fe   : > { %v8722_v42 = vmul.f32 %v8713_v8, %v14980_v23  ;;  %v8505_v36 = vmul.f32 %v8496_v0, %v14980_v23  ;;  %v9557_v26 = vsel %vm16179_vm14, %v14864_v31, %v14900_v32  ;;  %v8930_v55 = vsel %vm16180_vm15, %v16156_v13, %v14814_v41  ;;  %vm16182_vm14 = vmmov %vm16181_vm13 }
 0x3ff   : > { %7000 = vrot.lane.b32.xlu0 %v6986_v54, %s12853_s23  ;;  %6787 = vrot.lane.b32.xlu1 %v6771_v17, %s12854_s26  ;;  %v15085_v29 = vpop.permute.xlu0 %10636  ;;  %v7422_v54 = vmul.f32 %v14607_v43, %v14999_v6  ;;  %v7637_v17 = vmul.f32 %v7628_v60, %v14980_v23  ;;  %v15101_v43 = vpop.permute.xlu1 %10634  ;;  %v9566_v10 = vmul.f32 %v9557_v26, %v15158_v19  ;;  %vm16185_vm15 = vcmask 72704  }
 0x400   : > { %v8939_v60 = vmul.f32 %v8930_v55, %v14980_v23  ;;  %v9559_v32 = vsel %vm16173_vm9, %v14886_v38, %v14922_v21  ;;  %v12526_v38 = vld [vmem:[%s16087_s3 + $0x47] ss:$8 sm:$0xf]  ;;  %v9565_v59 = vmul.f32 %v14864_v31, %v14966_v3  ;;  %v9786_v55 = vmul.f32 %v14940_v4, %v14802_v47  ;;  %vm16188_vm9 = vmmov %vm16185_vm15 }
 0x401   : > { %v9568_v41 = vmul.f32 %v9559_v32, %v15171_v30  ;;  %v11272_v31 = vrot.slane %v12526_v38, %v16174_v14  ;;  %v11280_v0 = vrot.slane %v12526_v38, %v16176_v35 }
 0x403   : > { %7004 = vrot.lane.b32.xlu0 %v6988_v46, %s12853_s23  ;;  %9585 = vrot.lane.b32.xlu1 %v9569_v15, %s12859_s12  ;;  %v15103_v15 = vpop.permute.xlu0 %10640  ;;  %v15119_v20 = vpop.permute.xlu1 %10638 }
 0x407   : > { %7434 = vrot.lane.b32.xlu0 %v7420_v58, %s12851_s13  ;;  %7217 = vrot.lane.b32.xlu1 %v7203_v52, %s12852_s20  ;;  %v15121_v46 = vpop.permute.xlu0 %10853  ;;  %v15131_v40 = vpop.permute.xlu1 %10851 }
 0x40b   : > { %7438 = vrot.lane.b32.xlu0 %v7422_v54, %s12851_s13  ;;  %7221 = vrot.lane.b32.xlu1 %v7205_v45, %s12852_s20  ;;  %v15133_v5 = vpop.permute.xlu0 %10857  ;;  %v15149_v52 = vpop.permute.xlu1 %10855  ;;  %v8724_v54 = vmul.f32 %v14762_v24, %v14999_v6 }
 0x40f   : > { %7868 = vrot.lane.b32.xlu0 %v7854_v11, %s12848_s19  ;;  %7651 = vrot.lane.b32.xlu1 %v7637_v17, %s12850_s14  ;;  %v15147_v58 = vpop.permute.xlu0 %9368  ;;  %v8941_v17 = vmul.f32 %v16161_v63, %v14999_v6 }
 0x410   : > { %16178 = vst [vmem:[#allocation3_spill] sm:$0xff] %v15147_v58 }
 0x413   : > { %7872 = vrot.lane.b32.xlu0 %v7856_v27, %s12848_s19  ;;  %7655 = vrot.lane.b32.xlu1 %v7639_v50, %s12850_s14  ;;  %v9340_v27 = vsel %vm16181_vm13, %v14848_v39, %v16164_v16  ;;  %v9342_v39 = vsel %vm16182_vm14, %v14862_v28, %v14804_v56  ;;  %v11276_v16 = vrot.slane %v12526_v38, %v16169_v22  ;;  %vm16189_vm13 = vmmov %vm16188_vm9  ;;  %vm6410_vm14 = vcmask 1043456  }
 0x414   : > { %v9349_v63 = vmul.f32 %v9340_v27, %v15158_v19  ;;  %v11284_v56 = vrot.slane %v12526_v38, %v16171_v62 }
 0x417   : > { %8302 = vrot.lane.b32.xlu0 %v8288_v51, %s16140_s22  ;;  %8085 = vrot.lane.b32.xlu1 %v8071_v7, %s12849_s10  ;;  %v9351_v7 = vmul.f32 %v9342_v39, %v15171_v30  ;;  %v16184_v39 = vld [vmem:[#allocation20_spill] sm:$0xff] }
 0x41b   : > { %8306 = vrot.lane.b32.xlu0 %v8290_v49, %s16140_s22  ;;  %8089 = vrot.lane.b32.xlu1 %v8073_v57, %s12849_s10  ;;  %v9775_v57 = vsel %vm637_vm0, %v14924_v61, %v14960_v1 }
 0x41c   : > { %v9784_v8 = vmul.f32 %v9775_v57, %v14997_v44 }
 0x41f   : > { %8736 = vrot.lane.b32.xlu0 %v8722_v42, %s16138_s15  ;;  %8519 = vrot.lane.b32.xlu1 %v8505_v36, %s16139_s9 }
 0x423   : > { %8740 = vrot.lane.b32.xlu0 %v8724_v54, %s16138_s15  ;;  %8523 = vrot.lane.b32.xlu1 %v8507_v53, %s16139_s9  ;;  %v9774_v54 = vsel %vm637_vm0, %v14938_v25, %v14924_v61  ;;  %v12534_v53 = vld [vmem:[%s16087_s3 + $0x60] ss:$8 sm:$0xf]  ;;  %v9776_v61 = vsel %vm637_vm0, %v14960_v1, %v14940_v4  ;;  %v9782_v4 = vmul.f32 %v14938_v25, %v14966_v3  ;;  %s16236_s15 = sshll.u32 %s16238_s28, 4 }
 0x424   : > { %v9783_v26 = vmul.f32 %v9774_v54, %v15158_v19  ;;  %v11489_v32 = vrot.slane %v12534_v53, %v16174_v14  ;;  %v11497_v38 = vrot.slane %v12534_v53, %v16176_v35  ;;  %v16186_v25 = vld [vmem:[#allocation6_spill] sm:$0xff]  ;;  %v11501_v54 = vrot.slane %v12534_v53, %v16171_v62 }
 0x425   : > { %v15165_v45 = vpop.permute.xlu1 %6568  ;;  %v15167_v24 = vpop.permute.xlu0 %6394 }
 0x427   : > { %9579 = vrot.lane.b32.xlu0 %v9566_v10, %s12859_s12  ;;  %8953 = vrot.lane.b32.xlu1 %v8939_v60, %s12861_s29 }
 0x429   : > { %v15179_v13 = vpop.permute.xlu1 %6572  ;;  %v15181_v11 = vpop.permute.xlu0 %6398 }
 0x42b   : > { %9583 = vrot.lane.b32.xlu0 %v9568_v41, %s12859_s12  ;;  %8957 = vrot.lane.b32.xlu1 %v8941_v17, %s12861_s29  ;;  %v9785_v41 = vmul.f32 %v9776_v61, %v15171_v30 }
 0x42d   : > { %v15193_v21 = vpop.permute.xlu1 %6998  ;;  %v15195_v50 = vpop.permute.xlu0 %6781 }
 0x42f   : > { %9577 = vrot.lane.b32.xlu0 %v9565_v59, %s12859_s12  ;;  %9362 = vrot.lane.b32.xlu1 %v9349_v63, %s12860_s18  ;;  %v16183_v63 = vld [vmem:[#allocation21_spill] sm:$0xff] }
 0x431   : > { %v15206_v2 = vpop.permute.xlu1 %7002  ;;  %v15208_v51 = vpop.permute.xlu0 %6785 }
 0x433   : > { %11287 = vrot.lane.b32.xlu0 %v11276_v16, %s12853_s23  ;;  %9366 = vrot.lane.b32.xlu1 %v9351_v7, %s12860_s18  ;;  %v9991_v16 = vsel %vm16185_vm15, %v16184_v39, %v16183_v63  ;;  %v11493_v7 = vrot.slane %v12534_v53, %v16169_v22  ;;  %v9999_v53 = vmul.f32 %v16184_v39, %v14966_v3  ;;  %vm6406_vm15 = vcmask 31744  }
 0x435   : > { %v15215_v28 = vpop.permute.xlu1 %7432  ;;  %v15217_v49 = vpop.permute.xlu0 %7215 }
 0x437   : > { %11285 = vrot.lane.b32.xlu1 %v11272_v31, %s12853_s23  ;;  %11291 = vrot.lane.b32.xlu0 %v11284_v56, %s12853_s23  ;;  %v10000_v31 = vmul.f32 %v9991_v16, %v15158_v19 }
 0x439   : > { %v15226_v42 = vpop.permute.xlu1 %7436  ;;  %v15228_v36 = vpop.permute.xlu0 %7219 }
 0x43b   : > { %11289 = vrot.lane.b32.xlu1 %v11280_v0, %s12853_s23  ;;  %9798 = vrot.lane.b32.xlu0 %v9784_v8, %s12858_s25  ;;  %v16187_v0 = vld [vmem:[#allocation12_spill] sm:$0xff] }
 0x43c   : > { %v9993_v8 = vsel %vm16188_vm9, %v16187_v0, %v16186_v25  ;;  %vm16195_vm9 = vcmask 596992  }
 0x43d   : > { %v15241_v10 = vpop.permute.xlu1 %7866  ;;  %v15243_v60 = vpop.permute.xlu0 %7649 }
 0x43f   : > { %9796 = vrot.lane.b32.xlu1 %v9783_v26, %s12858_s25  ;;  %9802 = vrot.lane.b32.xlu0 %v9786_v55, %s12858_s25  ;;  %v10002_v26 = vmul.f32 %v9993_v8, %v15171_v30 }
 0x441   : > { %v15252_v17 = vpop.permute.xlu1 %7870  ;;  %v15254_v27 = vpop.permute.xlu0 %7653 }
 0x443   : > { %9800 = vrot.lane.b32.xlu1 %v9785_v41, %s12858_s25  ;;  %11502 = vrot.lane.b32.xlu0 %v11489_v32, %s12854_s26  ;;  %v9992_v32 = vsel %vm16189_vm13, %v16183_v63, %v16187_v0  ;;  %v12542_v41 = vld [vmem:[%s16087_s3 + $0x61] ss:$8 sm:$0xf]  ;;  %vm16197_vm13 = vmmov %vm16195_vm9 }
 0x444   : > { %v11710_v63 = vrot.slane %v12542_v41, %v16169_v22  ;;  %v11706_v39 = vrot.slane %v12542_v41, %v16174_v14  ;;  %v11718_v8 = vrot.slane %v12542_v41, %v16171_v62 }
 0x445   : > { %v15261_v1 = vpop.permute.xlu1 %8300  ;;  %v15263_v59 = vpop.permute.xlu0 %8083 }
 0x447   : > { %9794 = vrot.lane.b32.xlu1 %v9782_v4, %s12858_s25  ;;  %11506 = vrot.lane.b32.xlu0 %v11497_v38, %s12854_s26  ;;  %v10001_v38 = vmul.f32 %v9992_v32, %v14997_v44  ;;  %v16191_v32 = vld [vmem:[#allocation22_spill] sm:$0xff] }
 0x449   : > { %v15272_v56 = vpop.permute.xlu1 %8304  ;;  %v15274_v57 = vpop.permute.xlu0 %8087 }
 0x44b   : > { %11504 = vrot.lane.b32.xlu1 %v11493_v7, %s12854_s26  ;;  %10013 = vrot.lane.b32.xlu0 %v10000_v31, %s12857_s21  ;;  %v10003_v7 = vmul.f32 %v16186_v25, %v14802_v47  ;;  %v10209_v25 = vsel %vm555_vm2, %v16191_v32, %v15038_v34 }
 0x44c   : > { %v10218_v58 = vmul.f32 %v10209_v25, %v14997_v44  ;;  %v15350_v25 = vld [vmem:[#allocation2] sm:$0xff] }
 0x44d   : > { %v15283_v55 = vpop.permute.xlu1 %8734  ;;  %v15285_v61 = vpop.permute.xlu0 %8517 }
 0x44f   : > { %11508 = vrot.lane.b32.xlu1 %v11501_v54, %s12854_s26  ;;  %10017 = vrot.lane.b32.xlu0 %v10002_v26, %s12857_s21 }
 0x451   : > { %v15298_v4 = vpop.permute.xlu1 %8738  ;;  %v15300_v16 = vpop.permute.xlu0 %8521 }
 0x453   : > { %10015 = vrot.lane.b32.xlu1 %v10001_v38, %s12857_s21  ;;  %10011 = vrot.lane.b32.xlu0 %v9999_v53, %s12857_s21  ;;  %v11714_v38 = vrot.slane %v12542_v41, %v16176_v35  ;;  %v10208_v41 = vsel %vm555_vm2, %v15032_v9, %v16191_v32 }
 0x454   : > { %v10217_v32 = vmul.f32 %v10208_v41, %v15158_v19  ;;  %v6345_v41 = vld [vmem:[%s16089_s5] sm:$0xf] }
 0x455   : > { %v15307_v31 = vpop.permute.xlu1 %9360  ;;  %v15309_v0 = vpop.permute.xlu0 %8951 }
 0x456   : > { %16190 = vst [vmem:[#allocation21_spill] sm:$0xff] %v15307_v31 }
 0x457   : > { %10019 = vrot.lane.b32.xlu1 %v10003_v7, %s12857_s21  ;;  %11721 = vrot.lane.b32.xlu0 %v11710_v63, %s12855_s11  ;;  %v12345_v63 = vld [vmem:[%s16089_s5 + $0x4] sm:$0xf]  ;;  %v16192_v7 = vld [vmem:[#allocation7_spill] sm:$0xff] }
 0x458   : > { %v6402_v31 = vsel %vm628_vm8, %v16192_v7, %v15167_v24 }
 0x459   : > { %v6397_v54 = vpop.permute.xlu1 %6396  ;;  %v15315_v26 = vpop.permute.xlu0 %8955 }
 0x45a   : > { %v6403_v53 = vsel %vm628_vm8, %v15167_v24, %v6397_v54  ;;  %v6404_v24 = vsel %vm628_vm8, %v6397_v54, %v15181_v11 }
 0x45b   : > { %11719 = vrot.lane.b32.xlu1 %v11706_v39, %s12855_s11  ;;  %11725 = vrot.lane.b32.xlu0 %v11718_v8, %s12855_s11 }
 0x45c   : > { %12346 = vmatprep.subr.msk.mxu0 %vm6410_vm14, %v6403_v53  ;;  %v16194_v53 = vld [vmem:[#allocation5_spill] sm:$0xff] }
 0x45d   : > { %12347 = vmatpush1.msk.msra.mxu0 %vm6410_vm14, %v6402_v31  ;;  %v6401_v39 = vpop.permute.xlu1 %6400  ;;  %v15334_v6 = vpop.permute.xlu0 %9364  ;;  %v12550_v31 = vld [vmem:[%s16087_s3 + $0x62] ss:$8 sm:$0xf]  ;;  %v10210_v54 = vsel %vm555_vm2, %v15038_v34, %v16194_v53 }
 0x45e   : > { %16193 = vst [vmem:[#allocation20_spill] sm:$0xff] %v15334_v6  ;;  %v6405_v8 = vsel %vm628_vm8, %v15181_v11, %v6401_v39  ;;  %12348 = vmatmul.mubr.msk.f32.vlgmr.msra.gmra.mrb[4].mxu0 %vm6406_vm15, %v12345_v63  ;;  %v11923_v39 = vrot.slane %v12550_v31, %v16174_v14  ;;  %v10219_v34 = vmul.f32 %v10210_v54, %v15171_v30 }
 0x45f   : > { %11723 = vrot.lane.b32.xlu1 %v11714_v38, %s12855_s11  ;;  %10232 = vrot.lane.b32.xlu0 %v10218_v58, %s12856_s16  ;;  %v10220_v38 = vmul.f32 %v16194_v53, %v14802_v47  ;;  %v10216_v54 = vmul.f32 %v15032_v9, %v14966_v3 }
 0x460   : > { %12349 = vmatprep.subr.msk.mxu1 %vm6410_vm14, %v6405_v8  ;;  %6655 = vmatprep.mubr.f32.mxu0 %v15350_v25  ;;  %v16196_v8 = vld [vmem:[#allocation8_spill] sm:$0xff] }
 0x461   : > { %12350 = vmatpush1.msk.msra.mxu1 %vm6410_vm14, %v6404_v24  ;;  %v15357_v58 = vpop.permute.xlu1 %11070  ;;  %v6571_v11 = vpop.permute.xlu0 %6570  ;;  %v6576_v24 = vsel %vm16197_vm13, %v16196_v8, %v15165_v45  ;;  %vm16198_vm13 = vmmov %vm16195_vm9 }
 0x462   : > { %v6577_v7 = vsel %vm16195_vm9, %v15165_v45, %v6571_v11  ;;  %12351 = vmatmul.mubr.msk.f32.vlgmr.msra.gmra.mrb[4].mxu1 %vm6406_vm15, %v12345_v63  ;;  %v11931_v45 = vrot.slane %v12550_v31, %v16176_v35 }
 0x463   : > { %10230 = vrot.lane.b32.xlu1 %v10217_v32, %s12856_s16  ;;  %10236 = vrot.lane.b32.xlu0 %v10220_v38, %s12856_s16  ;;  %v6578_v38 = vsel %vm16198_vm13, %v6571_v11, %v15179_v13 }
 0x464   : > { %12352 = vmatprep.subr.msk.mxu0 %vm6410_vm14, %v6577_v7  ;;  %6726 = vmatprep.mubr.f32.mxu1 %v15350_v25 }
 0x465   : > { %12353 = vmatpush1.msk.msra.mxu0 %vm6410_vm14, %v6576_v24  ;;  %v15378_v63 = vpop.permute.xlu1 %11074  ;;  %v6575_v32 = vpop.permute.xlu0 %6574 }
 0x466   : > { %v6579_v53 = vsel %vm16195_vm9, %v15179_v13, %v6575_v32  ;;  %12354 = vmatmul.mubr.msk.f32.vlgmr.msra.gmra.mrb[4].mxu0 %vm6406_vm15, %v6345_v41  ;;  %v11927_v13 = vrot.slane %v12550_v31, %v16169_v22  ;;  %v10427_v32 = vsel %vm597_vm1, %v15056_v48, %v15083_v12  ;;  %vm16208_vm9 = vcmask 72704  }
 0x467   : > { %10234 = vrot.lane.b32.xlu1 %v10219_v34, %s12856_s16  ;;  %11936 = vrot.lane.b32.xlu0 %v11923_v39, %s12856_s16  ;;  %v16200_v39 = vld [vmem:[#allocation4_spill] sm:$0xff]  ;;  %vm16209_vm13 = vmmov %vm16208_vm9 }
 0x468   : > { %12355 = vmatprep.subr.msk.mxu1 %vm6410_vm14, %v6579_v53  ;;  %6868 = vmatprep.mubr.f32.mxu0 %v15350_v25  ;;  %v10425_v24 = vsel %vm597_vm1, %v16200_v39, %v15067_v37  ;;  %v12359_v53 = vld [vmem:[%s16089_s5 + $0x8] sm:$0xf] }
 0x469   : > { %12356 = vmatpush1.msk.msra.mxu1 %vm6410_vm14, %v6578_v38  ;;  %v15393_v7 = vpop.permute.xlu1 %9581  ;;  %v15395_v8 = vpop.permute.xlu0 %11068  ;;  %v10434_v9 = vmul.f32 %v10425_v24, %v15158_v19  ;;  %v16201_v38 = vld [vmem:[#allocation9_spill] sm:$0xff]  ;;  %v10436_v24 = vmul.f32 %v10427_v32, %v15171_v30 }
 0x46a   : > { %16199 = vst [vmem:[#allocation6_spill] sm:$0xff] %v15393_v7  ;;  %12357 = vmatmul.mubr.msk.f32.vlgmr.msra.gmra.mrb[4].mxu1 %vm6406_vm15, %v6345_v41 }
 0x46b   : > { %10228 = vrot.lane.b32.xlu1 %v10216_v54, %s12856_s16  ;;  %11940 = vrot.lane.b32.xlu0 %v11931_v45, %s12856_s16  ;;  %v11935_v45 = vrot.slane %v12550_v31, %v16171_v62  ;;  %v6789_v54 = vsel %vm1010_vm7, %v16201_v38, %v15195_v50  ;;  %v16202_v31 = vld [vmem:[#allocation10_spill] sm:$0xff] }
 0x46c   : > { %6939 = vmatprep.mubr.f32.mxu1 %v15350_v25  ;;  %v7006_v32 = vsel %vm1226_vm6, %v16202_v31, %v15193_v21 }
 0x46d   : > { %v6784_v11 = vpop.permute.xlu1 %6783  ;;  %v15406_v34 = vpop.permute.xlu0 %11072 }
 0x46e   : > { %v6790_v41 = vsel %vm1010_vm7, %v15195_v50, %v6784_v11 }
 0x46f   : > { %11938 = vrot.lane.b32.xlu1 %v11927_v13, %s12856_s16  ;;  %10447 = vrot.lane.b32.xlu0 %v10434_v9, %s12855_s11  ;;  %v10426_v9 = vsel %vm597_vm1, %v15067_v37, %v15056_v48  ;;  %v10433_v48 = vmul.f32 %v16200_v39, %v14966_v3 }
 0x470   : > { %12360 = vmatprep.subr.msk.mxu0 %vm6410_vm14, %v6790_v41  ;;  %v6791_v41 = vsel %vm1010_vm7, %v6784_v11, %v15208_v51  ;;  %v10435_v37 = vmul.f32 %v10426_v9, %v14997_v44  ;;  %v10437_v11 = vmul.f32 %v15083_v12, %v14802_v47  ;;  %v16203_v12 = vld [vmem:[#allocation11_spill] sm:$0xff] }
 0x471   : > { %12361 = vmatpush1.msk.msra.mxu0 %vm6410_vm14, %v6789_v54  ;;  %v6788_v7 = vpop.permute.xlu1 %6787  ;;  %v7001_v13 = vpop.permute.xlu0 %7000 }
 0x472   : > { %v6792_v6 = vsel %vm1010_vm7, %v15208_v51, %v6788_v7  ;;  %12362 = vmatmul.mubr.msk.f32.vlgmr.msra.gmra.mrb[4].mxu0 %vm6406_vm15, %v12359_v53  ;;  %v7007_v50 = vsel %vm1226_vm6, %v15193_v21, %v7001_v13  ;;  %v10643_v21 = vsel %vm979_vm3, %v15085_v29, %v15119_v20  ;;  %v12367_v51 = vld [vmem:[%s16089_s5 + $0xc] sm:$0xf]  ;;  %v7008_v39 = vsel %vm1226_vm6, %v7001_v13, %v15206_v2 }
 0x473   : > { %11942 = vrot.lane.b32.xlu1 %v11935_v45, %s12856_s16  ;;  %10451 = vrot.lane.b32.xlu0 %v10436_v24, %s12855_s11  ;;  %v10642_v24 = vsel %vm979_vm3, %v15101_v43, %v15085_v29  ;;  %v7223_v13 = vsel %vm1411_vm5, %v16203_v12, %v15217_v49  ;;  %v10654_v29 = vmul.f32 %v15103_v15, %v14802_v47  ;;  %s322_s16 = scalar_lea.vmem %s16092_s8, %s16236_s15 }
 0x474   : > { %12363 = vmatprep.subr.msk.mxu1 %vm6410_vm14, %v6792_v6  ;;  %12368 = vmatprep.subr.msk.mxu0 %vm6410_vm14, %v7007_v50  ;;  %v10651_v9 = vmul.f32 %v10642_v24, %v15158_v19 }
 0x475   : > { %12364 = vmatpush1.msk.msra.mxu1 %vm6410_vm14, %v6791_v41  ;;  %12369 = vmatpush1.msk.msra.mxu0 %vm6410_vm14, %v7006_v32  ;;  %v15447_v7 = vpop.permute.xlu1 %9585  ;;  %v7005_v45 = vpop.permute.xlu0 %7004 }
 0x476   : > { %12365 = vmatmul.mubr.msk.f32.vlgmr.msra.gmra.mrb[4].mxu1 %vm6406_vm15, %v12359_v53  ;;  %v7009_v6 = vsel %vm1226_vm6, %v15206_v2, %v7005_v45  ;;  %7085 = vmatprep.mubr.f32.mxu0 %v15350_v25  ;;  %v10652_v53 = vmul.f32 %v10643_v21, %v14997_v44 }
 0x477   : > { %10449 = vrot.lane.b32.xlu1 %v10435_v37, %s12855_s11  ;;  %10445 = vrot.lane.b32.xlu0 %v10433_v48, %s12855_s11  ;;  %v10859_v48 = vsel %vm1195_vm4, %v15131_v40, %v15121_v46  ;;  %v12375_v37 = vld [vmem:[%s16089_s5 + $0x10] sm:$0xf] }
 0x478   : > { %12371 = vmatprep.subr.msk.mxu1 %vm6410_vm14, %v7009_v6  ;;  %7156 = vmatprep.mubr.f32.mxu1 %v15350_v25 }
 0x479   : > { %12372 = vmatpush1.msk.msra.mxu1 %vm6410_vm14, %v7008_v39  ;;  %v7218_v38 = vpop.permute.xlu1 %7217  ;;  %v7435_v54 = vpop.permute.xlu0 %7434  ;;  %v16204_v39 = vld [vmem:[#allocation17_spill] sm:$0xff] }
 0x47a   : > { %v7224_v2 = vsel %vm1411_vm5, %v15217_v49, %v7218_v38  ;;  %12370 = vmatmul.mubr.msk.f32.vlgmr.msra.gmra.mrb[4].mxu0 %vm6406_vm15, %v12367_v51  ;;  %v7441_v50 = vsel %vm1195_vm4, %v15215_v28, %v7435_v54  ;;  %v10644_v49 = vsel %vm979_vm3, %v15119_v20, %v15103_v15  ;;  %v7225_v15 = vsel %vm1411_vm5, %v7218_v38, %v15228_v36 }
 0x47b   : > { %10453 = vrot.lane.b32.xlu1 %v10437_v11, %s12855_s11  ;;  %10666 = vrot.lane.b32.xlu0 %v10652_v53, %s12854_s26  ;;  %v10653_v20 = vmul.f32 %v10644_v49, %v15171_v30  ;;  %v10861_v53 = vsel %vm1195_vm4, %v15149_v52, %v15133_v5 }
 0x47c   : > { %12376 = vmatprep.subr.msk.mxu0 %vm6410_vm14, %v7224_v2  ;;  %7302 = vmatprep.mubr.f32.mxu0 %v15350_v25  ;;  %v10860_v2 = vsel %vm1195_vm4, %v15121_v46, %v15149_v52  ;;  %v10870_v12 = vmul.f32 %v10861_v53, %v15171_v30 }
 0x47d   : > { %12377 = vmatpush1.msk.msra.mxu0 %vm6410_vm14, %v7223_v13  ;;  %v7222_v31 = vpop.permute.xlu1 %7221  ;;  %v7439_v32 = vpop.permute.xlu0 %7438  ;;  %v7442_v13 = vsel %vm1195_vm4, %v7435_v54, %v15226_v42  ;;  %v10869_v46 = vmul.f32 %v10860_v2, %v14997_v44  ;;  %v10867_v54 = vmul.f32 %v15131_v40, %v14966_v3  ;;  %v10871_v40 = vmul.f32 %v15133_v5, %v14802_v47  ;;  %v12391_v47 = vld [vmem:[%s16089_s5 + $0x18] sm:$0xf] }
 0x47e   : > { %v7226_v41 = vsel %vm1411_vm5, %v15228_v36, %v7222_v31  ;;  %12373 = vmatmul.mubr.msk.f32.vlgmr.msra.gmra.mrb[4].mxu1 %vm6406_vm15, %v12367_v51  ;;  %12384 = vmatprep.subr.msk.mxu0 %vm6410_vm14, %v7441_v50  ;;  %v7443_v45 = vsel %vm1195_vm4, %v15226_v42, %v7439_v32  ;;  %v10868_v51 = vmul.f32 %v10859_v48, %v15158_v19 }
 0x47f   : > { %10664 = vrot.lane.b32.xlu1 %v10651_v9, %s12854_s26  ;;  %10670 = vrot.lane.b32.xlu0 %v10654_v29, %s12854_s26  ;;  %v7440_v36 = vsel %vm1195_vm4, %v16204_v39, %v15215_v28  ;;  %v10650_v28 = vmul.f32 %v15101_v43, %v14966_v3  ;;  %v12383_v43 = vld [vmem:[%s16089_s5 + $0x14] sm:$0xf]  ;;  %v11077_v31 = vsel %vm1411_vm5, %v15357_v58, %v15406_v34 }
 0x480   : > { %12379 = vmatprep.subr.msk.mxu1 %vm6410_vm14, %v7226_v41  ;;  %7373 = vmatprep.mubr.f32.mxu1 %v15350_v25  ;;  %v16205_v29 = vld [vmem:[#allocation15_spill] sm:$0xff]  ;;  %v11076_v41 = vsel %vm1411_vm5, %v15395_v8, %v15357_v58  ;;  %v11086_v48 = vmul.f32 %v11077_v31, %v14997_v44  ;;  %v11078_v39 = vsel %vm1411_vm5, %v15406_v34, %v15378_v63 }
 0x481   : > { %12380 = vmatpush1.msk.msra.mxu1 %vm6410_vm14, %v7225_v15  ;;  %v7652_v21 = vpop.permute.xlu1 %7651  ;;  %v15511_v6 = vpop.permute.xlu0 %7868  ;;  %v7657_v50 = vsel %vm979_vm3, %v16205_v29, %v15243_v60  ;;  %v11085_v5 = vmul.f32 %v11076_v41, %v15158_v19  ;;  %v16212_v41 = vld [vmem:[#allocation14_spill] sm:$0xff] }
 0x482   : > { %v7658_v11 = vsel %vm979_vm3, %v15243_v60, %v7652_v21  ;;  %12378 = vmatmul.mubr.msk.f32.vlgmr.msra.gmra.mrb[4].mxu0 %vm6406_vm15, %v12375_v37  ;;  %12387 = vmatprep.subr.msk.mxu1 %vm6410_vm14, %v7443_v45  ;;  %v7875_v32 = vsel %vm597_vm1, %v15241_v10, %v15511_v6 }
 0x483   : > { %12385 = vmatpush1.msk.msra.mxu0 %vm6410_vm14, %v7440_v36  ;;  %10668 = vrot.lane.b32.xlu1 %v10653_v20, %s12854_s26  ;;  %v16206_v20 = vld [vmem:[#allocation18_spill] sm:$0xff] }
 0x484   : > { %10881 = vrot.lane.b32.xlu0 %v10868_v51, %s12853_s23  ;;  %12392 = vmatprep.subr.msk.mxu0 %vm6410_vm14, %v7658_v11  ;;  %v7874_v45 = vsel %vm597_vm1, %v16206_v20, %v15241_v10  ;;  %v11087_v10 = vmul.f32 %v11078_v39, %v15171_v30 }
 0x485   : > { %v7656_v38 = vpop.permute.xlu1 %7655  ;;  %v7873_v24 = vpop.permute.xlu0 %7872  ;;  %7519 = vmatprep.mubr.f32.mxu0 %v15350_v25 }
 0x486   : > { %v7660_v9 = vsel %vm979_vm3, %v15254_v27, %v7656_v38  ;;  %12381 = vmatmul.mubr.msk.f32.vlgmr.msra.gmra.mrb[4].mxu1 %vm6406_vm15, %v12375_v37  ;;  %v7659_v37 = vsel %vm979_vm3, %v7652_v21, %v15254_v27  ;;  %v7877_v15 = vsel %vm597_vm1, %v15252_v17, %v7873_v24  ;;  %v15597_v21 = vld [vmem:[#allocation2 + $0x28] sm:$0xf]  ;;  %v16207_v24 = vld [vmem:[#allocation19_spill] sm:$0xff] }
 0x487   : > { %12388 = vmatpush1.msk.msra.mxu1 %vm6410_vm14, %v7442_v13  ;;  %10662 = vrot.lane.b32.xlu1 %v10650_v28, %s12854_s26  ;;  %v11088_v51 = vmul.f32 %v15597_v21, %v15378_v63  ;;  %v7876_v63 = vsel %vm597_vm1, %v15511_v6, %v15252_v17  ;;  %v12399_v28 = vld [vmem:[%s16089_s5 + $0x1c] sm:$0xf]  ;;  %v11084_v17 = vmul.f32 %v15395_v8, %v14966_v3 }
 0x488   : > { %10885 = vrot.lane.b32.xlu0 %v10870_v12, %s12853_s23  ;;  %12395 = vmatprep.subr.msk.mxu1 %vm6410_vm14, %v7660_v9  ;;  %v8091_v2 = vsel %vm555_vm2, %v16207_v24, %v15263_v59  ;;  %v12431_v24 = vld [vmem:[%s16089_s5 + $0x2c] sm:$0xf] }
 0x489   : > { %v15548_v52 = vpop.permute.xlu1 %8085  ;;  %v15550_v42 = vpop.permute.xlu0 %8302  ;;  %7590 = vmatprep.mubr.f32.mxu1 %v15350_v25 }
 0x48a   : > { %12386 = vmatmul.mubr.msk.f32.vlgmr.msra.gmra.mrb[4].mxu0 %vm6406_vm15, %v12383_v43  ;;  %v8092_v36 = vsel %vm555_vm2, %v15263_v59, %v15548_v52  ;;  %v8309_v12 = vsel %vm16208_vm9, %v15261_v1, %v15550_v42  ;;  %v8093_v59 = vsel %vm555_vm2, %v15548_v52, %v15274_v57 }
 0x48b   : > { %12393 = vmatpush1.msk.msra.mxu0 %vm6410_vm14, %v7657_v50  ;;  %10883 = vrot.lane.b32.xlu1 %v10869_v46, %s12853_s23 }
 0x48c   : > { %12400 = vmatprep.subr.msk.mxu0 %vm6410_vm14, %v7875_v32  ;;  %10879 = vrot.lane.b32.xlu0 %v10867_v54, %s12853_s23 }
 0x48d   : > { %v8090_v60 = vpop.permute.xlu1 %8089  ;;  %v8307_v49 = vpop.permute.xlu0 %8306  ;;  %7736 = vmatprep.mubr.f32.mxu0 %v15350_v25 }
 0x48e   : > { %12389 = vmatmul.mubr.msk.f32.vlgmr.msra.gmra.mrb[4].mxu1 %vm6406_vm15, %v12383_v43  ;;  %v8094_v34 = vsel %vm555_vm2, %v15274_v57, %v8090_v60  ;;  %v8311_v9 = vsel %vm16209_vm13, %v15272_v56, %v8307_v49  ;;  %v12407_v43 = vld [vmem:[%s16089_s5 + $0x20] sm:$0xf]  ;;  %vm16211_vm13 = vmmov %vm16208_vm9 }
 0x48f   : > { %12396 = vmatpush1.msk.msra.mxu1 %vm6410_vm14, %v7659_v37  ;;  %10887 = vrot.lane.b32.xlu1 %v10871_v40, %s12853_s23  ;;  %v16210_v57 = vld [vmem:[#allocation13_spill] sm:$0xff]  ;;  %v8310_v32 = vsel %vm16211_vm13, %v15550_v42, %v15272_v56  ;;  %v8525_v56 = vsel %vm637_vm0, %v16212_v41, %v15285_v61 }
 0x490   : > { %12403 = vmatprep.subr.msk.mxu1 %vm6410_vm14, %v7877_v15  ;;  %11100 = vrot.lane.b32.xlu0 %v11086_v48, %s12852_s20  ;;  %v8308_v52 = vsel %vm16208_vm9, %v16210_v57, %v15261_v1  ;;  %v12415_v40 = vld [vmem:[%s16089_s5 + $0x24] sm:$0xf]  ;;  %vm16213_vm9 = vcmask 56320  }
 0x491   : > { %v15589_v27 = vpop.permute.xlu1 %8519  ;;  %v15591_v58 = vpop.permute.xlu0 %8736  ;;  %7807 = vmatprep.mubr.f32.mxu1 %v15350_v25  ;;  %vm16214_vm13 = vmmov %vm16213_vm9 }
 0x492   : > { %12394 = vmatmul.mubr.msk.f32.vlgmr.msra.gmra.mrb[4].mxu0 %vm6406_vm15, %v12391_v47  ;;  %v8526_v29 = vsel %vm637_vm0, %v15285_v61, %v15589_v27  ;;  %v8743_v48 = vsel %vm16213_vm9, %v15283_v55, %v15591_v58 }
 0x493   : > { %12401 = vmatpush1.msk.msra.mxu0 %vm6410_vm14, %v7874_v45  ;;  %11098 = vrot.lane.b32.xlu1 %v11085_v5, %s12852_s20 }
 0x494   : > { %12408 = vmatprep.subr.msk.mxu0 %vm6410_vm14, %v8092_v36  ;;  %11104 = vrot.lane.b32.xlu0 %v11088_v51, %s12852_s20 }
 0x495   : > { %v8524_v11 = vpop.permute.xlu1 %8523  ;;  %v15613_v53 = vpop.permute.xlu0 %8740  ;;  %7953 = vmatprep.mubr.f32.mxu0 %v15350_v25 }
 0x496   : > { %12397 = vmatmul.mubr.msk.f32.vlgmr.msra.gmra.mrb[4].mxu1 %vm6406_vm15, %v12391_v47  ;;  %v8528_v1 = vsel %vm637_vm0, %v15300_v16, %v8524_v11  ;;  %v8527_v47 = vsel %vm637_vm0, %v15589_v27, %v15300_v16  ;;  %v8745_v45 = vsel %vm16214_vm13, %v15298_v4, %v15613_v53  ;;  %v12423_v16 = vld [vmem:[%s16089_s5 + $0x28] sm:$0xf]  ;;  %vm16215_vm0 = vmmov %vm16213_vm9  ;;  %vm16216_vm9 = vcmask 7168  }
 0x497   : > { %12404 = vmatpush1.msk.msra.mxu1 %vm6410_vm14, %v7876_v63  ;;  %11102 = vrot.lane.b32.xlu1 %v11087_v10, %s12852_s20  ;;  %v8742_v10 = vsel %vm16215_vm0, %v15054_v18, %v15283_v55  ;;  %vm16217_vm13 = vmmov %vm16215_vm0 }
 0x498   : > { %12411 = vmatprep.subr.msk.mxu1 %vm6410_vm14, %v8094_v34  ;;  %8024 = vmatprep.mubr.f32.mxu1 %v15350_v25  ;;  %v12446_v34 = vld [vmem:[%s16087_s3 + $0x25] ss:$8 sm:$0xf]  ;;  %vm16218_vm0 = vmmov %vm16216_vm9 }
 0x499   : > { %v15631_v6 = vpop.permute.xlu1 %8953  ;;  %v15633_v38 = vpop.permute.xlu0 %9579 }
 0x49a   : > { %12402 = vmatmul.mubr.msk.f32.vlgmr.msra.gmra.mrb[4].mxu0 %vm6406_vm15, %v12399_v28  ;;  %v8960_v11 = vsel %vm16216_vm9, %v15309_v0, %v15631_v6  ;;  %vm16219_vm9 = vmmov %vm16218_vm0 }
 0x49b   : > { %12409 = vmatpush1.msk.msra.mxu0 %vm6410_vm14, %v8091_v2  ;;  %11096 = vrot.lane.b32.xlu1 %v11084_v17, %s12852_s20 }
 0x49c   : > { %12416 = vmatprep.subr.msk.mxu0 %vm6410_vm14, %v8309_v12  ;;  %8170 = vmatprep.mubr.f32.mxu0 %v15350_v25  ;;  %v9137_v12 = vrot.slane %v12446_v34, %v16171_v62  ;;  %v16221_v62 = vld [vmem:[#allocation16_spill] sm:$0xff] }
 0x49d   : > { %v15646_v8 = vpop.permute.xlu1 %8957  ;;  %v15648_v13 = vpop.permute.xlu0 %9583 }
 0x49e   : > { %12405 = vmatmul.mubr.msk.f32.vlgmr.msra.gmra.mrb[4].mxu1 %vm6406_vm15, %v12399_v28  ;;  %v9129_v28 = vrot.slane %v12446_v34, %v16169_v22  ;;  %v8962_v17 = vsel %vm16218_vm0, %v15315_v26, %v15646_v8  ;;  %v8959_v22 = vsel %vm16219_vm9, %v15069_v33, %v15309_v0 }
 0x49f   : > { %12412 = vmatpush1.msk.msra.mxu1 %vm6410_vm14, %v8093_v59  ;;  %8241 = vmatprep.mubr.f32.mxu1 %v15350_v25 }
 0x4a0   : > { %12419 = vmatprep.subr.msk.mxu1 %vm6410_vm14, %v8311_v9  ;;  %v9125_v9 = vrot.slane %v12446_v34, %v16174_v14  ;;  %v12439_v14 = vld [vmem:[%s16089_s5 + $0x30] sm:$0xf] }
 0x4a1   : > { %v15662_v46 = vpop.permute.xlu1 %9362  ;;  %v15664_v54 = vpop.permute.xlu0 %9577 }
 0x4a2   : > { %12410 = vmatmul.mubr.msk.f32.vlgmr.msra.gmra.mrb[4].mxu0 %vm6406_vm15, %v12407_v43 }
 0x4a3   : > { %12417 = vmatpush1.msk.msra.mxu0 %vm6410_vm14, %v8308_v52  ;;  %8387 = vmatprep.mubr.f32.mxu0 %v15350_v25 }
 0x4a4   : > { %12424 = vmatprep.subr.msk.mxu0 %vm6410_vm14, %v8526_v29 }
 0x4a5   : > { %v15676_v50 = vpop.permute.xlu1 %9366  ;;  %v11288_v31 = vpop.permute.xlu0 %11287 }
 0x4a6   : > { %12413 = vmatmul.mubr.msk.f32.vlgmr.msra.gmra.mrb[4].mxu1 %vm6406_vm15, %v12407_v43  ;;  %v9145_v43 = vmul.f32 %v9137_v12, %v16221_v62 }
 0x4a7   : > { %12420 = vmatpush1.msk.msra.mxu1 %vm6410_vm14, %v8310_v32  ;;  %8458 = vmatprep.mubr.f32.mxu1 %v15350_v25 }
 0x4a8   : > { %12427 = vmatprep.subr.msk.mxu1 %vm6410_vm14, %v8528_v1 }
 0x4a9   : > { %v11286_v60 = vpop.permute.xlu1 %11285  ;;  %v11292_v49 = vpop.permute.xlu0 %11291 }
 0x4aa   : > { %v11293_v42 = vsel %vm1226_vm6, %v11286_v60, %v11288_v31  ;;  %12418 = vmatmul.mubr.msk.f32.vlgmr.msra.gmra.mrb[4].mxu0 %vm6406_vm15, %v12415_v40  ;;  %v11301_v53 = vmul.f32 %v11286_v60, %v14966_v3  ;;  %v11305_v63 = vmul.f32 %v15597_v21, %v11292_v49  ;;  %v8744_v3 = vsel %vm16217_vm13, %v15591_v58, %v15298_v4  ;;  %vm16220_vm13 = vmmov %vm16218_vm0 }
 0x4ab   : > { %v11302_v37 = vmul.f32 %v11293_v42, %v15158_v19  ;;  %12425 = vmatpush1.msk.msra.mxu0 %vm6410_vm14, %v8525_v56  ;;  %8604 = vmatprep.mubr.f32.mxu0 %v15350_v25  ;;  %v9143_v58 = vmul.f32 %v9129_v28, %v14980_v23  ;;  %v8961_v33 = vsel %vm16220_vm13, %v15631_v6, %v15315_v26  ;;  %v12832_v6 = vld [vmem:[#allocation2 + $0x8] sm:$0xf]  ;;  %vm16223_vm0 = vcmask 1039360  }
 0x4ac   : > { %12432 = vmatprep.subr.msk.mxu0 %vm6410_vm14, %v8743_v48  ;;  %v9142_v29 = vmul.f32 %v12832_v6, %v9125_v9  ;;  %v16224_v48 = vld [vmem:[#allocation3_spill] sm:$0xff]  ;;  %vm16225_vm9 = vmmov %vm16223_vm0 }
 0x4ad   : > { %v11290_v15 = vpop.permute.xlu1 %11289  ;;  %11315 = vrot.lane.b32.xlu0 %v11302_v37, %s12851_s13  ;;  %v15703_v61 = vpop.permute.xlu0 %9798  ;;  %v9373_v37 = vsel %vm16225_vm9, %v15676_v50, %v16224_v48  ;;  %vm16227_vm13 = vmmov %vm16223_vm0  ;;  %v12479_v48 = vld [vmem:[%s16089_s5 + $0x44] sm:$0xf] }
 0x4ae   : > { %v11294_v5 = vsel %vm1226_vm6, %v11288_v31, %v11290_v15  ;;  %v11295_v20 = vsel %vm1226_vm6, %v11290_v15, %v11292_v49  ;;  %12421 = vmatmul.mubr.msk.f32.vlgmr.msra.gmra.mrb[4].mxu1 %vm6406_vm15, %v12415_v40  ;;  %v16222_v40 = vld [vmem:[#allocation20_spill] sm:$0xff]  ;;  %v15815_v15 = vld [vmem:[#allocation2 + $0x8] sm:$0xf] }
 0x4af   : > { %v11303_v51 = vmul.f32 %v11294_v5, %v14997_v44  ;;  %v11304_v39 = vmul.f32 %v11295_v20, %v15171_v30  ;;  %12428 = vmatpush1.msk.msra.mxu1 %vm6410_vm14, %v8527_v47  ;;  %8675 = vmatprep.mubr.f32.mxu1 %v15350_v25  ;;  %v9371_v60 = vsel %vm16223_vm0, %v15662_v46, %v16222_v40  ;;  %v12447_v5 = vld [vmem:[%s16089_s5 + $0x34] sm:$0xf] }
 0x4b0   : > { %12435 = vmatprep.subr.msk.mxu1 %vm6410_vm14, %v8745_v45 }
 0x4b1   : > { %v15722_v27 = vpop.permute.xlu1 %9796  ;;  %11317 = vrot.lane.b32.xlu1 %v11303_v51, %s12851_s13  ;;  %11319 = vrot.lane.b32.xlu0 %v11304_v39, %s12851_s13  ;;  %v15726_v36 = vpop.permute.xlu0 %9802  ;;  %v16226_v51 = vld [vmem:[#allocation21_spill] sm:$0xff] }
 0x4b2   : > { %12426 = vmatmul.mubr.msk.f32.vlgmr.msra.gmra.mrb[4].mxu0 %vm6406_vm15, %v12423_v16  ;;  %v9370_v39 = vsel %vm16227_vm13, %v16226_v51, %v15662_v46 }
 0x4b3   : > { %12433 = vmatpush1.msk.msra.mxu0 %vm6410_vm14, %v8742_v10  ;;  %8821 = vmatprep.mubr.f32.mxu0 %v15350_v25 }
 0x4b4   : > { %12440 = vmatprep.subr.msk.mxu0 %vm6410_vm14, %v8960_v11 }
 0x4b5   : > { %v15743_v18 = vpop.permute.xlu1 %9800  ;;  %11321 = vrot.lane.b32.xlu1 %v11305_v63, %s12851_s13  ;;  %11313 = vrot.lane.b32.xlu0 %v11301_v53, %s12851_s13  ;;  %v11503_v55 = vpop.permute.xlu0 %11502  ;;  %v9372_v63 = vsel %vm16223_vm0, %v16222_v40, %v15676_v50 }
 0x4b6   : > { %12429 = vmatmul.mubr.msk.f32.vlgmr.msra.gmra.mrb[4].mxu1 %vm6406_vm15, %v12423_v16  ;;  %v11518_v47 = vmul.f32 %v15815_v15, %v11503_v55  ;;  %v16228_v16 = vld [vmem:[#allocation6_spill] sm:$0xff] }
 0x4b7   : > { %12436 = vmatpush1.msk.msra.mxu1 %vm6410_vm14, %v8744_v3  ;;  %8892 = vmatprep.mubr.f32.mxu1 %v15350_v25  ;;  %v9588_v10 = vsel %vm2913_vm12, %v15633_v38, %v16228_v16  ;;  %v12455_v3 = vld [vmem:[%s16089_s5 + $0x38] sm:$0xf]  ;;  %v9589_v12 = vsel %vm2913_vm12, %v16228_v16, %v15648_v13 }
 0x4b8   : > { %12443 = vmatprep.subr.msk.mxu1 %vm6410_vm14, %v8962_v17 }
 0x4b9   : > { %v15761_v2 = vpop.permute.xlu1 %9794  ;;  %v11507_v4 = vpop.permute.xlu0 %11506 }
 0x4ba   : > { %12434 = vmatmul.mubr.msk.f32.vlgmr.msra.gmra.mrb[4].mxu0 %vm6406_vm15, %v12431_v24 }
 0x4bb   : > { %12441 = vmatpush1.msk.msra.mxu0 %vm6410_vm14, %v8959_v22  ;;  %9038 = vmatprep.mubr.f32.mxu0 %v15350_v25 }
 0x4bc   : > { %12448 = vmatprep.subr.msk.mxu0 %vm6410_vm14, %v9143_v58 }
 0x4bd   : > { %v11505_v8 = vpop.permute.xlu1 %11504  ;;  %v15772_v59 = vpop.permute.xlu0 %10013 }
 0x4be   : > { %v11510_v0 = vsel %vm1010_vm7, %v11503_v55, %v11505_v8  ;;  %v11511_v23 = vsel %vm1010_vm7, %v11505_v8, %v11507_v4  ;;  %12437 = vmatmul.mubr.msk.f32.vlgmr.msra.gmra.mrb[4].mxu1 %vm6406_vm15, %v12431_v24  ;;  %v9805_v24 = vsel %vm2698_vm11, %v15722_v27, %v15703_v61 }
 0x4bf   : > { %v11519_v57 = vmul.f32 %v11510_v0, %v15158_v19  ;;  %v11520_v52 = vmul.f32 %v11511_v23, %v14997_v44  ;;  %12444 = vmatpush1.msk.msra.mxu1 %vm6410_vm14, %v8961_v33  ;;  %9109 = vmatprep.mubr.f32.mxu1 %v15350_v25  ;;  %v9133_v44 = vrot.slane %v12446_v34, %v16176_v35  ;;  %v12833_v35 = vld [vmem:[#allocation2 + $0x18] sm:$0xf]  ;;  %v12463_v33 = vld [vmem:[%s16089_s5 + $0x3c] sm:$0xf] }
 0x4c0   : > { %12451 = vmatprep.subr.msk.mxu1 %vm6410_vm14, %v9145_v43  ;;  %v9590_v34 = vsel %vm2913_vm12, %v15648_v13, %v15447_v7  ;;  %v9587_v7 = vsel %vm2913_vm12, %v15664_v54, %v15633_v38  ;;  %v9804_v0 = vsel %vm2698_vm11, %v15761_v2, %v15722_v27  ;;  %v12471_v2 = vld [vmem:[%s16089_s5 + $0x40] sm:$0xf] }
 0x4c1   : > { %v11509_v26 = vpop.permute.xlu1 %11508  ;;  %11532 = vrot.lane.b32.xlu1 %v11519_v57, %s12850_s14  ;;  %11534 = vrot.lane.b32.xlu0 %v11520_v52, %s12850_s14  ;;  %v15792_v31 = vpop.permute.xlu0 %10017  ;;  %v9144_v56 = vmul.f32 %v12833_v35, %v9133_v44  ;;  %v9806_v57 = vsel %vm2698_vm11, %v15703_v61, %v15743_v18 }
 0x4c2   : > { %v11512_v32 = vsel %vm1010_vm7, %v11507_v4, %v11509_v26  ;;  %v11522_v1 = vmul.f32 %v15597_v21, %v11509_v26  ;;  %12442 = vmatmul.mubr.msk.f32.vlgmr.msra.gmra.mrb[4].mxu0 %vm6406_vm15, %v12439_v14  ;;  %v12835_v4 = vld [vmem:[#allocation2 + $0x18] sm:$0xf] }
 0x4c3   : > { %v11521_v49 = vmul.f32 %v11512_v32, %v15171_v30  ;;  %12449 = vmatpush1.msk.msra.mxu0 %vm6410_vm14, %v9142_v29  ;;  %9227 = vmatprep.mubr.f32.mxu0 %v15350_v25  ;;  %v12836_v29 = vld [vmem:[#allocation2 + $0x10] sm:$0xf] }
 0x4c4   : > { %12456 = vmatprep.subr.msk.mxu0 %vm6410_vm14, %v9371_v60 }
 0x4c5   : > { %v15805_v41 = vpop.permute.xlu1 %10015  ;;  %11536 = vrot.lane.b32.xlu1 %v11521_v49, %s12850_s14  ;;  %11538 = vrot.lane.b32.xlu0 %v11522_v1, %s12850_s14  ;;  %v15809_v42 = vpop.permute.xlu0 %10011 }
 0x4c6   : > { %12445 = vmatmul.mubr.msk.f32.vlgmr.msra.gmra.mrb[4].mxu1 %vm6406_vm15, %v12439_v14  ;;  %v10022_v23 = vsel %vm2482_vm10, %v15772_v59, %v15805_v41  ;;  %v10021_v61 = vsel %vm2482_vm10, %v15809_v42, %v15772_v59  ;;  %v10023_v40 = vsel %vm2482_vm10, %v15805_v41, %v15792_v31 }
 0x4c7   : > { %12452 = vmatpush1.msk.msra.mxu1 %vm6410_vm14, %v9144_v56  ;;  %9298 = vmatprep.mubr.f32.mxu1 %v15350_v25  ;;  %v12837_v56 = vld [vmem:[#allocation2 + $0x20] sm:$0xf] }
 0x4c8   : > { %12459 = vmatprep.subr.msk.mxu1 %vm6410_vm14, %v9373_v37 }
 0x4c9   : > { %v10020_v20 = vpop.permute.xlu1 %10019  ;;  %11530 = vrot.lane.b32.xlu1 %v11518_v47, %s12850_s14  ;;  %v11722_v45 = vpop.permute.xlu0 %11721  ;;  %v12135_v47 = vld [vmem:[%s16091_s7] sm:$0xf] }
 0x4ca   : > { %12450 = vmatmul.mubr.msk.f32.vlgmr.msra.gmra.mrb[4].mxu0 %vm6406_vm15, %v12447_v5  ;;  %v10024_v27 = vsel %vm2482_vm10, %v15792_v31, %v10020_v20 }
 0x4cb   : > { %12457 = vmatpush1.msk.msra.mxu0 %vm6410_vm14, %v9370_v39  ;;  %9449 = vmatprep.mubr.f32.mxu0 %v15350_v25 }
 0x4cc   : > { %12464 = vmatprep.subr.msk.mxu0 %vm6410_vm14, %v9588_v10 }
 0x4cd   : > { %v11720_v11 = vpop.permute.xlu1 %11719  ;;  %v11726_v53 = vpop.permute.xlu0 %11725 }
 0x4ce   : > { %v11727_v46 = vsel %vm628_vm8, %v11720_v11, %v11722_v45  ;;  %12453 = vmatmul.mubr.msk.f32.vlgmr.msra.gmra.mrb[4].mxu1 %vm6406_vm15, %v12447_v5  ;;  %v11735_v8 = vmul.f32 %v15815_v15, %v11720_v11  ;;  %v11739_v9 = vmul.f32 %v15597_v21, %v11726_v53 }
 0x4cf   : > { %v11736_v55 = vmul.f32 %v11727_v46, %v15158_v19  ;;  %12460 = vmatpush1.msk.msra.mxu1 %vm6410_vm14, %v9372_v63  ;;  %9520 = vmatprep.mubr.f32.mxu1 %v15350_v25 }
 0x4d0   : > { %12467 = vmatprep.subr.msk.mxu1 %vm6410_vm14, %v9590_v34 }
 0x4d1   : > { %v11724_v50 = vpop.permute.xlu1 %11723  ;;  %11749 = vrot.lane.b32.xlu0 %v11736_v55, %s12848_s19  ;;  %v15851_v28 = vpop.permute.xlu0 %10232 }
 0x4d2   : > { %v11728_v19 = vsel %vm628_vm8, %v11722_v45, %v11724_v50  ;;  %v11729_v17 = vsel %vm628_vm8, %v11724_v50, %v11726_v53  ;;  %12458 = vmatmul.mubr.msk.f32.vlgmr.msra.gmra.mrb[4].mxu0 %vm6406_vm15, %v12455_v3 }
 0x4d3   : > { %v11737_v22 = vmul.f32 %v12835_v4, %v11728_v19  ;;  %v11738_v58 = vmul.f32 %v11729_v17, %v15171_v30  ;;  %12465 = vmatpush1.msk.msra.mxu0 %vm6410_vm14, %v9587_v7  ;;  %9666 = vmatprep.mubr.f32.mxu0 %v15350_v25  ;;  %v9807_v30 = vsel %vm2698_vm11, %v15743_v18, %v15726_v36  ;;  %vm16229_vm11 = vcmask 596992  }
 0x4d4   : > { %12472 = vmatprep.subr.msk.mxu0 %vm6410_vm14, %v9805_v24  ;;  %vm16230_vm12 = vmmov %vm16229_vm11 }
 0x4d5   : > { %v15866_v38 = vpop.permute.xlu1 %10230  ;;  %11751 = vrot.lane.b32.xlu1 %v11737_v22, %s12848_s19  ;;  %11753 = vrot.lane.b32.xlu0 %v11738_v58, %s12848_s19  ;;  %v10237_v54 = vpop.permute.xlu0 %10236  ;;  %vm16231_vm9 = vmmov %vm16229_vm11  ;;  %v12503_v22 = vld [vmem:[%s16089_s5 + $0x50] sm:$0xf] }
 0x4d6   : > { %12461 = vmatmul.mubr.msk.f32.vlgmr.msra.gmra.mrb[4].mxu1 %vm6406_vm15, %v12455_v3  ;;  %v10239_v6 = vsel %vm16231_vm9, %v15866_v38, %v15851_v28  ;;  %vm16232_vm13 = vmmov %vm16231_vm9  ;;  %v12495_v3 = vld [vmem:[%s16089_s5 + $0x4c] sm:$0xf] }
 0x4d7   : > { %12468 = vmatpush1.msk.msra.mxu1 %vm6410_vm14, %v9589_v12  ;;  %9737 = vmatprep.mubr.f32.mxu1 %v15350_v25  ;;  %vm16233_vm0 = vmmov %vm16231_vm9 }
 0x4d8   : > { %12475 = vmatprep.subr.msk.mxu1 %vm6410_vm14, %v9807_v30  ;;  %vm16234_vm10 = vmmov %vm16233_vm0 }
 0x4d9   : > { %v15885_v13 = vpop.permute.xlu1 %10234  ;;  %11755 = vrot.lane.b32.xlu1 %v11739_v9, %s12848_s19  ;;  %11747 = vrot.lane.b32.xlu0 %v11735_v8, %s12848_s19  ;;  %v11937_v36 = vpop.permute.xlu0 %11936 }
 0x4da   : > { %12466 = vmatmul.mubr.msk.f32.vlgmr.msra.gmra.mrb[4].mxu0 %vm6406_vm15, %v12463_v33  ;;  %v10241_v35 = vsel %vm16233_vm0, %v15885_v13, %v10237_v54  ;;  %v11952_v5 = vmul.f32 %v15815_v15, %v11937_v36  ;;  %v12487_v15 = vld [vmem:[%s16089_s5 + $0x48] sm:$0xf] }
 0x4db   : > { %12473 = vmatpush1.msk.msra.mxu0 %vm6410_vm14, %v9804_v0  ;;  %9883 = vmatprep.mubr.f32.mxu0 %v15350_v25 }
 0x4dc   : > { %12480 = vmatprep.subr.msk.mxu0 %vm6410_vm14, %v10022_v23 }
 0x4dd   : > { %v10229_v62 = vpop.permute.xlu1 %10228  ;;  %v11941_v43 = vpop.permute.xlu0 %11940 }
 0x4de   : > { %12469 = vmatmul.mubr.msk.f32.vlgmr.msra.gmra.mrb[4].mxu1 %vm6406_vm15, %v12463_v33  ;;  %v10238_v41 = vsel %vm16234_vm10, %v10229_v62, %v15866_v38 }
 0x4df   : > { %12476 = vmatpush1.msk.msra.mxu1 %vm6410_vm14, %v9806_v57  ;;  %9954 = vmatprep.mubr.f32.mxu1 %v15350_v25  ;;  %v12519_v57 = vld [vmem:[%s16089_s5 + $0x58] sm:$0xf] }
 0x4e0   : > { %12483 = vmatprep.subr.msk.mxu1 %vm6410_vm14, %v10024_v27 }
 0x4e1   : > { %v11939_v52 = vpop.permute.xlu1 %11938  ;;  %v10448_v14 = vpop.permute.xlu0 %10447 }
 0x4e2   : > { %v11944_v18 = vsel %vm16229_vm11, %v11937_v36, %v11939_v52  ;;  %v11945_v26 = vsel %vm16230_vm12, %v11939_v52, %v11941_v43  ;;  %12474 = vmatmul.mubr.msk.f32.vlgmr.msra.gmra.mrb[4].mxu0 %vm6406_vm15, %v12471_v2  ;;  %vm16235_vm11 = vmmov %vm16233_vm0  ;;  %v12511_v36 = vld [vmem:[%s16089_s5 + $0x54] sm:$0xf] }
 0x4e3   : > { %v11953_v44 = vmul.f32 %v12836_v29, %v11944_v18  ;;  %v11954_v32 = vmul.f32 %v12835_v4, %v11945_v26  ;;  %12481 = vmatpush1.msk.msra.mxu0 %vm6410_vm14, %v10021_v61  ;;  %10100 = vmatprep.mubr.f32.mxu0 %v15350_v25  ;;  %v10240_v51 = vsel %vm16235_vm11, %v15851_v28, %v15885_v13  ;;  %v12527_v29 = vld [vmem:[%s16089_s5 + $0x5c] sm:$0xf] }
 0x4e4   : > { %12488 = vmatprep.subr.msk.mxu0 %vm6410_vm14, %v10239_v6 }
 0x4e5   : > { %v11943_v59 = vpop.permute.xlu1 %11942  ;;  %11966 = vrot.lane.b32.xlu1 %v11953_v44, %s12849_s10  ;;  %11968 = vrot.lane.b32.xlu0 %v11954_v32, %s12849_s10  ;;  %v10452_v1 = vpop.permute.xlu0 %10451 }
 0x4e6   : > { %v11946_v60 = vsel %vm16232_vm13, %v11941_v43, %v11943_v59  ;;  %v11956_v49 = vmul.f32 %v15597_v21, %v11943_v59  ;;  %12477 = vmatmul.mubr.msk.f32.vlgmr.msra.gmra.mrb[4].mxu1 %vm6406_vm15, %v12471_v2 }
 0x4e7   : > { %v11955_v42 = vmul.f32 %v12837_v56, %v11946_v60  ;;  %12484 = vmatpush1.msk.msra.mxu1 %vm6410_vm14, %v10023_v40  ;;  %10171 = vmatprep.mubr.f32.mxu1 %v15350_v25  ;;  %v12535_v56 = vld [vmem:[%s16089_s5 + $0x60] sm:$0xf] }
 0x4e8   : > { %12491 = vmatprep.subr.msk.mxu1 %vm6410_vm14, %v10241_v35 }
 0x4e9   : > { %v10450_v31 = vpop.permute.xlu1 %10449  ;;  %11970 = vrot.lane.b32.xlu1 %v11955_v42, %s12849_s10  ;;  %11972 = vrot.lane.b32.xlu0 %v11956_v49, %s12849_s10  ;;  %v10446_v21 = vpop.permute.xlu0 %10445 }
 0x4ea   : > { %v10456_v37 = vsel %vm628_vm8, %v10448_v14, %v10450_v31  ;;  %12482 = vmatmul.mubr.msk.f32.vlgmr.msra.gmra.mrb[4].mxu0 %vm6406_vm15, %v12479_v48  ;;  %v10455_v11 = vsel %vm628_vm8, %v10446_v21, %v10448_v14  ;;  %v10457_v46 = vsel %vm628_vm8, %v10450_v31, %v10452_v1 }
 0x4eb   : > { %12489 = vmatpush1.msk.msra.mxu0 %vm6410_vm14, %v10238_v41  ;;  %10317 = vmatprep.mubr.f32.mxu0 %v15350_v25 }
 0x4ec   : > { %12496 = vmatprep.subr.msk.mxu0 %vm6410_vm14, %v10456_v37 }
 0x4ed   : > { %v10454_v20 = vpop.permute.xlu1 %10453  ;;  %11964 = vrot.lane.b32.xlu1 %v11952_v5, %s12849_s10  ;;  %12138 = vperm.xlu0 %12821, %v12135_v47   ;;  %v10667_v45 = vpop.permute.xlu0 %10666 }
 0x4ee   : > { %v10458_v39 = vsel %vm628_vm8, %v10452_v1, %v10454_v20  ;;  %12485 = vmatmul.mubr.msk.f32.vlgmr.msra.gmra.mrb[4].mxu1 %vm6406_vm15, %v12479_v48 }
 0x4ef   : > { %12492 = vmatpush1.msk.msra.mxu1 %vm6410_vm14, %v10240_v51  ;;  %10388 = vmatprep.mubr.f32.mxu1 %v15350_v25  ;;  %v12543_v51 = vld [vmem:[%s16089_s5 + $0x64] sm:$0xf] }
 0x4f0   : > { %12499 = vmatprep.subr.msk.mxu1 %vm6410_vm14, %v10458_v39 }
 0x4f1   : > { %v10665_v16 = vpop.permute.xlu1 %10664  ;;  %v10671_v10 = vpop.permute.xlu0 %10670 }
 0x4f2   : > { %v10673_v53 = vsel %vm1010_vm7, %v10665_v16, %v10667_v45  ;;  %12490 = vmatmul.mubr.msk.f32.vlgmr.msra.gmra.mrb[4].mxu0 %vm6406_vm15, %v12487_v15 }
 0x4f3   : > { %12497 = vmatpush1.msk.msra.mxu0 %vm6410_vm14, %v10455_v11  ;;  %10534 = vmatprep.mubr.f32.mxu0 %v15350_v25 }
 0x4f4   : > { %12504 = vmatprep.subr.msk.mxu0 %vm6410_vm14, %v10673_v53 }
 0x4f5   : > { %v10669_v63 = vpop.permute.xlu1 %10668 }
 0x4f6   : > { %v10675_v34 = vsel %vm1010_vm7, %v10669_v63, %v10671_v10  ;;  %12493 = vmatmul.mubr.msk.f32.vlgmr.msra.gmra.mrb[4].mxu1 %vm6406_vm15, %v12487_v15  ;;  %v10882_v55 = vpop.permute.xlu0 %10881  ;;  %v10674_v17 = vsel %vm1010_vm7, %v10667_v45, %v10669_v63 }
 0x4f7   : > { %12500 = vmatpush1.msk.msra.mxu1 %vm6410_vm14, %v10457_v46  ;;  %10605 = vmatprep.mubr.f32.mxu1 %v15350_v25 }
 0x4f8   : > { %12507 = vmatprep.subr.msk.mxu1 %vm6410_vm14, %v10675_v34  ;;  %v12551_v34 = vld [vmem:[%s16089_s5 + $0x68] sm:$0xf] }
 0x4f9   : > { %v10663_v50 = vpop.permute.xlu1 %10662 }
 0x4fa   : > { %v10672_v28 = vsel %vm1010_vm7, %v10663_v50, %v10665_v16  ;;  %12498 = vmatmul.mubr.msk.f32.vlgmr.msra.gmra.mrb[4].mxu0 %vm6406_vm15, %v12495_v3  ;;  %v10886_v7 = vpop.permute.xlu0 %10885 }
 0x4fb   : > { %12505 = vmatpush1.msk.msra.mxu0 %vm6410_vm14, %v10672_v28  ;;  %10751 = vmatprep.mubr.f32.mxu0 %v15350_v25 }
 0x4fd   : > { %v10884_v19 = vpop.permute.xlu1 %10883 }
 0x4fe   : > { %v10890_v24 = vsel %vm1226_vm6, %v10882_v55, %v10884_v19  ;;  %12501 = vmatmul.mubr.msk.f32.vlgmr.msra.gmra.mrb[4].mxu1 %vm6406_vm15, %v12495_v3  ;;  %v10880_v4 = vpop.permute.xlu0 %10879  ;;  %v10891_v8 = vsel %vm1226_vm6, %v10884_v19, %v10886_v7 }
 0x4ff   : > { %12508 = vmatpush1.msk.msra.mxu1 %vm6410_vm14, %v10674_v17  ;;  %12512 = vmatprep.subr.msk.mxu0 %vm6410_vm14, %v10890_v24  ;;  %v10889_v38 = vsel %vm1226_vm6, %v10880_v4, %v10882_v55 }
 0x500   : > { %10822 = vmatprep.mubr.f32.mxu1 %v15350_v25 }
 0x501   : > { %v10888_v58 = vpop.permute.xlu1 %10887 }
 0x502   : > { %v10892_v54 = vsel %vm1226_vm6, %v10886_v7, %v10888_v58  ;;  %12506 = vmatmul.mubr.msk.f32.vlgmr.msra.gmra.mrb[4].mxu0 %vm6406_vm15, %v12503_v22  ;;  %v11101_v12 = vpop.permute.xlu0 %11100 }
 0x503   : > { %12513 = vmatpush1.msk.msra.mxu0 %vm6410_vm14, %v10889_v38  ;;  %12515 = vmatprep.subr.msk.mxu1 %vm6410_vm14, %v10892_v54 }
 0x504   : > { %10968 = vmatprep.mubr.f32.mxu0 %v15350_v25 }
 0x505   : > { %v11099_v30 = vpop.permute.xlu1 %11098 }
 0x506   : > { %v11107_v9 = vsel %vm1411_vm5, %v11099_v30, %v11101_v12  ;;  %12509 = vmatmul.mubr.msk.f32.vlgmr.msra.gmra.mrb[4].mxu1 %vm6406_vm15, %v12503_v22  ;;  %v11105_v33 = vpop.permute.xlu0 %11104 }
 0x507   : > { %12516 = vmatpush1.msk.msra.mxu1 %vm6410_vm14, %v10891_v8  ;;  %12520 = vmatprep.subr.msk.mxu0 %vm6410_vm14, %v11107_v9 }
 0x508   : > { %11039 = vmatprep.mubr.f32.mxu1 %v15350_v25 }
 0x509   : > { %v11103_v13 = vpop.permute.xlu1 %11102 }
 0x50a   : > { %v11109_v0 = vsel %vm1411_vm5, %v11103_v13, %v11105_v33  ;;  %12514 = vmatmul.mubr.msk.f32.vlgmr.msra.gmra.mrb[4].mxu0 %vm6406_vm15, %v12511_v36  ;;  %v11108_v62 = vsel %vm1411_vm5, %v11101_v12, %v11103_v13 }
 0x50b   : > { %12523 = vmatprep.subr.msk.mxu1 %vm6410_vm14, %v11109_v0  ;;  %11185 = vmatprep.mubr.f32.mxu0 %v15350_v25 }
 0x50d   : > { %v11097_v23 = vpop.permute.xlu1 %11096 }
 0x50e   : > { %v11106_v43 = vsel %vm1411_vm5, %v11097_v23, %v11099_v30  ;;  %12517 = vmatmul.mubr.msk.f32.vlgmr.msra.gmra.mrb[4].mxu1 %vm6406_vm15, %v12511_v36 }
 0x50f   : > { %12524 = vmatpush1.msk.msra.mxu1 %vm6410_vm14, %v11108_v62  ;;  %12521 = vmatpush1.msk.msra.mxu0 %vm6410_vm14, %v11106_v43 }
 0x510   : > { %11256 = vmatprep.mubr.f32.mxu1 %v15350_v25 }
 0x512   : > { %12522 = vmatmul.mubr.msk.f32.vlgmr.msra.gmra.mrb[4].mxu0 %vm6406_vm15, %v12519_v57 }
 0x513   : > { %11402 = vmatprep.mubr.f32.mxu0 %v15350_v25 }
 0x516   : > { %12525 = vmatmul.mubr.msk.f32.vlgmr.msra.gmra.mrb[4].mxu1 %vm6406_vm15, %v12519_v57 }
 0x517   : > { %11473 = vmatprep.mubr.f32.mxu1 %v15350_v25  ;;  %v12838_v25 = vld [vmem:[#allocation2] sm:$0xff] }
 0x51f   : > { %v11316_v27 = vpop.permute.xlu0 %11315 }
 0x523   : > { %v11318_v2 = vpop.permute.xlu1 %11317  ;;  %v11320_v52 = vpop.permute.xlu0 %11319 }
 0x524   : > { %v11324_v14 = vsel %vm1195_vm4, %v11316_v27, %v11318_v2  ;;  %v11325_v44 = vsel %vm1195_vm4, %v11318_v2, %v11320_v52 }
 0x525   : > { %12528 = vmatprep.subr.msk.mxu0 %vm6410_vm14, %v11324_v14 }
 0x527   : > { %v11322_v61 = vpop.permute.xlu1 %11321  ;;  %v11314_v18 = vpop.permute.xlu0 %11313 }
 0x528   : > { %v11326_v26 = vsel %vm1195_vm4, %v11320_v52, %v11322_v61  ;;  %v11323_v6 = vsel %vm1195_vm4, %v11314_v18, %v11316_v27 }
 0x529   : > { %12529 = vmatpush1.msk.msra.mxu0 %vm6410_vm14, %v11323_v6  ;;  %12531 = vmatprep.subr.msk.mxu1 %vm6410_vm14, %v11326_v26 }
 0x52a   : > { %12532 = vmatpush1.msk.msra.mxu1 %vm6410_vm14, %v11325_v44  ;;  %12530 = vmatmul.mubr.msk.f32.vlgmr.msra.gmra.mrb[4].mxu0 %vm6406_vm15, %v12527_v29 }
 0x52b   : > { %12533 = vmatmul.mubr.msk.f32.vlgmr.msra.gmra.mrb[4].mxu1 %vm6406_vm15, %v12527_v29  ;;  %11619 = vmatprep.mubr.f32.mxu0 %v12838_v25 }
 0x52c   : > { %11690 = vmatprep.mubr.f32.mxu1 %v12838_v25 }
 0x533   : > { %v11533_v32 = vpop.permute.xlu1 %11532  ;;  %v11535_v59 = vpop.permute.xlu0 %11534 }
 0x534   : > { %v11541_v1 = vsel %vm979_vm3, %v11533_v32, %v11535_v59 }
 0x535   : > { %12536 = vmatprep.subr.msk.mxu0 %vm6410_vm14, %v11541_v1 }
 0x537   : > { %v11537_v40 = vpop.permute.xlu1 %11536  ;;  %v11539_v60 = vpop.permute.xlu0 %11538 }
 0x538   : > { %v11542_v49 = vsel %vm979_vm3, %v11535_v59, %v11537_v40  ;;  %v11543_v35 = vsel %vm979_vm3, %v11537_v40, %v11539_v60 }
 0x539   : > { %12539 = vmatprep.subr.msk.mxu1 %vm6410_vm14, %v11543_v35 }
 0x53a   : > { %12540 = vmatpush1.msk.msra.mxu1 %vm6410_vm14, %v11542_v49 }
 0x53b   : > { %v11531_v42 = vpop.permute.xlu1 %11530  ;;  %12541 = vmatmul.mubr.msk.f32.vlgmr.msra.gmra.mrb[4].mxu1 %vm6406_vm15, %v12535_v56 }
 0x53c   : > { %v11540_v48 = vsel %vm979_vm3, %v11531_v42, %v11533_v32  ;;  %11907 = vmatprep.mubr.f32.mxu1 %v12838_v25 }
 0x53d   : > { %12537 = vmatpush1.msk.msra.mxu0 %vm6410_vm14, %v11540_v48 }
 0x53e   : > { %12538 = vmatmul.mubr.msk.f32.vlgmr.msra.gmra.mrb[4].mxu0 %vm6406_vm15, %v12535_v56 }
 0x53f   : > { %11836 = vmatprep.mubr.f32.mxu0 %v12838_v25 }
 0x543   : > { %v11750_v31 = vpop.permute.xlu0 %11749 }
 0x547   : > { %v11752_v21 = vpop.permute.xlu1 %11751  ;;  %v11754_v41 = vpop.permute.xlu0 %11753 }
 0x548   : > { %v11758_v37 = vsel %vm597_vm1, %v11750_v31, %v11752_v21  ;;  %v11759_v39 = vsel %vm597_vm1, %v11752_v21, %v11754_v41 }
 0x549   : > { %12544 = vmatprep.subr.msk.mxu0 %vm6410_vm14, %v11758_v37 }
 0x54b   : > { %v11756_v47 = vpop.permute.xlu1 %11755  ;;  %v11748_v5 = vpop.permute.xlu0 %11747 }
 0x54c   : > { %v11760_v20 = vsel %vm597_vm1, %v11754_v41, %v11756_v47  ;;  %v11757_v45 = vsel %vm597_vm1, %v11748_v5, %v11750_v31 }
 0x54d   : > { %12545 = vmatpush1.msk.msra.mxu0 %vm6410_vm14, %v11757_v45  ;;  %12547 = vmatprep.subr.msk.mxu1 %vm6410_vm14, %v11760_v20 }
 0x54e   : > { %12548 = vmatpush1.msk.msra.mxu1 %vm6410_vm14, %v11759_v39  ;;  %12546 = vmatmul.mubr.msk.f32.vlgmr.msra.gmra.mrb[4].mxu0 %vm6406_vm15, %v12543_v51 }
 0x54f   : > { %12549 = vmatmul.mubr.msk.f32.vlgmr.msra.gmra.mrb[4].mxu1 %vm6406_vm15, %v12543_v51  ;;  %12053 = vmatprep.mubr.f32.mxu0 %v12838_v25 }
 0x550   : > { %12124 = vmatprep.mubr.f32.mxu1 %v12838_v25 }
 0x557   : > { %v11967_v15 = vpop.permute.xlu1 %11966  ;;  %v11969_v16 = vpop.permute.xlu0 %11968 }
 0x558   : > { %v11975_v10 = vsel %vm555_vm2, %v11967_v15, %v11969_v16 }
 0x559   : > { %12552 = vmatprep.subr.msk.mxu0 %vm6410_vm14, %v11975_v10 }
 0x55b   : > { %v11971_v11 = vpop.permute.xlu1 %11970  ;;  %v11973_v53 = vpop.permute.xlu0 %11972 }
 0x55c   : > { %v11976_v63 = vsel %vm555_vm2, %v11969_v16, %v11971_v11  ;;  %v11977_v46 = vsel %vm555_vm2, %v11971_v11, %v11973_v53 }
 0x55d   : > { %12555 = vmatprep.subr.msk.mxu1 %vm6410_vm14, %v11977_v46 }
 0x55e   : > { %12556 = vmatpush1.msk.msra.mxu1 %vm6410_vm14, %v11976_v63 }
 0x55f   : > { %v11965_v55 = vpop.permute.xlu1 %11964  ;;  %12557 = vmatmul.mubr.msk.f32.vlgmr.msra.gmra.mrb[4].mxu1 %vm6406_vm15, %v12551_v34 }
 0x560   : > { %v11974_v3 = vsel %vm555_vm2, %v11965_v55, %v11967_v15 }
 0x561   : > { %12553 = vmatpush1.msk.msra.mxu0 %vm6410_vm14, %v11974_v3 }
 0x562   : > { %12554 = vmatmul.mubr.msk.f32.vlgmr.msra.gmra.mrb[4].mxu0 %vm6406_vm15, %v12551_v34 }
 0x56c   : > { %v12139_v50 = vpop.permute.xlu0 %12138 }
 0x632   : > { %v12126_v28 = vpop.f32.mrb[4].mxu1 }
 0x633   : > { %v12143_v7 = vadd.f32 %v12139_v50, %v12126_v28  ;;  %v12128_v19 = vpop.f32.mrb[5].mxu1 }
 0x634   : > { %v12144_v17 = vadd.f32 %v12139_v50, %v12128_v19 }
 0x635   : > { %v12147_v24 = vmax.f32 %v12143_v7, 0.0  ;;  %v12055_v4 = vpop.f32.mrb[4].mxu0 }
 0x636   : > { %v12148_v22 = vmax.f32 %v12144_v17, 0.0  ;;  %v12141_v58 = vadd.f32 %v12139_v50, %v12055_v4  ;;  %v12057_v38 = vpop.f32.mrb[5].mxu0 }
 0x637   : > { %v12142_v54 = vadd.f32 %v12139_v50, %v12057_v38 }
 0x638   : > { %v12154_v12 = vcombine.low %v12147_v24, %v12148_v22  ;;  %v12145_v30 = vmax.f32 %v12141_v58, 0.0 }
 0x639   : > { %v12146_v8 = vmax.f32 %v12142_v54, 0.0 }
 0x63a   : > { %12158 = vst [vmem:[%s322_s16 + $0x8] sm:$0xff] %v12154_v12 }
 0x63b   : > { %v12153_v9 = vcombine.low %v12145_v30, %v12146_v8 }
 0x63d   : > { %12157 = vst [vmem:[%s322_s16] sm:$0xff] %v12153_v9 }
 0x63e PF: > { %s18_s27 = sadd.s32 1, %s12845_s27  }
 0x63f   : > { %p15_p4 = scmp.ge.s32.totalorder %s18_s27, 4  }
 0x641   :  { %17 = sbr.rel (!%p15_p4) target bundleno = 1 (0x1), region = 163 }

</bundles_post_ra>
